<compile_context>
chip_gen: v5e
topology: v5e:2x2
jax: 0.10.0
libtpu: 0.0.40
codegen_flags: <defaults>
</compile_context>

<pallas_src>
import functools

import jax
import jax.numpy as jnp
from jax import lax
from jax.experimental import pallas as pl
from jax.experimental.pallas import tpu as pltpu

# ---------------- model hyper-parameters (small, deterministic) ------------
B_IN, C_IN, H_IN, W_IN = 2, 4, 16, 16      # NCHW student/teacher input
PATCH = 4                                  # patch size -> 16 patches / image
EMBED = 32                                 # model_embed_dim
NUM_HEADS = 2
NUM_LAYERS = 3
MLP_DIM = 4 * EMBED
TOP_K = 2                                  # average_top_k_layers
NORMALIZE_TARGETS = True
N_MASKED = 8                               # total masked tokens (static)
EPS = 1e-5                                 # F.layer_norm default eps

SEQ = (H_IN // PATCH) * (W_IN // PATCH)    # 16 patches per image
ROWS = B_IN * SEQ                          # 32 token rows
HEAD_DIM = EMBED // NUM_HEADS              # 16
PATCH_DIM = C_IN * PATCH * PATCH           # 64


# ============================ in-kernel helpers ==============================


def _ln_rows(x, g=None, b=None):
    """Row-wise LayerNorm over the last dim (optionally affine)."""
    mean = jnp.mean(x, axis=-1, keepdims=True)
    var = jnp.mean((x - mean) ** 2, axis=-1, keepdims=True)
    xn = (x - mean) * lax.rsqrt(var + EPS)
    if g is not None:
        xn = xn * g + b
    return xn


# ============================ the fused kernel ==============================


def _data2vec_kernel(idx_ref,
                     xp_ref, maskf_ref, bias_ref,
                     pw_ref, pb_ref, mtok_ref,
                     ln1g_ref, ln1b_ref, wqkv_ref, bqkv_ref, wo_ref, bo_ref,
                     ln2g_ref, ln2b_ref, w1_ref, b1_ref, w2_ref, b2_ref,
                     hw_ref, hb_ref,
                     out_ref,
                     h_scratch, sel_scratch,
                     *, student_only=False):
    """Fused Data2Vec forward.  One grid step = one full encoder pass."""
    p = pl.program_id(0)                       # 0 = student, 1 = teacher
    L, H, Dh = NUM_LAYERS, NUM_HEADS, HEAD_DIM
    scale = 1.0 / float(Dh) ** 0.5

    # ---- patch embedding + mask-token blending (fused, first step) --------
    tok = (jnp.dot(xp_ref[0], pw_ref[0], preferred_element_type=jnp.float32)
           + pb_ref[0])
    m = maskf_ref[0]                           # (ROWS, 1); all-zero for teacher
    h = tok * (1.0 - m) + mtok_ref[0] * m      # (ROWS, D)

    bias = bias_ref[...]                       # (ROWS, ROWS) block-diag 0 / -1e30

    # ---- NUM_LAYERS pre-LN transformer blocks, statically unrolled --------
    hs_last = []
    for l in range(L):
        # attention (pre-LN), per-head weights pre-split -> no lane slicing
        hn = _ln_rows(h, ln1g_ref[0, l], ln1b_ref[0, l])
        attn = None
        for hh in range(H):
            qi = (l * 3 + 0) * H + hh
            ki = (l * 3 + 1) * H + hh
            vi = (l * 3 + 2) * H + hh
            q = jnp.dot(hn, wqkv_ref[0, qi],
                        preferred_element_type=jnp.float32) + bqkv_ref[0, qi]
            k = jnp.dot(hn, wqkv_ref[0, ki],
                        preferred_element_type=jnp.float32) + bqkv_ref[0, ki]
            v = jnp.dot(hn, wqkv_ref[0, vi],
                        preferred_element_type=jnp.float32) + bqkv_ref[0, vi]
            s = lax.dot_general(q, k, (((1,), (1,)), ((), ())),
                                preferred_element_type=jnp.float32) * scale + bias
            s = s - jnp.max(s, axis=-1, keepdims=True)
            e = jnp.exp(s)
            prob = e / jnp.sum(e, axis=-1, keepdims=True)       # exact softmax
            o = jnp.dot(prob, v, preferred_element_type=jnp.float32)  # (ROWS, Dh)
            c = jnp.dot(o, wo_ref[0, l * H + hh],
                        preferred_element_type=jnp.float32)           # (ROWS, D)
            attn = c if attn is None else attn + c
        h = h + attn + bo_ref[0, l]

        # MLP (pre-LN)
        hn2 = _ln_rows(h, ln2g_ref[0, l], ln2b_ref[0, l])
        g = jnp.dot(hn2, w1_ref[0, l], preferred_element_type=jnp.float32) + b1_ref[0, l]
        # TODO(synk): PyTorch nn.GELU defaults to exact erf GELU; tanh approx is
        # used here for robust Mosaic lowering (synthetic encoder only).
        g = jax.nn.gelu(g, approximate=True)
        h = h + jnp.dot(g, w2_ref[0, l], preferred_element_type=jnp.float32) + b2_ref[0, l]

        if l >= L - TOP_K:
            hs_last.append(h)

    if student_only:                           # encoder-only path (teacher=None)
        out_ref[0] = h
        return

    # ---- per-path epilogue: target / masked gather / regression head ------
    @pl.when(p == 0)                           # student: keep final hidden state
    def _():
        h_scratch[...] = h

    @pl.when(p == 1)                           # teacher: Data2Vec target
    def _():
        acc = _ln_rows(hs_last[0])
        for t in range(1, TOP_K):
            acc = acc + _ln_rows(hs_last[t])
        tgt = acc * (1.0 / TOP_K)
        if NORMALIZE_TARGETS:
            tgt = _ln_rows(tgt)
        h_scratch[...] = tgt

    # masked-row gather; mask_indices live in SMEM via scalar prefetch
    for i in range(N_MASKED):
        sel_scratch[pl.ds(i, 1), :] = h_scratch[pl.ds(idx_ref[i], 1), :]

    @pl.when(p == 0)                           # student: regression head
    def _():
        out_ref[0] = (jnp.dot(sel_scratch[...], hw_ref[...],
                              preferred_element_type=jnp.float32) + hb_ref[...])

    @pl.when(p == 1)                           # teacher: target rows as-is
    def _():
        out_ref[0] = sel_scratch[...]


# ============================ wrappers ======================================


def _patchify(x):
    """(N, B, C, H, W) -> (N, B*S, C*P*P); row-major over (b, h_patch, w_patch)."""
    n = x.shape[0]
    P = PATCH
    x = x.reshape(n, B_IN, C_IN, H_IN // P, P, W_IN // P, P)
    x = x.transpose(0, 1, 3, 5, 2, 4, 6)
    return x.reshape(n, ROWS, PATCH_DIM)


def _in_specs():
    L, D, Dh, H, MD = NUM_LAYERS, EMBED, HEAD_DIM, NUM_HEADS, MLP_DIM

    def per_path(*dims):                       # stacked (2, ...) arrays: block i
        n = len(dims)
        return pl.BlockSpec((1,) + dims, lambda i, idx, n=n: (i,) + (0,) * n)

    def shared(*dims):                         # shared arrays: single full block
        n = len(dims)
        return pl.BlockSpec(dims, lambda i, idx, n=n: (0,) * n)

    return [
        per_path(ROWS, PATCH_DIM),                                  # patchified input
        per_path(ROWS, 1),                                          # mask floats
        shared(ROWS, ROWS),                                         # attention bias
        per_path(PATCH_DIM, D), per_path(1, D), per_path(1, D),     # patch w/b, mask tok
        per_path(L, 1, D), per_path(L, 1, D),                       # ln1 g/b
        per_path(L * 3 * H, D, Dh), per_path(L * 3 * H, 1, Dh),     # qkv per-head w/b
        per_path(L * H, Dh, D), per_path(L, 1, D),                  # out-proj per-head w, b
        per_path(L, 1, D), per_path(L, 1, D),                       # ln2 g/b
        per_path(L, D, MD), per_path(L, 1, MD),                     # mlp fc1 w/b
        per_path(L, MD, D), per_path(L, 1, D),                      # mlp fc2 w/b
        shared(D, D), shared(1, D),                                 # regression head w/b
    ]


def data2vec_forward(params, student_input, teacher_input=None, mask=None,
                     mask_indices=None):
    stacked = params["stacked"]
    D = EMBED

    # block-diagonal (per-image) additive attention bias — tiny constant input
    img_id = jnp.arange(ROWS, dtype=jnp.int32) // SEQ
    attn_bias = jnp.where(img_id[:, None] == img_id[None, :], 0.0, -1e30
                          ).astype(jnp.float32)

    mask_f = (jnp.zeros((ROWS, 1), jnp.float32) if mask is None
              else mask.reshape(ROWS, 1).astype(jnp.float32))

    weight_args = (
        stacked["patch_w"], stacked["patch_b"], stacked["mask_tok"],
        stacked["ln1_g"], stacked["ln1_b"], stacked["wqkv"], stacked["bqkv"],
        stacked["wo"], stacked["bo"], stacked["ln2_g"], stacked["ln2_b"],
        stacked["w1"], stacked["b1"], stacked["w2"], stacked["b2"],
        params["head_w"], params["head_b"],
    )
    scratch = [pltpu.VMEM((ROWS, D), jnp.float32),
               pltpu.VMEM((N_MASKED, D), jnp.float32)]

    if teacher_input is None:
        # encoder-only path: return the final student hidden states (encoder_out)
        xp = _patchify(student_input[None])
        out = pl.pallas_call(
            functools.partial(_data2vec_kernel, student_only=True),
            out_shape=jax.ShapeDtypeStruct((1, ROWS, D), jnp.float32),
            grid_spec=pltpu.PrefetchScalarGridSpec(
                num_scalar_prefetch=1, grid=(1,),
                in_specs=_in_specs(),
                out_specs=pl.BlockSpec((1, ROWS, D), lambda i, idx: (i, 0, 0)),
                scratch_shapes=scratch),
            compiler_params=pltpu.CompilerParams(
                dimension_semantics=("arbitrary",)),
        )(jnp.zeros((N_MASKED,), jnp.int32), xp, mask_f[None], attn_bias,
          *weight_args)
        return out[0]

    # main training path: student + teacher in ONE call, grid axis = path
    xp = _patchify(jnp.stack([student_input, teacher_input], axis=0))
    maskf = jnp.stack([mask_f, jnp.zeros((ROWS, 1), jnp.float32)], axis=0)
    out = pl.pallas_call(
        _data2vec_kernel,
        out_shape=jax.ShapeDtypeStruct((2, N_MASKED, D), jnp.float32),
        grid_spec=pltpu.PrefetchScalarGridSpec(
            num_scalar_prefetch=1, grid=(2,),
            in_specs=_in_specs(),
            out_specs=pl.BlockSpec((1, N_MASKED, D), lambda i, idx: (i, 0, 0)),
            scratch_shapes=scratch),
        compiler_params=pltpu.CompilerParams(
            dimension_semantics=("parallel",)),     # 2 TCs on v7x
    )(mask_indices.astype(jnp.int32), xp, maskf, attn_bias, *weight_args)
    return out[0], out[1]


# ============================ parameter init ================================


def _init_encoder(key):
    D, H, Dh, L = EMBED, NUM_HEADS, HEAD_DIM, NUM_LAYERS
    keys = iter(jax.random.split(key, 64))

    def dense(din, dout):
        w = jax.random.normal(next(keys), (din, dout), jnp.float32) * (1.0 / float(din) ** 0.5)
        return w, jnp.zeros((dout,), jnp.float32)

    def split_cols(w):            # (D, D) -> (H, D, Dh): per-head column blocks
        return w.reshape(D, H, Dh).transpose(1, 0, 2)

    p = {}
    w, b = dense(PATCH_DIM, D)
    p["patch_w"], p["patch_b"] = w, b.reshape(1, D)
    p["mask_tok"] = (jax.random.normal(next(keys), (D,), jnp.float32) * 0.02).reshape(1, D)

    ln1g, ln1b, ln2g, ln2b = [], [], [], []
    wqkv, bqkv, wo, bo, w1, b1, w2, b2 = [], [], [], [], [], [], [], []
    for _ in range(L):
        ln1g.append(jnp.ones((1, D), jnp.float32))
        ln1b.append(jnp.zeros((1, D), jnp.float32))
        ln2g.append(jnp.ones((1, D), jnp.float32))
        ln2b.append(jnp.zeros((1, D), jnp.float32))
        wq, bq = dense(D, D)
        wk, bk = dense(D, D)
        wv, bv = dense(D, D)
        wqkv.append(jnp.stack([split_cols(wq), split_cols(wk), split_cols(wv)],
                              axis=0))                               # (3, H, D, Dh)
        bqkv.append(jnp.stack([bq.reshape(H, 1, Dh), bk.reshape(H, 1, Dh),
                               bv.reshape(H, 1, Dh)], axis=0))       # (3, H, 1, Dh)
        w, b = dense(D, D)
        wo.append(w.reshape(H, Dh, D))            # per-head row blocks of out-proj
        bo.append(b.reshape(1, D))
        w, b = dense(D, MLP_DIM); w1.append(w); b1.append(b.reshape(1, MLP_DIM))
        w, b = dense(MLP_DIM, D); w2.append(w); b2.append(b.reshape(1, D))

    p["ln1_g"], p["ln1_b"] = jnp.stack(ln1g), jnp.stack(ln1b)        # (L, 1, D)
    p["ln2_g"], p["ln2_b"] = jnp.stack(ln2g), jnp.stack(ln2b)
    p["wqkv"] = jnp.stack(wqkv).reshape(L * 3 * H, D, Dh)
    p["bqkv"] = jnp.stack(bqkv).reshape(L * 3 * H, 1, Dh)
    p["wo"] = jnp.stack(wo).reshape(L * H, Dh, D)
    p["bo"] = jnp.stack(bo)                                          # (L, 1, D)
    p["w1"], p["b1"] = jnp.stack(w1), jnp.stack(b1)
    p["w2"], p["b2"] = jnp.stack(w2), jnp.stack(b2)
    return p


def init_params(key):
    student = _init_encoder(jax.random.fold_in(key, 0))
    teacher = jax.tree_util.tree_map(jnp.copy, student)    # EMA teacher = copy at init
    stacked = jax.tree_util.tree_map(lambda a, b: jnp.stack([a, b], axis=0),
                                     student, teacher)
    kh = jax.random.fold_in(key, 1)
    head_w = jax.random.normal(kh, (EMBED, EMBED), jnp.float32) * (1.0 / float(EMBED) ** 0.5)
    head_b = jnp.zeros((1, EMBED), jnp.float32)
    return {"stacked": stacked, "head_w": head_w, "head_b": head_b}


# =================================== main ===================================

if __name__ == "__main__":
    key = jax.random.PRNGKey(0)
    params = init_params(key)

    k_s, k_t = jax.random.split(jax.random.fold_in(key, 1))
    student = jax.random.normal(k_s, (B_IN, C_IN, H_IN, W_IN), jnp.float32)
    teacher = jax.random.normal(k_t, (B_IN, C_IN, H_IN, W_IN), jnp.float32)

    # deterministic mask: 4 masked patches per sample (8 total = N_MASKED)
    masked_pos = jnp.array([[1, 3, 7, 12], [0, 5, 9, 14]], dtype=jnp.int32)
    mask = jnp.zeros((B_IN, SEQ), dtype=bool)
    mask = mask.at[jnp.arange(B_IN)[:, None], masked_pos].set(True)
    mask_indices = jnp.nonzero(mask.reshape(-1), size=N_MASKED)[0].astype(jnp.int32)

    x_out, y_out = data2vec_forward(params, student, teacher,
                                    mask=mask, mask_indices=mask_indices)
    jax.block_until_ready((x_out, y_out))
    assert x_out.shape == (N_MASKED, EMBED) and y_out.shape == (N_MASKED, EMBED)
    assert bool(jnp.all(jnp.isfinite(x_out))) and bool(jnp.all(jnp.isfinite(y_out)))
    print("KERNEL_OK")
</pallas_src>

<mosaic_0001>
module attributes {stable_mosaic.version = 11 : i64} {
  func.func @_data2vec_kernel(%arg0: i32, %arg1: memref<8xi32, #tpu.memory_space<smem>>, %arg2: memref<1x32x64xf32, #tpu.memory_space<vmem>>, %arg3: memref<1x32x1xf32, #tpu.memory_space<vmem>>, %arg4: memref<32x32xf32, #tpu.memory_space<vmem>>, %arg5: memref<1x64x32xf32, #tpu.memory_space<vmem>>, %arg6: memref<1x1x32xf32, #tpu.memory_space<vmem>>, %arg7: memref<1x1x32xf32, #tpu.memory_space<vmem>>, %arg8: memref<1x3x1x32xf32, #tpu.memory_space<vmem>>, %arg9: memref<1x3x1x32xf32, #tpu.memory_space<vmem>>, %arg10: memref<1x18x32x16xf32, #tpu.memory_space<vmem>>, %arg11: memref<1x18x1x16xf32, #tpu.memory_space<vmem>>, %arg12: memref<1x6x16x32xf32, #tpu.memory_space<vmem>>, %arg13: memref<1x3x1x32xf32, #tpu.memory_space<vmem>>, %arg14: memref<1x3x1x32xf32, #tpu.memory_space<vmem>>, %arg15: memref<1x3x1x32xf32, #tpu.memory_space<vmem>>, %arg16: memref<1x3x32x128xf32, #tpu.memory_space<vmem>>, %arg17: memref<1x3x1x128xf32, #tpu.memory_space<vmem>>, %arg18: memref<1x3x128x32xf32, #tpu.memory_space<vmem>>, %arg19: memref<1x3x1x32xf32, #tpu.memory_space<vmem>>, %arg20: memref<32x32xf32, #tpu.memory_space<vmem>>, %arg21: memref<1x32xf32, #tpu.memory_space<vmem>>, %arg22: memref<1x8x32xf32, #tpu.memory_space<vmem>>, %arg23: memref<32x32xf32, #tpu.memory_space<vmem>>, %arg24: memref<8x32xf32, #tpu.memory_space<vmem>>) attributes {dimension_semantics = [#tpu.dimension_semantics<parallel>], iteration_bounds = array<i64: 2>, scalar_prefetch = 1 : i64, scratch_operands = 2 : i64, tpu.core_type = #tpu.core_type<tc>, window_params = [{transform_indices = @transform_0, window_bounds = array<i64: 1, 32, 64>}, {transform_indices = @transform_1, window_bounds = array<i64: 1, 32, 1>}, {pipeline_mode = #tpu.pipeline_mode<synchronous>, transform_indices = @transform_2, window_bounds = array<i64: 32, 32>}, {transform_indices = @transform_3, window_bounds = array<i64: 1, 64, 32>}, {transform_indices = @transform_4, window_bounds = array<i64: 1, 1, 32>}, {transform_indices = @transform_5, window_bounds = array<i64: 1, 1, 32>}, {transform_indices = @transform_6, window_bounds = array<i64: 1, 3, 1, 32>}, {transform_indices = @transform_7, window_bounds = array<i64: 1, 3, 1, 32>}, {transform_indices = @transform_8, window_bounds = array<i64: 1, 18, 32, 16>}, {transform_indices = @transform_9, window_bounds = array<i64: 1, 18, 1, 16>}, {transform_indices = @transform_10, window_bounds = array<i64: 1, 6, 16, 32>}, {transform_indices = @transform_11, window_bounds = array<i64: 1, 3, 1, 32>}, {transform_indices = @transform_12, window_bounds = array<i64: 1, 3, 1, 32>}, {transform_indices = @transform_13, window_bounds = array<i64: 1, 3, 1, 32>}, {transform_indices = @transform_14, window_bounds = array<i64: 1, 3, 32, 128>}, {transform_indices = @transform_15, window_bounds = array<i64: 1, 3, 1, 128>}, {transform_indices = @transform_16, window_bounds = array<i64: 1, 3, 128, 32>}, {transform_indices = @transform_17, window_bounds = array<i64: 1, 3, 1, 32>}, {pipeline_mode = #tpu.pipeline_mode<synchronous>, transform_indices = @transform_18, window_bounds = array<i64: 32, 32>}, {pipeline_mode = #tpu.pipeline_mode<synchronous>, transform_indices = @transform_19, window_bounds = array<i64: 1, 32>}, {transform_indices = @transform_20, window_bounds = array<i64: 1, 8, 32>}]} {
    %c0 = arith.constant 0 : index
    %c0_0 = arith.constant 0 : index
    %c0_1 = arith.constant 0 : index
    %0 = vector.load %arg2[%c0, %c0_0, %c0_1] : memref<1x32x64xf32, #tpu.memory_space<vmem>>, vector<1x32x64xf32>
    %1 = vector.shape_cast %0 : vector<1x32x64xf32> to vector<32x64xf32>
    %c0_2 = arith.constant 0 : index
    %c0_3 = arith.constant 0 : index
    %c0_4 = arith.constant 0 : index
    %2 = vector.load %arg5[%c0_2, %c0_3, %c0_4] : memref<1x64x32xf32, #tpu.memory_space<vmem>>, vector<1x64x32xf32>
    %3 = vector.shape_cast %2 : vector<1x64x32xf32> to vector<64x32xf32>
    %cst = arith.constant dense<0.000000e+00> : vector<32x32xf32>
    %4 = tpu.matmul %1, %3, %cst {dimension_numbers = #tpu.dot_dimension_numbers<[1], [0], [0], [1], [0, 0, 1, 1], [], []>} : vector<32x64xf32>, vector<64x32xf32>, vector<32x32xf32> -> vector<32x32xf32>
    %c0_5 = arith.constant 0 : index
    %c0_6 = arith.constant 0 : index
    %c0_7 = arith.constant 0 : index
    %5 = vector.load %arg6[%c0_5, %c0_6, %c0_7] : memref<1x1x32xf32, #tpu.memory_space<vmem>>, vector<1x1x32xf32>
    %6 = vector.shape_cast %5 : vector<1x1x32xf32> to vector<1x32xf32>
    %7 = vector.broadcast %6 : vector<1x32xf32> to vector<32x32xf32>
    %8 = arith.addf %4, %7 : vector<32x32xf32>
    %c0_8 = arith.constant 0 : index
    %c0_9 = arith.constant 0 : index
    %c0_10 = arith.constant 0 : index
    %9 = vector.load %arg3[%c0_8, %c0_9, %c0_10] : memref<1x32x1xf32, #tpu.memory_space<vmem>>, vector<1x32x1xf32>
    %10 = vector.shape_cast %9 : vector<1x32x1xf32> to vector<32x1xf32>
    %cst_11 = arith.constant 1.000000e+00 : f32
    %11 = vector.broadcast %cst_11 : f32 to vector<32x1xf32>
    %12 = arith.subf %11, %10 : vector<32x1xf32>
    %13 = vector.broadcast %12 : vector<32x1xf32> to vector<32x32xf32>
    %14 = arith.mulf %8, %13 : vector<32x32xf32>
    %c0_12 = arith.constant 0 : index
    %c0_13 = arith.constant 0 : index
    %c0_14 = arith.constant 0 : index
    %15 = vector.load %arg7[%c0_12, %c0_13, %c0_14] : memref<1x1x32xf32, #tpu.memory_space<vmem>>, vector<1x1x32xf32>
    %16 = vector.shape_cast %15 : vector<1x1x32xf32> to vector<1x32xf32>
    %17 = vector.broadcast %16 : vector<1x32xf32> to vector<32x32xf32>
    %18 = vector.broadcast %10 : vector<32x1xf32> to vector<32x32xf32>
    %19 = arith.mulf %17, %18 : vector<32x32xf32>
    %20 = arith.addf %14, %19 : vector<32x32xf32>
    %c0_15 = arith.constant 0 : index
    %c0_16 = arith.constant 0 : index
    %21 = vector.load %arg4[%c0_15, %c0_16] : memref<32x32xf32, #tpu.memory_space<vmem>>, vector<32x32xf32>
    %c0_17 = arith.constant 0 : index
    %c0_18 = arith.constant 0 : index
    %c0_19 = arith.constant 0 : index
    %c0_20 = arith.constant 0 : index
    %22 = vector.load %arg8[%c0_17, %c0_18, %c0_19, %c0_20] : memref<1x3x1x32xf32, #tpu.memory_space<vmem>>, vector<1x1x1x32xf32>
    %23 = vector.shape_cast %22 : vector<1x1x1x32xf32> to vector<1x32xf32>
    %c0_21 = arith.constant 0 : index
    %c0_22 = arith.constant 0 : index
    %c0_23 = arith.constant 0 : index
    %c0_24 = arith.constant 0 : index
    %24 = vector.load %arg9[%c0_21, %c0_22, %c0_23, %c0_24] : memref<1x3x1x32xf32, #tpu.memory_space<vmem>>, vector<1x1x1x32xf32>
    %25 = vector.shape_cast %24 : vector<1x1x1x32xf32> to vector<1x32xf32>
    %cst_25 = arith.constant dense<0.000000e+00> : vector<32xf32>
    %26 = vector.multi_reduction <add>, %20, %cst_25 [1] : vector<32x32xf32> to vector<32xf32>
    %27 = vector.shape_cast %26 : vector<32xf32> to vector<32x1xf32>
    %cst_26 = arith.constant 3.200000e+01 : f32
    %28 = vector.broadcast %cst_26 : f32 to vector<32x1xf32>
    %29 = arith.divf %27, %28 : vector<32x1xf32>
    %30 = vector.broadcast %29 : vector<32x1xf32> to vector<32x32xf32>
    %31 = arith.subf %20, %30 : vector<32x32xf32>
    %32 = arith.mulf %31, %31 : vector<32x32xf32>
    %cst_27 = arith.constant dense<0.000000e+00> : vector<32xf32>
    %33 = vector.multi_reduction <add>, %32, %cst_27 [1] : vector<32x32xf32> to vector<32xf32>
    %34 = vector.shape_cast %33 : vector<32xf32> to vector<32x1xf32>
    %cst_28 = arith.constant 3.200000e+01 : f32
    %35 = vector.broadcast %cst_28 : f32 to vector<32x1xf32>
    %36 = arith.divf %34, %35 : vector<32x1xf32>
    %37 = vector.broadcast %29 : vector<32x1xf32> to vector<32x32xf32>
    %38 = arith.subf %20, %37 : vector<32x32xf32>
    %cst_29 = arith.constant 9.99999974E-6 : f32
    %39 = vector.broadcast %cst_29 : f32 to vector<32x1xf32>
    %40 = arith.addf %36, %39 : vector<32x1xf32>
    %41 = math.rsqrt %40 : vector<32x1xf32>
    %42 = vector.broadcast %41 : vector<32x1xf32> to vector<32x32xf32>
    %43 = arith.mulf %38, %42 : vector<32x32xf32>
    %44 = vector.broadcast %23 : vector<1x32xf32> to vector<32x32xf32>
    %45 = arith.mulf %43, %44 : vector<32x32xf32>
    %46 = vector.broadcast %25 : vector<1x32xf32> to vector<32x32xf32>
    %47 = arith.addf %45, %46 : vector<32x32xf32>
    %c0_30 = arith.constant 0 : index
    %c0_31 = arith.constant 0 : index
    %c0_32 = arith.constant 0 : index
    %c0_33 = arith.constant 0 : index
    %48 = vector.load %arg10[%c0_30, %c0_31, %c0_32, %c0_33] : memref<1x18x32x16xf32, #tpu.memory_space<vmem>>, vector<1x1x32x16xf32>
    %49 = vector.shape_cast %48 : vector<1x1x32x16xf32> to vector<32x16xf32>
    %cst_34 = arith.constant dense<0.000000e+00> : vector<32x16xf32>
    %50 = tpu.matmul %47, %49, %cst_34 {dimension_numbers = #tpu.dot_dimension_numbers<[1], [0], [0], [1], [0, 0, 1, 1], [], []>} : vector<32x32xf32>, vector<32x16xf32>, vector<32x16xf32> -> vector<32x16xf32>
    %c0_35 = arith.constant 0 : index
    %c0_36 = arith.constant 0 : index
    %c0_37 = arith.constant 0 : index
    %c0_38 = arith.constant 0 : index
    %51 = vector.load %arg11[%c0_35, %c0_36, %c0_37, %c0_38] : memref<1x18x1x16xf32, #tpu.memory_space<vmem>>, vector<1x1x1x16xf32>
    %52 = vector.shape_cast %51 : vector<1x1x1x16xf32> to vector<1x16xf32>
    %53 = vector.broadcast %52 : vector<1x16xf32> to vector<32x16xf32>
    %54 = arith.addf %50, %53 : vector<32x16xf32>
    %c0_39 = arith.constant 0 : index
    %c2 = arith.constant 2 : index
    %c0_40 = arith.constant 0 : index
    %c0_41 = arith.constant 0 : index
    %55 = vector.load %arg10[%c0_39, %c2, %c0_40, %c0_41] : memref<1x18x32x16xf32, #tpu.memory_space<vmem>>, vector<1x1x32x16xf32>
    %56 = vector.shape_cast %55 : vector<1x1x32x16xf32> to vector<32x16xf32>
    %cst_42 = arith.constant dense<0.000000e+00> : vector<32x16xf32>
    %57 = tpu.matmul %47, %56, %cst_42 {dimension_numbers = #tpu.dot_dimension_numbers<[1], [0], [0], [1], [0, 0, 1, 1], [], []>} : vector<32x32xf32>, vector<32x16xf32>, vector<32x16xf32> -> vector<32x16xf32>
    %c0_43 = arith.constant 0 : index
    %c2_44 = arith.constant 2 : index
    %c0_45 = arith.constant 0 : index
    %c0_46 = arith.constant 0 : index
    %58 = vector.load %arg11[%c0_43, %c2_44, %c0_45, %c0_46] : memref<1x18x1x16xf32, #tpu.memory_space<vmem>>, vector<1x1x1x16xf32>
    %59 = vector.shape_cast %58 : vector<1x1x1x16xf32> to vector<1x16xf32>
    %60 = vector.broadcast %59 : vector<1x16xf32> to vector<32x16xf32>
    %61 = arith.addf %57, %60 : vector<32x16xf32>
    %c0_47 = arith.constant 0 : index
    %c4 = arith.constant 4 : index
    %c0_48 = arith.constant 0 : index
    %c0_49 = arith.constant 0 : index
    %62 = vector.load %arg10[%c0_47, %c4, %c0_48, %c0_49] : memref<1x18x32x16xf32, #tpu.memory_space<vmem>>, vector<1x1x32x16xf32>
    %63 = vector.shape_cast %62 : vector<1x1x32x16xf32> to vector<32x16xf32>
    %cst_50 = arith.constant dense<0.000000e+00> : vector<32x16xf32>
    %64 = tpu.matmul %47, %63, %cst_50 {dimension_numbers = #tpu.dot_dimension_numbers<[1], [0], [0], [1], [0, 0, 1, 1], [], []>} : vector<32x32xf32>, vector<32x16xf32>, vector<32x16xf32> -> vector<32x16xf32>
    %c0_51 = arith.constant 0 : index
    %c4_52 = arith.constant 4 : index
    %c0_53 = arith.constant 0 : index
    %c0_54 = arith.constant 0 : index
    %65 = vector.load %arg11[%c0_51, %c4_52, %c0_53, %c0_54] : memref<1x18x1x16xf32, #tpu.memory_space<vmem>>, vector<1x1x1x16xf32>
    %66 = vector.shape_cast %65 : vector<1x1x1x16xf32> to vector<1x16xf32>
    %67 = vector.broadcast %66 : vector<1x16xf32> to vector<32x16xf32>
    %68 = arith.addf %64, %67 : vector<32x16xf32>
    %cst_55 = arith.constant dense<0.000000e+00> : vector<32x32xf32>
    %69 = tpu.matmul %54, %61, %cst_55 {dimension_numbers = #tpu.dot_dimension_numbers<[1], [1], [0], [0], [0, 0, 1, 0], [], []>} : vector<32x16xf32>, vector<32x16xf32>, vector<32x32xf32> -> vector<32x32xf32>
    %cst_56 = arith.constant 2.500000e-01 : f32
    %70 = vector.broadcast %cst_56 : f32 to vector<32x32xf32>
    %71 = arith.mulf %69, %70 : vector<32x32xf32>
    %72 = arith.addf %71, %21 : vector<32x32xf32>
    %cst_57 = arith.constant dense<0xFF800000> : vector<32xf32>
    %73 = vector.multi_reduction <maximumf>, %72, %cst_57 [1] : vector<32x32xf32> to vector<32xf32>
    %74 = vector.shape_cast %73 : vector<32xf32> to vector<32x1xf32>
    %75 = vector.broadcast %74 : vector<32x1xf32> to vector<32x32xf32>
    %76 = arith.subf %72, %75 : vector<32x32xf32>
    %77 = math.exp %76 : vector<32x32xf32>
    %cst_58 = arith.constant dense<0.000000e+00> : vector<32xf32>
    %78 = vector.multi_reduction <add>, %77, %cst_58 [1] : vector<32x32xf32> to vector<32xf32>
    %79 = vector.shape_cast %78 : vector<32xf32> to vector<32x1xf32>
    %80 = vector.broadcast %79 : vector<32x1xf32> to vector<32x32xf32>
    %81 = arith.divf %77, %80 : vector<32x32xf32>
    %cst_59 = arith.constant dense<0.000000e+00> : vector<32x16xf32>
    %82 = tpu.matmul %81, %68, %cst_59 {dimension_numbers = #tpu.dot_dimension_numbers<[1], [0], [0], [1], [0, 0, 1, 1], [], []>} : vector<32x32xf32>, vector<32x16xf32>, vector<32x16xf32> -> vector<32x16xf32>
    %c0_60 = arith.constant 0 : index
    %c0_61 = arith.constant 0 : index
    %c0_62 = arith.constant 0 : index
    %c0_63 = arith.constant 0 : index
    %83 = vector.load %arg12[%c0_60, %c0_61, %c0_62, %c0_63] : memref<1x6x16x32xf32, #tpu.memory_space<vmem>>, vector<1x1x16x32xf32>
    %84 = vector.shape_cast %83 : vector<1x1x16x32xf32> to vector<16x32xf32>
    %cst_64 = arith.constant dense<0.000000e+00> : vector<32x32xf32>
    %85 = tpu.matmul %82, %84, %cst_64 {dimension_numbers = #tpu.dot_dimension_numbers<[1], [0], [0], [1], [0, 0, 1, 1], [], []>} : vector<32x16xf32>, vector<16x32xf32>, vector<32x32xf32> -> vector<32x32xf32>
    %c0_65 = arith.constant 0 : index
    %c1 = arith.constant 1 : index
    %c0_66 = arith.constant 0 : index
    %c0_67 = arith.constant 0 : index
    %86 = vector.load %arg10[%c0_65, %c1, %c0_66, %c0_67] : memref<1x18x32x16xf32, #tpu.memory_space<vmem>>, vector<1x1x32x16xf32>
    %87 = vector.shape_cast %86 : vector<1x1x32x16xf32> to vector<32x16xf32>
    %cst_68 = arith.constant dense<0.000000e+00> : vector<32x16xf32>
    %88 = tpu.matmul %47, %87, %cst_68 {dimension_numbers = #tpu.dot_dimension_numbers<[1], [0], [0], [1], [0, 0, 1, 1], [], []>} : vector<32x32xf32>, vector<32x16xf32>, vector<32x16xf32> -> vector<32x16xf32>
    %c0_69 = arith.constant 0 : index
    %c1_70 = arith.constant 1 : index
    %c0_71 = arith.constant 0 : index
    %c0_72 = arith.constant 0 : index
    %89 = vector.load %arg11[%c0_69, %c1_70, %c0_71, %c0_72] : memref<1x18x1x16xf32, #tpu.memory_space<vmem>>, vector<1x1x1x16xf32>
    %90 = vector.shape_cast %89 : vector<1x1x1x16xf32> to vector<1x16xf32>
    %91 = vector.broadcast %90 : vector<1x16xf32> to vector<32x16xf32>
    %92 = arith.addf %88, %91 : vector<32x16xf32>
    %c0_73 = arith.constant 0 : index
    %c3 = arith.constant 3 : index
    %c0_74 = arith.constant 0 : index
    %c0_75 = arith.constant 0 : index
    %93 = vector.load %arg10[%c0_73, %c3, %c0_74, %c0_75] : memref<1x18x32x16xf32, #tpu.memory_space<vmem>>, vector<1x1x32x16xf32>
    %94 = vector.shape_cast %93 : vector<1x1x32x16xf32> to vector<32x16xf32>
    %cst_76 = arith.constant dense<0.000000e+00> : vector<32x16xf32>
    %95 = tpu.matmul %47, %94, %cst_76 {dimension_numbers = #tpu.dot_dimension_numbers<[1], [0], [0], [1], [0, 0, 1, 1], [], []>} : vector<32x32xf32>, vector<32x16xf32>, vector<32x16xf32> -> vector<32x16xf32>
    %c0_77 = arith.constant 0 : index
    %c3_78 = arith.constant 3 : index
    %c0_79 = arith.constant 0 : index
    %c0_80 = arith.constant 0 : index
    %96 = vector.load %arg11[%c0_77, %c3_78, %c0_79, %c0_80] : memref<1x18x1x16xf32, #tpu.memory_space<vmem>>, vector<1x1x1x16xf32>
    %97 = vector.shape_cast %96 : vector<1x1x1x16xf32> to vector<1x16xf32>
    %98 = vector.broadcast %97 : vector<1x16xf32> to vector<32x16xf32>
    %99 = arith.addf %95, %98 : vector<32x16xf32>
    %c0_81 = arith.constant 0 : index
    %c5 = arith.constant 5 : index
    %c0_82 = arith.constant 0 : index
    %c0_83 = arith.constant 0 : index
    %100 = vector.load %arg10[%c0_81, %c5, %c0_82, %c0_83] : memref<1x18x32x16xf32, #tpu.memory_space<vmem>>, vector<1x1x32x16xf32>
    %101 = vector.shape_cast %100 : vector<1x1x32x16xf32> to vector<32x16xf32>
    %cst_84 = arith.constant dense<0.000000e+00> : vector<32x16xf32>
    %102 = tpu.matmul %47, %101, %cst_84 {dimension_numbers = #tpu.dot_dimension_numbers<[1], [0], [0], [1], [0, 0, 1, 1], [], []>} : vector<32x32xf32>, vector<32x16xf32>, vector<32x16xf32> -> vector<32x16xf32>
    %c0_85 = arith.constant 0 : index
    %c5_86 = arith.constant 5 : index
    %c0_87 = arith.constant 0 : index
    %c0_88 = arith.constant 0 : index
    %103 = vector.load %arg11[%c0_85, %c5_86, %c0_87, %c0_88] : memref<1x18x1x16xf32, #tpu.memory_space<vmem>>, vector<1x1x1x16xf32>
    %104 = vector.shape_cast %103 : vector<1x1x1x16xf32> to vector<1x16xf32>
    %105 = vector.broadcast %104 : vector<1x16xf32> to vector<32x16xf32>
    %106 = arith.addf %102, %105 : vector<32x16xf32>
    %cst_89 = arith.constant dense<0.000000e+00> : vector<32x32xf32>
    %107 = tpu.matmul %92, %99, %cst_89 {dimension_numbers = #tpu.dot_dimension_numbers<[1], [1], [0], [0], [0, 0, 1, 0], [], []>} : vector<32x16xf32>, vector<32x16xf32>, vector<32x32xf32> -> vector<32x32xf32>
    %cst_90 = arith.constant 2.500000e-01 : f32
    %108 = vector.broadcast %cst_90 : f32 to vector<32x32xf32>
    %109 = arith.mulf %107, %108 : vector<32x32xf32>
    %110 = arith.addf %109, %21 : vector<32x32xf32>
    %cst_91 = arith.constant dense<0xFF800000> : vector<32xf32>
    %111 = vector.multi_reduction <maximumf>, %110, %cst_91 [1] : vector<32x32xf32> to vector<32xf32>
    %112 = vector.shape_cast %111 : vector<32xf32> to vector<32x1xf32>
    %113 = vector.broadcast %112 : vector<32x1xf32> to vector<32x32xf32>
    %114 = arith.subf %110, %113 : vector<32x32xf32>
    %115 = math.exp %114 : vector<32x32xf32>
    %cst_92 = arith.constant dense<0.000000e+00> : vector<32xf32>
    %116 = vector.multi_reduction <add>, %115, %cst_92 [1] : vector<32x32xf32> to vector<32xf32>
    %117 = vector.shape_cast %116 : vector<32xf32> to vector<32x1xf32>
    %118 = vector.broadcast %117 : vector<32x1xf32> to vector<32x32xf32>
    %119 = arith.divf %115, %118 : vector<32x32xf32>
    %cst_93 = arith.constant dense<0.000000e+00> : vector<32x16xf32>
    %120 = tpu.matmul %119, %106, %cst_93 {dimension_numbers = #tpu.dot_dimension_numbers<[1], [0], [0], [1], [0, 0, 1, 1], [], []>} : vector<32x32xf32>, vector<32x16xf32>, vector<32x16xf32> -> vector<32x16xf32>
    %c0_94 = arith.constant 0 : index
    %c1_95 = arith.constant 1 : index
    %c0_96 = arith.constant 0 : index
    %c0_97 = arith.constant 0 : index
    %121 = vector.load %arg12[%c0_94, %c1_95, %c0_96, %c0_97] : memref<1x6x16x32xf32, #tpu.memory_space<vmem>>, vector<1x1x16x32xf32>
    %122 = vector.shape_cast %121 : vector<1x1x16x32xf32> to vector<16x32xf32>
    %cst_98 = arith.constant dense<0.000000e+00> : vector<32x32xf32>
    %123 = tpu.matmul %120, %122, %cst_98 {dimension_numbers = #tpu.dot_dimension_numbers<[1], [0], [0], [1], [0, 0, 1, 1], [], []>} : vector<32x16xf32>, vector<16x32xf32>, vector<32x32xf32> -> vector<32x32xf32>
    %124 = arith.addf %85, %123 : vector<32x32xf32>
    %125 = arith.addf %20, %124 : vector<32x32xf32>
    %c0_99 = arith.constant 0 : index
    %c0_100 = arith.constant 0 : index
    %c0_101 = arith.constant 0 : index
    %c0_102 = arith.constant 0 : index
    %126 = vector.load %arg13[%c0_99, %c0_100, %c0_101, %c0_102] : memref<1x3x1x32xf32, #tpu.memory_space<vmem>>, vector<1x1x1x32xf32>
    %127 = vector.shape_cast %126 : vector<1x1x1x32xf32> to vector<1x32xf32>
    %128 = vector.broadcast %127 : vector<1x32xf32> to vector<32x32xf32>
    %129 = arith.addf %125, %128 : vector<32x32xf32>
    %c0_103 = arith.constant 0 : index
    %c0_104 = arith.constant 0 : index
    %c0_105 = arith.constant 0 : index
    %c0_106 = arith.constant 0 : index
    %130 = vector.load %arg14[%c0_103, %c0_104, %c0_105, %c0_106] : memref<1x3x1x32xf32, #tpu.memory_space<vmem>>, vector<1x1x1x32xf32>
    %131 = vector.shape_cast %130 : vector<1x1x1x32xf32> to vector<1x32xf32>
    %c0_107 = arith.constant 0 : index
    %c0_108 = arith.constant 0 : index
    %c0_109 = arith.constant 0 : index
    %c0_110 = arith.constant 0 : index
    %132 = vector.load %arg15[%c0_107, %c0_108, %c0_109, %c0_110] : memref<1x3x1x32xf32, #tpu.memory_space<vmem>>, vector<1x1x1x32xf32>
    %133 = vector.shape_cast %132 : vector<1x1x1x32xf32> to vector<1x32xf32>
    %cst_111 = arith.constant dense<0.000000e+00> : vector<32xf32>
    %134 = vector.multi_reduction <add>, %129, %cst_111 [1] : vector<32x32xf32> to vector<32xf32>
    %135 = vector.shape_cast %134 : vector<32xf32> to vector<32x1xf32>
    %cst_112 = arith.constant 3.200000e+01 : f32
    %136 = vector.broadcast %cst_112 : f32 to vector<32x1xf32>
    %137 = arith.divf %135, %136 : vector<32x1xf32>
    %138 = vector.broadcast %137 : vector<32x1xf32> to vector<32x32xf32>
    %139 = arith.subf %129, %138 : vector<32x32xf32>
    %140 = arith.mulf %139, %139 : vector<32x32xf32>
    %cst_113 = arith.constant dense<0.000000e+00> : vector<32xf32>
    %141 = vector.multi_reduction <add>, %140, %cst_113 [1] : vector<32x32xf32> to vector<32xf32>
    %142 = vector.shape_cast %141 : vector<32xf32> to vector<32x1xf32>
    %cst_114 = arith.constant 3.200000e+01 : f32
    %143 = vector.broadcast %cst_114 : f32 to vector<32x1xf32>
    %144 = arith.divf %142, %143 : vector<32x1xf32>
    %145 = vector.broadcast %137 : vector<32x1xf32> to vector<32x32xf32>
    %146 = arith.subf %129, %145 : vector<32x32xf32>
    %cst_115 = arith.constant 9.99999974E-6 : f32
    %147 = vector.broadcast %cst_115 : f32 to vector<32x1xf32>
    %148 = arith.addf %144, %147 : vector<32x1xf32>
    %149 = math.rsqrt %148 : vector<32x1xf32>
    %150 = vector.broadcast %149 : vector<32x1xf32> to vector<32x32xf32>
    %151 = arith.mulf %146, %150 : vector<32x32xf32>
    %152 = vector.broadcast %131 : vector<1x32xf32> to vector<32x32xf32>
    %153 = arith.mulf %151, %152 : vector<32x32xf32>
    %154 = vector.broadcast %133 : vector<1x32xf32> to vector<32x32xf32>
    %155 = arith.addf %153, %154 : vector<32x32xf32>
    %c0_116 = arith.constant 0 : index
    %c0_117 = arith.constant 0 : index
    %c0_118 = arith.constant 0 : index
    %c0_119 = arith.constant 0 : index
    %156 = vector.load %arg16[%c0_116, %c0_117, %c0_118, %c0_119] : memref<1x3x32x128xf32, #tpu.memory_space<vmem>>, vector<1x1x32x128xf32>
    %157 = vector.shape_cast %156 : vector<1x1x32x128xf32> to vector<32x128xf32>
    %cst_120 = arith.constant dense<0.000000e+00> : vector<32x128xf32>
    %158 = tpu.matmul %155, %157, %cst_120 {dimension_numbers = #tpu.dot_dimension_numbers<[1], [0], [0], [1], [0, 0, 1, 1], [], []>} : vector<32x32xf32>, vector<32x128xf32>, vector<32x128xf32> -> vector<32x128xf32>
    %c0_121 = arith.constant 0 : index
    %c0_122 = arith.constant 0 : index
    %c0_123 = arith.constant 0 : index
    %c0_124 = arith.constant 0 : index
    %159 = vector.load %arg17[%c0_121, %c0_122, %c0_123, %c0_124] : memref<1x3x1x128xf32, #tpu.memory_space<vmem>>, vector<1x1x1x128xf32>
    %160 = vector.shape_cast %159 : vector<1x1x1x128xf32> to vector<1x128xf32>
    %161 = vector.broadcast %160 : vector<1x128xf32> to vector<32x128xf32>
    %162 = arith.addf %158, %161 : vector<32x128xf32>
    %163 = arith.mulf %162, %162 : vector<32x128xf32>
    %164 = arith.mulf %162, %163 : vector<32x128xf32>
    %cst_125 = arith.constant 4.471500e-02 : f32
    %165 = vector.broadcast %cst_125 : f32 to vector<32x128xf32>
    %166 = arith.mulf %165, %164 : vector<32x128xf32>
    %167 = arith.addf %162, %166 : vector<32x128xf32>
    %cst_126 = arith.constant 0.797884583 : f32
    %168 = vector.broadcast %cst_126 : f32 to vector<32x128xf32>
    %169 = arith.mulf %168, %167 : vector<32x128xf32>
    %170 = math.tanh %169 : vector<32x128xf32>
    %cst_127 = arith.constant 1.000000e+00 : f32
    %171 = vector.broadcast %cst_127 : f32 to vector<32x128xf32>
    %172 = arith.addf %171, %170 : vector<32x128xf32>
    %cst_128 = arith.constant 5.000000e-01 : f32
    %173 = vector.broadcast %cst_128 : f32 to vector<32x128xf32>
    %174 = arith.mulf %173, %172 : vector<32x128xf32>
    %175 = arith.mulf %162, %174 : vector<32x128xf32>
    %c0_129 = arith.constant 0 : index
    %c0_130 = arith.constant 0 : index
    %c0_131 = arith.constant 0 : index
    %c0_132 = arith.constant 0 : index
    %176 = vector.load %arg18[%c0_129, %c0_130, %c0_131, %c0_132] : memref<1x3x128x32xf32, #tpu.memory_space<vmem>>, vector<1x1x128x32xf32>
    %177 = vector.shape_cast %176 : vector<1x1x128x32xf32> to vector<128x32xf32>
    %cst_133 = arith.constant dense<0.000000e+00> : vector<32x32xf32>
    %178 = tpu.matmul %175, %177, %cst_133 {dimension_numbers = #tpu.dot_dimension_numbers<[1], [0], [0], [1], [0, 0, 1, 1], [], []>} : vector<32x128xf32>, vector<128x32xf32>, vector<32x32xf32> -> vector<32x32xf32>
    %179 = arith.addf %129, %178 : vector<32x32xf32>
    %c0_134 = arith.constant 0 : index
    %c0_135 = arith.constant 0 : index
    %c0_136 = arith.constant 0 : index
    %c0_137 = arith.constant 0 : index
    %180 = vector.load %arg19[%c0_134, %c0_135, %c0_136, %c0_137] : memref<1x3x1x32xf32, #tpu.memory_space<vmem>>, vector<1x1x1x32xf32>
    %181 = vector.shape_cast %180 : vector<1x1x1x32xf32> to vector<1x32xf32>
    %182 = vector.broadcast %181 : vector<1x32xf32> to vector<32x32xf32>
    %183 = arith.addf %179, %182 : vector<32x32xf32>
    %c0_138 = arith.constant 0 : index
    %c1_139 = arith.constant 1 : index
    %c0_140 = arith.constant 0 : index
    %c0_141 = arith.constant 0 : index
    %184 = vector.load %arg8[%c0_138, %c1_139, %c0_140, %c0_141] : memref<1x3x1x32xf32, #tpu.memory_space<vmem>>, vector<1x1x1x32xf32>
    %185 = vector.shape_cast %184 : vector<1x1x1x32xf32> to vector<1x32xf32>
    %c0_142 = arith.constant 0 : index
    %c1_143 = arith.constant 1 : index
    %c0_144 = arith.constant 0 : index
    %c0_145 = arith.constant 0 : index
    %186 = vector.load %arg9[%c0_142, %c1_143, %c0_144, %c0_145] : memref<1x3x1x32xf32, #tpu.memory_space<vmem>>, vector<1x1x1x32xf32>
    %187 = vector.shape_cast %186 : vector<1x1x1x32xf32> to vector<1x32xf32>
    %cst_146 = arith.constant dense<0.000000e+00> : vector<32xf32>
    %188 = vector.multi_reduction <add>, %183, %cst_146 [1] : vector<32x32xf32> to vector<32xf32>
    %189 = vector.shape_cast %188 : vector<32xf32> to vector<32x1xf32>
    %cst_147 = arith.constant 3.200000e+01 : f32
    %190 = vector.broadcast %cst_147 : f32 to vector<32x1xf32>
    %191 = arith.divf %189, %190 : vector<32x1xf32>
    %192 = vector.broadcast %191 : vector<32x1xf32> to vector<32x32xf32>
    %193 = arith.subf %183, %192 : vector<32x32xf32>
    %194 = arith.mulf %193, %193 : vector<32x32xf32>
    %cst_148 = arith.constant dense<0.000000e+00> : vector<32xf32>
    %195 = vector.multi_reduction <add>, %194, %cst_148 [1] : vector<32x32xf32> to vector<32xf32>
    %196 = vector.shape_cast %195 : vector<32xf32> to vector<32x1xf32>
    %cst_149 = arith.constant 3.200000e+01 : f32
    %197 = vector.broadcast %cst_149 : f32 to vector<32x1xf32>
    %198 = arith.divf %196, %197 : vector<32x1xf32>
    %199 = vector.broadcast %191 : vector<32x1xf32> to vector<32x32xf32>
    %200 = arith.subf %183, %199 : vector<32x32xf32>
    %cst_150 = arith.constant 9.99999974E-6 : f32
    %201 = vector.broadcast %cst_150 : f32 to vector<32x1xf32>
    %202 = arith.addf %198, %201 : vector<32x1xf32>
    %203 = math.rsqrt %202 : vector<32x1xf32>
    %204 = vector.broadcast %203 : vector<32x1xf32> to vector<32x32xf32>
    %205 = arith.mulf %200, %204 : vector<32x32xf32>
    %206 = vector.broadcast %185 : vector<1x32xf32> to vector<32x32xf32>
    %207 = arith.mulf %205, %206 : vector<32x32xf32>
    %208 = vector.broadcast %187 : vector<1x32xf32> to vector<32x32xf32>
    %209 = arith.addf %207, %208 : vector<32x32xf32>
    %c0_151 = arith.constant 0 : index
    %c6 = arith.constant 6 : index
    %c0_152 = arith.constant 0 : index
    %c0_153 = arith.constant 0 : index
    %210 = vector.load %arg10[%c0_151, %c6, %c0_152, %c0_153] : memref<1x18x32x16xf32, #tpu.memory_space<vmem>>, vector<1x1x32x16xf32>
    %211 = vector.shape_cast %210 : vector<1x1x32x16xf32> to vector<32x16xf32>
    %cst_154 = arith.constant dense<0.000000e+00> : vector<32x16xf32>
    %212 = tpu.matmul %209, %211, %cst_154 {dimension_numbers = #tpu.dot_dimension_numbers<[1], [0], [0], [1], [0, 0, 1, 1], [], []>} : vector<32x32xf32>, vector<32x16xf32>, vector<32x16xf32> -> vector<32x16xf32>
    %c0_155 = arith.constant 0 : index
    %c6_156 = arith.constant 6 : index
    %c0_157 = arith.constant 0 : index
    %c0_158 = arith.constant 0 : index
    %213 = vector.load %arg11[%c0_155, %c6_156, %c0_157, %c0_158] : memref<1x18x1x16xf32, #tpu.memory_space<vmem>>, vector<1x1x1x16xf32>
    %214 = vector.shape_cast %213 : vector<1x1x1x16xf32> to vector<1x16xf32>
    %215 = vector.broadcast %214 : vector<1x16xf32> to vector<32x16xf32>
    %216 = arith.addf %212, %215 : vector<32x16xf32>
    %c0_159 = arith.constant 0 : index
    %c8 = arith.constant 8 : index
    %c0_160 = arith.constant 0 : index
    %c0_161 = arith.constant 0 : index
    %217 = vector.load %arg10[%c0_159, %c8, %c0_160, %c0_161] : memref<1x18x32x16xf32, #tpu.memory_space<vmem>>, vector<1x1x32x16xf32>
    %218 = vector.shape_cast %217 : vector<1x1x32x16xf32> to vector<32x16xf32>
    %cst_162 = arith.constant dense<0.000000e+00> : vector<32x16xf32>
    %219 = tpu.matmul %209, %218, %cst_162 {dimension_numbers = #tpu.dot_dimension_numbers<[1], [0], [0], [1], [0, 0, 1, 1], [], []>} : vector<32x32xf32>, vector<32x16xf32>, vector<32x16xf32> -> vector<32x16xf32>
    %c0_163 = arith.constant 0 : index
    %c8_164 = arith.constant 8 : index
    %c0_165 = arith.constant 0 : index
    %c0_166 = arith.constant 0 : index
    %220 = vector.load %arg11[%c0_163, %c8_164, %c0_165, %c0_166] : memref<1x18x1x16xf32, #tpu.memory_space<vmem>>, vector<1x1x1x16xf32>
    %221 = vector.shape_cast %220 : vector<1x1x1x16xf32> to vector<1x16xf32>
    %222 = vector.broadcast %221 : vector<1x16xf32> to vector<32x16xf32>
    %223 = arith.addf %219, %222 : vector<32x16xf32>
    %c0_167 = arith.constant 0 : index
    %c10 = arith.constant 10 : index
    %c0_168 = arith.constant 0 : index
    %c0_169 = arith.constant 0 : index
    %224 = vector.load %arg10[%c0_167, %c10, %c0_168, %c0_169] : memref<1x18x32x16xf32, #tpu.memory_space<vmem>>, vector<1x1x32x16xf32>
    %225 = vector.shape_cast %224 : vector<1x1x32x16xf32> to vector<32x16xf32>
    %cst_170 = arith.constant dense<0.000000e+00> : vector<32x16xf32>
    %226 = tpu.matmul %209, %225, %cst_170 {dimension_numbers = #tpu.dot_dimension_numbers<[1], [0], [0], [1], [0, 0, 1, 1], [], []>} : vector<32x32xf32>, vector<32x16xf32>, vector<32x16xf32> -> vector<32x16xf32>
    %c0_171 = arith.constant 0 : index
    %c10_172 = arith.constant 10 : index
    %c0_173 = arith.constant 0 : index
    %c0_174 = arith.constant 0 : index
    %227 = vector.load %arg11[%c0_171, %c10_172, %c0_173, %c0_174] : memref<1x18x1x16xf32, #tpu.memory_space<vmem>>, vector<1x1x1x16xf32>
    %228 = vector.shape_cast %227 : vector<1x1x1x16xf32> to vector<1x16xf32>
    %229 = vector.broadcast %228 : vector<1x16xf32> to vector<32x16xf32>
    %230 = arith.addf %226, %229 : vector<32x16xf32>
    %cst_175 = arith.constant dense<0.000000e+00> : vector<32x32xf32>
    %231 = tpu.matmul %216, %223, %cst_175 {dimension_numbers = #tpu.dot_dimension_numbers<[1], [1], [0], [0], [0, 0, 1, 0], [], []>} : vector<32x16xf32>, vector<32x16xf32>, vector<32x32xf32> -> vector<32x32xf32>
    %cst_176 = arith.constant 2.500000e-01 : f32
    %232 = vector.broadcast %cst_176 : f32 to vector<32x32xf32>
    %233 = arith.mulf %231, %232 : vector<32x32xf32>
    %234 = arith.addf %233, %21 : vector<32x32xf32>
    %cst_177 = arith.constant dense<0xFF800000> : vector<32xf32>
    %235 = vector.multi_reduction <maximumf>, %234, %cst_177 [1] : vector<32x32xf32> to vector<32xf32>
    %236 = vector.shape_cast %235 : vector<32xf32> to vector<32x1xf32>
    %237 = vector.broadcast %236 : vector<32x1xf32> to vector<32x32xf32>
    %238 = arith.subf %234, %237 : vector<32x32xf32>
    %239 = math.exp %238 : vector<32x32xf32>
    %cst_178 = arith.constant dense<0.000000e+00> : vector<32xf32>
    %240 = vector.multi_reduction <add>, %239, %cst_178 [1] : vector<32x32xf32> to vector<32xf32>
    %241 = vector.shape_cast %240 : vector<32xf32> to vector<32x1xf32>
    %242 = vector.broadcast %241 : vector<32x1xf32> to vector<32x32xf32>
    %243 = arith.divf %239, %242 : vector<32x32xf32>
    %cst_179 = arith.constant dense<0.000000e+00> : vector<32x16xf32>
    %244 = tpu.matmul %243, %230, %cst_179 {dimension_numbers = #tpu.dot_dimension_numbers<[1], [0], [0], [1], [0, 0, 1, 1], [], []>} : vector<32x32xf32>, vector<32x16xf32>, vector<32x16xf32> -> vector<32x16xf32>
    %c0_180 = arith.constant 0 : index
    %c2_181 = arith.constant 2 : index
    %c0_182 = arith.constant 0 : index
    %c0_183 = arith.constant 0 : index
    %245 = vector.load %arg12[%c0_180, %c2_181, %c0_182, %c0_183] : memref<1x6x16x32xf32, #tpu.memory_space<vmem>>, vector<1x1x16x32xf32>
    %246 = vector.shape_cast %245 : vector<1x1x16x32xf32> to vector<16x32xf32>
    %cst_184 = arith.constant dense<0.000000e+00> : vector<32x32xf32>
    %247 = tpu.matmul %244, %246, %cst_184 {dimension_numbers = #tpu.dot_dimension_numbers<[1], [0], [0], [1], [0, 0, 1, 1], [], []>} : vector<32x16xf32>, vector<16x32xf32>, vector<32x32xf32> -> vector<32x32xf32>
    %c0_185 = arith.constant 0 : index
    %c7 = arith.constant 7 : index
    %c0_186 = arith.constant 0 : index
    %c0_187 = arith.constant 0 : index
    %248 = vector.load %arg10[%c0_185, %c7, %c0_186, %c0_187] : memref<1x18x32x16xf32, #tpu.memory_space<vmem>>, vector<1x1x32x16xf32>
    %249 = vector.shape_cast %248 : vector<1x1x32x16xf32> to vector<32x16xf32>
    %cst_188 = arith.constant dense<0.000000e+00> : vector<32x16xf32>
    %250 = tpu.matmul %209, %249, %cst_188 {dimension_numbers = #tpu.dot_dimension_numbers<[1], [0], [0], [1], [0, 0, 1, 1], [], []>} : vector<32x32xf32>, vector<32x16xf32>, vector<32x16xf32> -> vector<32x16xf32>
    %c0_189 = arith.constant 0 : index
    %c7_190 = arith.constant 7 : index
    %c0_191 = arith.constant 0 : index
    %c0_192 = arith.constant 0 : index
    %251 = vector.load %arg11[%c0_189, %c7_190, %c0_191, %c0_192] : memref<1x18x1x16xf32, #tpu.memory_space<vmem>>, vector<1x1x1x16xf32>
    %252 = vector.shape_cast %251 : vector<1x1x1x16xf32> to vector<1x16xf32>
    %253 = vector.broadcast %252 : vector<1x16xf32> to vector<32x16xf32>
    %254 = arith.addf %250, %253 : vector<32x16xf32>
    %c0_193 = arith.constant 0 : index
    %c9 = arith.constant 9 : index
    %c0_194 = arith.constant 0 : index
    %c0_195 = arith.constant 0 : index
    %255 = vector.load %arg10[%c0_193, %c9, %c0_194, %c0_195] : memref<1x18x32x16xf32, #tpu.memory_space<vmem>>, vector<1x1x32x16xf32>
    %256 = vector.shape_cast %255 : vector<1x1x32x16xf32> to vector<32x16xf32>
    %cst_196 = arith.constant dense<0.000000e+00> : vector<32x16xf32>
    %257 = tpu.matmul %209, %256, %cst_196 {dimension_numbers = #tpu.dot_dimension_numbers<[1], [0], [0], [1], [0, 0, 1, 1], [], []>} : vector<32x32xf32>, vector<32x16xf32>, vector<32x16xf32> -> vector<32x16xf32>
    %c0_197 = arith.constant 0 : index
    %c9_198 = arith.constant 9 : index
    %c0_199 = arith.constant 0 : index
    %c0_200 = arith.constant 0 : index
    %258 = vector.load %arg11[%c0_197, %c9_198, %c0_199, %c0_200] : memref<1x18x1x16xf32, #tpu.memory_space<vmem>>, vector<1x1x1x16xf32>
    %259 = vector.shape_cast %258 : vector<1x1x1x16xf32> to vector<1x16xf32>
    %260 = vector.broadcast %259 : vector<1x16xf32> to vector<32x16xf32>
    %261 = arith.addf %257, %260 : vector<32x16xf32>
    %c0_201 = arith.constant 0 : index
    %c11 = arith.constant 11 : index
    %c0_202 = arith.constant 0 : index
    %c0_203 = arith.constant 0 : index
    %262 = vector.load %arg10[%c0_201, %c11, %c0_202, %c0_203] : memref<1x18x32x16xf32, #tpu.memory_space<vmem>>, vector<1x1x32x16xf32>
    %263 = vector.shape_cast %262 : vector<1x1x32x16xf32> to vector<32x16xf32>
    %cst_204 = arith.constant dense<0.000000e+00> : vector<32x16xf32>
    %264 = tpu.matmul %209, %263, %cst_204 {dimension_numbers = #tpu.dot_dimension_numbers<[1], [0], [0], [1], [0, 0, 1, 1], [], []>} : vector<32x32xf32>, vector<32x16xf32>, vector<32x16xf32> -> vector<32x16xf32>
    %c0_205 = arith.constant 0 : index
    %c11_206 = arith.constant 11 : index
    %c0_207 = arith.constant 0 : index
    %c0_208 = arith.constant 0 : index
    %265 = vector.load %arg11[%c0_205, %c11_206, %c0_207, %c0_208] : memref<1x18x1x16xf32, #tpu.memory_space<vmem>>, vector<1x1x1x16xf32>
    %266 = vector.shape_cast %265 : vector<1x1x1x16xf32> to vector<1x16xf32>
    %267 = vector.broadcast %266 : vector<1x16xf32> to vector<32x16xf32>
    %268 = arith.addf %264, %267 : vector<32x16xf32>
    %cst_209 = arith.constant dense<0.000000e+00> : vector<32x32xf32>
    %269 = tpu.matmul %254, %261, %cst_209 {dimension_numbers = #tpu.dot_dimension_numbers<[1], [1], [0], [0], [0, 0, 1, 0], [], []>} : vector<32x16xf32>, vector<32x16xf32>, vector<32x32xf32> -> vector<32x32xf32>
    %cst_210 = arith.constant 2.500000e-01 : f32
    %270 = vector.broadcast %cst_210 : f32 to vector<32x32xf32>
    %271 = arith.mulf %269, %270 : vector<32x32xf32>
    %272 = arith.addf %271, %21 : vector<32x32xf32>
    %cst_211 = arith.constant dense<0xFF800000> : vector<32xf32>
    %273 = vector.multi_reduction <maximumf>, %272, %cst_211 [1] : vector<32x32xf32> to vector<32xf32>
    %274 = vector.shape_cast %273 : vector<32xf32> to vector<32x1xf32>
    %275 = vector.broadcast %274 : vector<32x1xf32> to vector<32x32xf32>
    %276 = arith.subf %272, %275 : vector<32x32xf32>
    %277 = math.exp %276 : vector<32x32xf32>
    %cst_212 = arith.constant dense<0.000000e+00> : vector<32xf32>
    %278 = vector.multi_reduction <add>, %277, %cst_212 [1] : vector<32x32xf32> to vector<32xf32>
    %279 = vector.shape_cast %278 : vector<32xf32> to vector<32x1xf32>
    %280 = vector.broadcast %279 : vector<32x1xf32> to vector<32x32xf32>
    %281 = arith.divf %277, %280 : vector<32x32xf32>
    %cst_213 = arith.constant dense<0.000000e+00> : vector<32x16xf32>
    %282 = tpu.matmul %281, %268, %cst_213 {dimension_numbers = #tpu.dot_dimension_numbers<[1], [0], [0], [1], [0, 0, 1, 1], [], []>} : vector<32x32xf32>, vector<32x16xf32>, vector<32x16xf32> -> vector<32x16xf32>
    %c0_214 = arith.constant 0 : index
    %c3_215 = arith.constant 3 : index
    %c0_216 = arith.constant 0 : index
    %c0_217 = arith.constant 0 : index
    %283 = vector.load %arg12[%c0_214, %c3_215, %c0_216, %c0_217] : memref<1x6x16x32xf32, #tpu.memory_space<vmem>>, vector<1x1x16x32xf32>
    %284 = vector.shape_cast %283 : vector<1x1x16x32xf32> to vector<16x32xf32>
    %cst_218 = arith.constant dense<0.000000e+00> : vector<32x32xf32>
    %285 = tpu.matmul %282, %284, %cst_218 {dimension_numbers = #tpu.dot_dimension_numbers<[1], [0], [0], [1], [0, 0, 1, 1], [], []>} : vector<32x16xf32>, vector<16x32xf32>, vector<32x32xf32> -> vector<32x32xf32>
    %286 = arith.addf %247, %285 : vector<32x32xf32>
    %287 = arith.addf %183, %286 : vector<32x32xf32>
    %c0_219 = arith.constant 0 : index
    %c1_220 = arith.constant 1 : index
    %c0_221 = arith.constant 0 : index
    %c0_222 = arith.constant 0 : index
    %288 = vector.load %arg13[%c0_219, %c1_220, %c0_221, %c0_222] : memref<1x3x1x32xf32, #tpu.memory_space<vmem>>, vector<1x1x1x32xf32>
    %289 = vector.shape_cast %288 : vector<1x1x1x32xf32> to vector<1x32xf32>
    %290 = vector.broadcast %289 : vector<1x32xf32> to vector<32x32xf32>
    %291 = arith.addf %287, %290 : vector<32x32xf32>
    %c0_223 = arith.constant 0 : index
    %c1_224 = arith.constant 1 : index
    %c0_225 = arith.constant 0 : index
    %c0_226 = arith.constant 0 : index
    %292 = vector.load %arg14[%c0_223, %c1_224, %c0_225, %c0_226] : memref<1x3x1x32xf32, #tpu.memory_space<vmem>>, vector<1x1x1x32xf32>
    %293 = vector.shape_cast %292 : vector<1x1x1x32xf32> to vector<1x32xf32>
    %c0_227 = arith.constant 0 : index
    %c1_228 = arith.constant 1 : index
    %c0_229 = arith.constant 0 : index
    %c0_230 = arith.constant 0 : index
    %294 = vector.load %arg15[%c0_227, %c1_228, %c0_229, %c0_230] : memref<1x3x1x32xf32, #tpu.memory_space<vmem>>, vector<1x1x1x32xf32>
    %295 = vector.shape_cast %294 : vector<1x1x1x32xf32> to vector<1x32xf32>
    %cst_231 = arith.constant dense<0.000000e+00> : vector<32xf32>
    %296 = vector.multi_reduction <add>, %291, %cst_231 [1] : vector<32x32xf32> to vector<32xf32>
    %297 = vector.shape_cast %296 : vector<32xf32> to vector<32x1xf32>
    %cst_232 = arith.constant 3.200000e+01 : f32
    %298 = vector.broadcast %cst_232 : f32 to vector<32x1xf32>
    %299 = arith.divf %297, %298 : vector<32x1xf32>
    %300 = vector.broadcast %299 : vector<32x1xf32> to vector<32x32xf32>
    %301 = arith.subf %291, %300 : vector<32x32xf32>
    %302 = arith.mulf %301, %301 : vector<32x32xf32>
    %cst_233 = arith.constant dense<0.000000e+00> : vector<32xf32>
    %303 = vector.multi_reduction <add>, %302, %cst_233 [1] : vector<32x32xf32> to vector<32xf32>
    %304 = vector.shape_cast %303 : vector<32xf32> to vector<32x1xf32>
    %cst_234 = arith.constant 3.200000e+01 : f32
    %305 = vector.broadcast %cst_234 : f32 to vector<32x1xf32>
    %306 = arith.divf %304, %305 : vector<32x1xf32>
    %307 = vector.broadcast %299 : vector<32x1xf32> to vector<32x32xf32>
    %308 = arith.subf %291, %307 : vector<32x32xf32>
    %cst_235 = arith.constant 9.99999974E-6 : f32
    %309 = vector.broadcast %cst_235 : f32 to vector<32x1xf32>
    %310 = arith.addf %306, %309 : vector<32x1xf32>
    %311 = math.rsqrt %310 : vector<32x1xf32>
    %312 = vector.broadcast %311 : vector<32x1xf32> to vector<32x32xf32>
    %313 = arith.mulf %308, %312 : vector<32x32xf32>
    %314 = vector.broadcast %293 : vector<1x32xf32> to vector<32x32xf32>
    %315 = arith.mulf %313, %314 : vector<32x32xf32>
    %316 = vector.broadcast %295 : vector<1x32xf32> to vector<32x32xf32>
    %317 = arith.addf %315, %316 : vector<32x32xf32>
    %c0_236 = arith.constant 0 : index
    %c1_237 = arith.constant 1 : index
    %c0_238 = arith.constant 0 : index
    %c0_239 = arith.constant 0 : index
    %318 = vector.load %arg16[%c0_236, %c1_237, %c0_238, %c0_239] : memref<1x3x32x128xf32, #tpu.memory_space<vmem>>, vector<1x1x32x128xf32>
    %319 = vector.shape_cast %318 : vector<1x1x32x128xf32> to vector<32x128xf32>
    %cst_240 = arith.constant dense<0.000000e+00> : vector<32x128xf32>
    %320 = tpu.matmul %317, %319, %cst_240 {dimension_numbers = #tpu.dot_dimension_numbers<[1], [0], [0], [1], [0, 0, 1, 1], [], []>} : vector<32x32xf32>, vector<32x128xf32>, vector<32x128xf32> -> vector<32x128xf32>
    %c0_241 = arith.constant 0 : index
    %c1_242 = arith.constant 1 : index
    %c0_243 = arith.constant 0 : index
    %c0_244 = arith.constant 0 : index
    %321 = vector.load %arg17[%c0_241, %c1_242, %c0_243, %c0_244] : memref<1x3x1x128xf32, #tpu.memory_space<vmem>>, vector<1x1x1x128xf32>
    %322 = vector.shape_cast %321 : vector<1x1x1x128xf32> to vector<1x128xf32>
    %323 = vector.broadcast %322 : vector<1x128xf32> to vector<32x128xf32>
    %324 = arith.addf %320, %323 : vector<32x128xf32>
    %325 = arith.mulf %324, %324 : vector<32x128xf32>
    %326 = arith.mulf %324, %325 : vector<32x128xf32>
    %cst_245 = arith.constant 4.471500e-02 : f32
    %327 = vector.broadcast %cst_245 : f32 to vector<32x128xf32>
    %328 = arith.mulf %327, %326 : vector<32x128xf32>
    %329 = arith.addf %324, %328 : vector<32x128xf32>
    %cst_246 = arith.constant 0.797884583 : f32
    %330 = vector.broadcast %cst_246 : f32 to vector<32x128xf32>
    %331 = arith.mulf %330, %329 : vector<32x128xf32>
    %332 = math.tanh %331 : vector<32x128xf32>
    %cst_247 = arith.constant 1.000000e+00 : f32
    %333 = vector.broadcast %cst_247 : f32 to vector<32x128xf32>
    %334 = arith.addf %333, %332 : vector<32x128xf32>
    %cst_248 = arith.constant 5.000000e-01 : f32
    %335 = vector.broadcast %cst_248 : f32 to vector<32x128xf32>
    %336 = arith.mulf %335, %334 : vector<32x128xf32>
    %337 = arith.mulf %324, %336 : vector<32x128xf32>
    %c0_249 = arith.constant 0 : index
    %c1_250 = arith.constant 1 : index
    %c0_251 = arith.constant 0 : index
    %c0_252 = arith.constant 0 : index
    %338 = vector.load %arg18[%c0_249, %c1_250, %c0_251, %c0_252] : memref<1x3x128x32xf32, #tpu.memory_space<vmem>>, vector<1x1x128x32xf32>
    %339 = vector.shape_cast %338 : vector<1x1x128x32xf32> to vector<128x32xf32>
    %cst_253 = arith.constant dense<0.000000e+00> : vector<32x32xf32>
    %340 = tpu.matmul %337, %339, %cst_253 {dimension_numbers = #tpu.dot_dimension_numbers<[1], [0], [0], [1], [0, 0, 1, 1], [], []>} : vector<32x128xf32>, vector<128x32xf32>, vector<32x32xf32> -> vector<32x32xf32>
    %341 = arith.addf %291, %340 : vector<32x32xf32>
    %c0_254 = arith.constant 0 : index
    %c1_255 = arith.constant 1 : index
    %c0_256 = arith.constant 0 : index
    %c0_257 = arith.constant 0 : index
    %342 = vector.load %arg19[%c0_254, %c1_255, %c0_256, %c0_257] : memref<1x3x1x32xf32, #tpu.memory_space<vmem>>, vector<1x1x1x32xf32>
    %343 = vector.shape_cast %342 : vector<1x1x1x32xf32> to vector<1x32xf32>
    %344 = vector.broadcast %343 : vector<1x32xf32> to vector<32x32xf32>
    %345 = arith.addf %341, %344 : vector<32x32xf32>
    %c0_258 = arith.constant 0 : index
    %c2_259 = arith.constant 2 : index
    %c0_260 = arith.constant 0 : index
    %c0_261 = arith.constant 0 : index
    %346 = vector.load %arg8[%c0_258, %c2_259, %c0_260, %c0_261] : memref<1x3x1x32xf32, #tpu.memory_space<vmem>>, vector<1x1x1x32xf32>
    %347 = vector.shape_cast %346 : vector<1x1x1x32xf32> to vector<1x32xf32>
    %c0_262 = arith.constant 0 : index
    %c2_263 = arith.constant 2 : index
    %c0_264 = arith.constant 0 : index
    %c0_265 = arith.constant 0 : index
    %348 = vector.load %arg9[%c0_262, %c2_263, %c0_264, %c0_265] : memref<1x3x1x32xf32, #tpu.memory_space<vmem>>, vector<1x1x1x32xf32>
    %349 = vector.shape_cast %348 : vector<1x1x1x32xf32> to vector<1x32xf32>
    %cst_266 = arith.constant dense<0.000000e+00> : vector<32xf32>
    %350 = vector.multi_reduction <add>, %345, %cst_266 [1] : vector<32x32xf32> to vector<32xf32>
    %351 = vector.shape_cast %350 : vector<32xf32> to vector<32x1xf32>
    %cst_267 = arith.constant 3.200000e+01 : f32
    %352 = vector.broadcast %cst_267 : f32 to vector<32x1xf32>
    %353 = arith.divf %351, %352 : vector<32x1xf32>
    %354 = vector.broadcast %353 : vector<32x1xf32> to vector<32x32xf32>
    %355 = arith.subf %345, %354 : vector<32x32xf32>
    %356 = arith.mulf %355, %355 : vector<32x32xf32>
    %cst_268 = arith.constant dense<0.000000e+00> : vector<32xf32>
    %357 = vector.multi_reduction <add>, %356, %cst_268 [1] : vector<32x32xf32> to vector<32xf32>
    %358 = vector.shape_cast %357 : vector<32xf32> to vector<32x1xf32>
    %cst_269 = arith.constant 3.200000e+01 : f32
    %359 = vector.broadcast %cst_269 : f32 to vector<32x1xf32>
    %360 = arith.divf %358, %359 : vector<32x1xf32>
    %361 = vector.broadcast %353 : vector<32x1xf32> to vector<32x32xf32>
    %362 = arith.subf %345, %361 : vector<32x32xf32>
    %cst_270 = arith.constant 9.99999974E-6 : f32
    %363 = vector.broadcast %cst_270 : f32 to vector<32x1xf32>
    %364 = arith.addf %360, %363 : vector<32x1xf32>
    %365 = math.rsqrt %364 : vector<32x1xf32>
    %366 = vector.broadcast %365 : vector<32x1xf32> to vector<32x32xf32>
    %367 = arith.mulf %362, %366 : vector<32x32xf32>
    %368 = vector.broadcast %347 : vector<1x32xf32> to vector<32x32xf32>
    %369 = arith.mulf %367, %368 : vector<32x32xf32>
    %370 = vector.broadcast %349 : vector<1x32xf32> to vector<32x32xf32>
    %371 = arith.addf %369, %370 : vector<32x32xf32>
    %c0_271 = arith.constant 0 : index
    %c12 = arith.constant 12 : index
    %c0_272 = arith.constant 0 : index
    %c0_273 = arith.constant 0 : index
    %372 = vector.load %arg10[%c0_271, %c12, %c0_272, %c0_273] : memref<1x18x32x16xf32, #tpu.memory_space<vmem>>, vector<1x1x32x16xf32>
    %373 = vector.shape_cast %372 : vector<1x1x32x16xf32> to vector<32x16xf32>
    %cst_274 = arith.constant dense<0.000000e+00> : vector<32x16xf32>
    %374 = tpu.matmul %371, %373, %cst_274 {dimension_numbers = #tpu.dot_dimension_numbers<[1], [0], [0], [1], [0, 0, 1, 1], [], []>} : vector<32x32xf32>, vector<32x16xf32>, vector<32x16xf32> -> vector<32x16xf32>
    %c0_275 = arith.constant 0 : index
    %c12_276 = arith.constant 12 : index
    %c0_277 = arith.constant 0 : index
    %c0_278 = arith.constant 0 : index
    %375 = vector.load %arg11[%c0_275, %c12_276, %c0_277, %c0_278] : memref<1x18x1x16xf32, #tpu.memory_space<vmem>>, vector<1x1x1x16xf32>
    %376 = vector.shape_cast %375 : vector<1x1x1x16xf32> to vector<1x16xf32>
    %377 = vector.broadcast %376 : vector<1x16xf32> to vector<32x16xf32>
    %378 = arith.addf %374, %377 : vector<32x16xf32>
    %c0_279 = arith.constant 0 : index
    %c14 = arith.constant 14 : index
    %c0_280 = arith.constant 0 : index
    %c0_281 = arith.constant 0 : index
    %379 = vector.load %arg10[%c0_279, %c14, %c0_280, %c0_281] : memref<1x18x32x16xf32, #tpu.memory_space<vmem>>, vector<1x1x32x16xf32>
    %380 = vector.shape_cast %379 : vector<1x1x32x16xf32> to vector<32x16xf32>
    %cst_282 = arith.constant dense<0.000000e+00> : vector<32x16xf32>
    %381 = tpu.matmul %371, %380, %cst_282 {dimension_numbers = #tpu.dot_dimension_numbers<[1], [0], [0], [1], [0, 0, 1, 1], [], []>} : vector<32x32xf32>, vector<32x16xf32>, vector<32x16xf32> -> vector<32x16xf32>
    %c0_283 = arith.constant 0 : index
    %c14_284 = arith.constant 14 : index
    %c0_285 = arith.constant 0 : index
    %c0_286 = arith.constant 0 : index
    %382 = vector.load %arg11[%c0_283, %c14_284, %c0_285, %c0_286] : memref<1x18x1x16xf32, #tpu.memory_space<vmem>>, vector<1x1x1x16xf32>
    %383 = vector.shape_cast %382 : vector<1x1x1x16xf32> to vector<1x16xf32>
    %384 = vector.broadcast %383 : vector<1x16xf32> to vector<32x16xf32>
    %385 = arith.addf %381, %384 : vector<32x16xf32>
    %c0_287 = arith.constant 0 : index
    %c16 = arith.constant 16 : index
    %c0_288 = arith.constant 0 : index
    %c0_289 = arith.constant 0 : index
    %386 = vector.load %arg10[%c0_287, %c16, %c0_288, %c0_289] : memref<1x18x32x16xf32, #tpu.memory_space<vmem>>, vector<1x1x32x16xf32>
    %387 = vector.shape_cast %386 : vector<1x1x32x16xf32> to vector<32x16xf32>
    %cst_290 = arith.constant dense<0.000000e+00> : vector<32x16xf32>
    %388 = tpu.matmul %371, %387, %cst_290 {dimension_numbers = #tpu.dot_dimension_numbers<[1], [0], [0], [1], [0, 0, 1, 1], [], []>} : vector<32x32xf32>, vector<32x16xf32>, vector<32x16xf32> -> vector<32x16xf32>
    %c0_291 = arith.constant 0 : index
    %c16_292 = arith.constant 16 : index
    %c0_293 = arith.constant 0 : index
    %c0_294 = arith.constant 0 : index
    %389 = vector.load %arg11[%c0_291, %c16_292, %c0_293, %c0_294] : memref<1x18x1x16xf32, #tpu.memory_space<vmem>>, vector<1x1x1x16xf32>
    %390 = vector.shape_cast %389 : vector<1x1x1x16xf32> to vector<1x16xf32>
    %391 = vector.broadcast %390 : vector<1x16xf32> to vector<32x16xf32>
    %392 = arith.addf %388, %391 : vector<32x16xf32>
    %cst_295 = arith.constant dense<0.000000e+00> : vector<32x32xf32>
    %393 = tpu.matmul %378, %385, %cst_295 {dimension_numbers = #tpu.dot_dimension_numbers<[1], [1], [0], [0], [0, 0, 1, 0], [], []>} : vector<32x16xf32>, vector<32x16xf32>, vector<32x32xf32> -> vector<32x32xf32>
    %cst_296 = arith.constant 2.500000e-01 : f32
    %394 = vector.broadcast %cst_296 : f32 to vector<32x32xf32>
    %395 = arith.mulf %393, %394 : vector<32x32xf32>
    %396 = arith.addf %395, %21 : vector<32x32xf32>
    %cst_297 = arith.constant dense<0xFF800000> : vector<32xf32>
    %397 = vector.multi_reduction <maximumf>, %396, %cst_297 [1] : vector<32x32xf32> to vector<32xf32>
    %398 = vector.shape_cast %397 : vector<32xf32> to vector<32x1xf32>
    %399 = vector.broadcast %398 : vector<32x1xf32> to vector<32x32xf32>
    %400 = arith.subf %396, %399 : vector<32x32xf32>
    %401 = math.exp %400 : vector<32x32xf32>
    %cst_298 = arith.constant dense<0.000000e+00> : vector<32xf32>
    %402 = vector.multi_reduction <add>, %401, %cst_298 [1] : vector<32x32xf32> to vector<32xf32>
    %403 = vector.shape_cast %402 : vector<32xf32> to vector<32x1xf32>
    %404 = vector.broadcast %403 : vector<32x1xf32> to vector<32x32xf32>
    %405 = arith.divf %401, %404 : vector<32x32xf32>
    %cst_299 = arith.constant dense<0.000000e+00> : vector<32x16xf32>
    %406 = tpu.matmul %405, %392, %cst_299 {dimension_numbers = #tpu.dot_dimension_numbers<[1], [0], [0], [1], [0, 0, 1, 1], [], []>} : vector<32x32xf32>, vector<32x16xf32>, vector<32x16xf32> -> vector<32x16xf32>
    %c0_300 = arith.constant 0 : index
    %c4_301 = arith.constant 4 : index
    %c0_302 = arith.constant 0 : index
    %c0_303 = arith.constant 0 : index
    %407 = vector.load %arg12[%c0_300, %c4_301, %c0_302, %c0_303] : memref<1x6x16x32xf32, #tpu.memory_space<vmem>>, vector<1x1x16x32xf32>
    %408 = vector.shape_cast %407 : vector<1x1x16x32xf32> to vector<16x32xf32>
    %cst_304 = arith.constant dense<0.000000e+00> : vector<32x32xf32>
    %409 = tpu.matmul %406, %408, %cst_304 {dimension_numbers = #tpu.dot_dimension_numbers<[1], [0], [0], [1], [0, 0, 1, 1], [], []>} : vector<32x16xf32>, vector<16x32xf32>, vector<32x32xf32> -> vector<32x32xf32>
    %c0_305 = arith.constant 0 : index
    %c13 = arith.constant 13 : index
    %c0_306 = arith.constant 0 : index
    %c0_307 = arith.constant 0 : index
    %410 = vector.load %arg10[%c0_305, %c13, %c0_306, %c0_307] : memref<1x18x32x16xf32, #tpu.memory_space<vmem>>, vector<1x1x32x16xf32>
    %411 = vector.shape_cast %410 : vector<1x1x32x16xf32> to vector<32x16xf32>
    %cst_308 = arith.constant dense<0.000000e+00> : vector<32x16xf32>
    %412 = tpu.matmul %371, %411, %cst_308 {dimension_numbers = #tpu.dot_dimension_numbers<[1], [0], [0], [1], [0, 0, 1, 1], [], []>} : vector<32x32xf32>, vector<32x16xf32>, vector<32x16xf32> -> vector<32x16xf32>
    %c0_309 = arith.constant 0 : index
    %c13_310 = arith.constant 13 : index
    %c0_311 = arith.constant 0 : index
    %c0_312 = arith.constant 0 : index
    %413 = vector.load %arg11[%c0_309, %c13_310, %c0_311, %c0_312] : memref<1x18x1x16xf32, #tpu.memory_space<vmem>>, vector<1x1x1x16xf32>
    %414 = vector.shape_cast %413 : vector<1x1x1x16xf32> to vector<1x16xf32>
    %415 = vector.broadcast %414 : vector<1x16xf32> to vector<32x16xf32>
    %416 = arith.addf %412, %415 : vector<32x16xf32>
    %c0_313 = arith.constant 0 : index
    %c15 = arith.constant 15 : index
    %c0_314 = arith.constant 0 : index
    %c0_315 = arith.constant 0 : index
    %417 = vector.load %arg10[%c0_313, %c15, %c0_314, %c0_315] : memref<1x18x32x16xf32, #tpu.memory_space<vmem>>, vector<1x1x32x16xf32>
    %418 = vector.shape_cast %417 : vector<1x1x32x16xf32> to vector<32x16xf32>
    %cst_316 = arith.constant dense<0.000000e+00> : vector<32x16xf32>
    %419 = tpu.matmul %371, %418, %cst_316 {dimension_numbers = #tpu.dot_dimension_numbers<[1], [0], [0], [1], [0, 0, 1, 1], [], []>} : vector<32x32xf32>, vector<32x16xf32>, vector<32x16xf32> -> vector<32x16xf32>
    %c0_317 = arith.constant 0 : index
    %c15_318 = arith.constant 15 : index
    %c0_319 = arith.constant 0 : index
    %c0_320 = arith.constant 0 : index
    %420 = vector.load %arg11[%c0_317, %c15_318, %c0_319, %c0_320] : memref<1x18x1x16xf32, #tpu.memory_space<vmem>>, vector<1x1x1x16xf32>
    %421 = vector.shape_cast %420 : vector<1x1x1x16xf32> to vector<1x16xf32>
    %422 = vector.broadcast %421 : vector<1x16xf32> to vector<32x16xf32>
    %423 = arith.addf %419, %422 : vector<32x16xf32>
    %c0_321 = arith.constant 0 : index
    %c17 = arith.constant 17 : index
    %c0_322 = arith.constant 0 : index
    %c0_323 = arith.constant 0 : index
    %424 = vector.load %arg10[%c0_321, %c17, %c0_322, %c0_323] : memref<1x18x32x16xf32, #tpu.memory_space<vmem>>, vector<1x1x32x16xf32>
    %425 = vector.shape_cast %424 : vector<1x1x32x16xf32> to vector<32x16xf32>
    %cst_324 = arith.constant dense<0.000000e+00> : vector<32x16xf32>
    %426 = tpu.matmul %371, %425, %cst_324 {dimension_numbers = #tpu.dot_dimension_numbers<[1], [0], [0], [1], [0, 0, 1, 1], [], []>} : vector<32x32xf32>, vector<32x16xf32>, vector<32x16xf32> -> vector<32x16xf32>
    %c0_325 = arith.constant 0 : index
    %c17_326 = arith.constant 17 : index
    %c0_327 = arith.constant 0 : index
    %c0_328 = arith.constant 0 : index
    %427 = vector.load %arg11[%c0_325, %c17_326, %c0_327, %c0_328] : memref<1x18x1x16xf32, #tpu.memory_space<vmem>>, vector<1x1x1x16xf32>
    %428 = vector.shape_cast %427 : vector<1x1x1x16xf32> to vector<1x16xf32>
    %429 = vector.broadcast %428 : vector<1x16xf32> to vector<32x16xf32>
    %430 = arith.addf %426, %429 : vector<32x16xf32>
    %cst_329 = arith.constant dense<0.000000e+00> : vector<32x32xf32>
    %431 = tpu.matmul %416, %423, %cst_329 {dimension_numbers = #tpu.dot_dimension_numbers<[1], [1], [0], [0], [0, 0, 1, 0], [], []>} : vector<32x16xf32>, vector<32x16xf32>, vector<32x32xf32> -> vector<32x32xf32>
    %cst_330 = arith.constant 2.500000e-01 : f32
    %432 = vector.broadcast %cst_330 : f32 to vector<32x32xf32>
    %433 = arith.mulf %431, %432 : vector<32x32xf32>
    %434 = arith.addf %433, %21 : vector<32x32xf32>
    %cst_331 = arith.constant dense<0xFF800000> : vector<32xf32>
    %435 = vector.multi_reduction <maximumf>, %434, %cst_331 [1] : vector<32x32xf32> to vector<32xf32>
    %436 = vector.shape_cast %435 : vector<32xf32> to vector<32x1xf32>
    %437 = vector.broadcast %436 : vector<32x1xf32> to vector<32x32xf32>
    %438 = arith.subf %434, %437 : vector<32x32xf32>
    %439 = math.exp %438 : vector<32x32xf32>
    %cst_332 = arith.constant dense<0.000000e+00> : vector<32xf32>
    %440 = vector.multi_reduction <add>, %439, %cst_332 [1] : vector<32x32xf32> to vector<32xf32>
    %441 = vector.shape_cast %440 : vector<32xf32> to vector<32x1xf32>
    %442 = vector.broadcast %441 : vector<32x1xf32> to vector<32x32xf32>
    %443 = arith.divf %439, %442 : vector<32x32xf32>
    %cst_333 = arith.constant dense<0.000000e+00> : vector<32x16xf32>
    %444 = tpu.matmul %443, %430, %cst_333 {dimension_numbers = #tpu.dot_dimension_numbers<[1], [0], [0], [1], [0, 0, 1, 1], [], []>} : vector<32x32xf32>, vector<32x16xf32>, vector<32x16xf32> -> vector<32x16xf32>
    %c0_334 = arith.constant 0 : index
    %c5_335 = arith.constant 5 : index
    %c0_336 = arith.constant 0 : index
    %c0_337 = arith.constant 0 : index
    %445 = vector.load %arg12[%c0_334, %c5_335, %c0_336, %c0_337] : memref<1x6x16x32xf32, #tpu.memory_space<vmem>>, vector<1x1x16x32xf32>
    %446 = vector.shape_cast %445 : vector<1x1x16x32xf32> to vector<16x32xf32>
    %cst_338 = arith.constant dense<0.000000e+00> : vector<32x32xf32>
    %447 = tpu.matmul %444, %446, %cst_338 {dimension_numbers = #tpu.dot_dimension_numbers<[1], [0], [0], [1], [0, 0, 1, 1], [], []>} : vector<32x16xf32>, vector<16x32xf32>, vector<32x32xf32> -> vector<32x32xf32>
    %448 = arith.addf %409, %447 : vector<32x32xf32>
    %449 = arith.addf %345, %448 : vector<32x32xf32>
    %c0_339 = arith.constant 0 : index
    %c2_340 = arith.constant 2 : index
    %c0_341 = arith.constant 0 : index
    %c0_342 = arith.constant 0 : index
    %450 = vector.load %arg13[%c0_339, %c2_340, %c0_341, %c0_342] : memref<1x3x1x32xf32, #tpu.memory_space<vmem>>, vector<1x1x1x32xf32>
    %451 = vector.shape_cast %450 : vector<1x1x1x32xf32> to vector<1x32xf32>
    %452 = vector.broadcast %451 : vector<1x32xf32> to vector<32x32xf32>
    %453 = arith.addf %449, %452 : vector<32x32xf32>
    %c0_343 = arith.constant 0 : index
    %c2_344 = arith.constant 2 : index
    %c0_345 = arith.constant 0 : index
    %c0_346 = arith.constant 0 : index
    %454 = vector.load %arg14[%c0_343, %c2_344, %c0_345, %c0_346] : memref<1x3x1x32xf32, #tpu.memory_space<vmem>>, vector<1x1x1x32xf32>
    %455 = vector.shape_cast %454 : vector<1x1x1x32xf32> to vector<1x32xf32>
    %c0_347 = arith.constant 0 : index
    %c2_348 = arith.constant 2 : index
    %c0_349 = arith.constant 0 : index
    %c0_350 = arith.constant 0 : index
    %456 = vector.load %arg15[%c0_347, %c2_348, %c0_349, %c0_350] : memref<1x3x1x32xf32, #tpu.memory_space<vmem>>, vector<1x1x1x32xf32>
    %457 = vector.shape_cast %456 : vector<1x1x1x32xf32> to vector<1x32xf32>
    %cst_351 = arith.constant dense<0.000000e+00> : vector<32xf32>
    %458 = vector.multi_reduction <add>, %453, %cst_351 [1] : vector<32x32xf32> to vector<32xf32>
    %459 = vector.shape_cast %458 : vector<32xf32> to vector<32x1xf32>
    %cst_352 = arith.constant 3.200000e+01 : f32
    %460 = vector.broadcast %cst_352 : f32 to vector<32x1xf32>
    %461 = arith.divf %459, %460 : vector<32x1xf32>
    %462 = vector.broadcast %461 : vector<32x1xf32> to vector<32x32xf32>
    %463 = arith.subf %453, %462 : vector<32x32xf32>
    %464 = arith.mulf %463, %463 : vector<32x32xf32>
    %cst_353 = arith.constant dense<0.000000e+00> : vector<32xf32>
    %465 = vector.multi_reduction <add>, %464, %cst_353 [1] : vector<32x32xf32> to vector<32xf32>
    %466 = vector.shape_cast %465 : vector<32xf32> to vector<32x1xf32>
    %cst_354 = arith.constant 3.200000e+01 : f32
    %467 = vector.broadcast %cst_354 : f32 to vector<32x1xf32>
    %468 = arith.divf %466, %467 : vector<32x1xf32>
    %469 = vector.broadcast %461 : vector<32x1xf32> to vector<32x32xf32>
    %470 = arith.subf %453, %469 : vector<32x32xf32>
    %cst_355 = arith.constant 9.99999974E-6 : f32
    %471 = vector.broadcast %cst_355 : f32 to vector<32x1xf32>
    %472 = arith.addf %468, %471 : vector<32x1xf32>
    %473 = math.rsqrt %472 : vector<32x1xf32>
    %474 = vector.broadcast %473 : vector<32x1xf32> to vector<32x32xf32>
    %475 = arith.mulf %470, %474 : vector<32x32xf32>
    %476 = vector.broadcast %455 : vector<1x32xf32> to vector<32x32xf32>
    %477 = arith.mulf %475, %476 : vector<32x32xf32>
    %478 = vector.broadcast %457 : vector<1x32xf32> to vector<32x32xf32>
    %479 = arith.addf %477, %478 : vector<32x32xf32>
    %c0_356 = arith.constant 0 : index
    %c2_357 = arith.constant 2 : index
    %c0_358 = arith.constant 0 : index
    %c0_359 = arith.constant 0 : index
    %480 = vector.load %arg16[%c0_356, %c2_357, %c0_358, %c0_359] : memref<1x3x32x128xf32, #tpu.memory_space<vmem>>, vector<1x1x32x128xf32>
    %481 = vector.shape_cast %480 : vector<1x1x32x128xf32> to vector<32x128xf32>
    %cst_360 = arith.constant dense<0.000000e+00> : vector<32x128xf32>
    %482 = tpu.matmul %479, %481, %cst_360 {dimension_numbers = #tpu.dot_dimension_numbers<[1], [0], [0], [1], [0, 0, 1, 1], [], []>} : vector<32x32xf32>, vector<32x128xf32>, vector<32x128xf32> -> vector<32x128xf32>
    %c0_361 = arith.constant 0 : index
    %c2_362 = arith.constant 2 : index
    %c0_363 = arith.constant 0 : index
    %c0_364 = arith.constant 0 : index
    %483 = vector.load %arg17[%c0_361, %c2_362, %c0_363, %c0_364] : memref<1x3x1x128xf32, #tpu.memory_space<vmem>>, vector<1x1x1x128xf32>
    %484 = vector.shape_cast %483 : vector<1x1x1x128xf32> to vector<1x128xf32>
    %485 = vector.broadcast %484 : vector<1x128xf32> to vector<32x128xf32>
    %486 = arith.addf %482, %485 : vector<32x128xf32>
    %487 = arith.mulf %486, %486 : vector<32x128xf32>
    %488 = arith.mulf %486, %487 : vector<32x128xf32>
    %cst_365 = arith.constant 4.471500e-02 : f32
    %489 = vector.broadcast %cst_365 : f32 to vector<32x128xf32>
    %490 = arith.mulf %489, %488 : vector<32x128xf32>
    %491 = arith.addf %486, %490 : vector<32x128xf32>
    %cst_366 = arith.constant 0.797884583 : f32
    %492 = vector.broadcast %cst_366 : f32 to vector<32x128xf32>
    %493 = arith.mulf %492, %491 : vector<32x128xf32>
    %494 = math.tanh %493 : vector<32x128xf32>
    %cst_367 = arith.constant 1.000000e+00 : f32
    %495 = vector.broadcast %cst_367 : f32 to vector<32x128xf32>
    %496 = arith.addf %495, %494 : vector<32x128xf32>
    %cst_368 = arith.constant 5.000000e-01 : f32
    %497 = vector.broadcast %cst_368 : f32 to vector<32x128xf32>
    %498 = arith.mulf %497, %496 : vector<32x128xf32>
    %499 = arith.mulf %486, %498 : vector<32x128xf32>
    %c0_369 = arith.constant 0 : index
    %c2_370 = arith.constant 2 : index
    %c0_371 = arith.constant 0 : index
    %c0_372 = arith.constant 0 : index
    %500 = vector.load %arg18[%c0_369, %c2_370, %c0_371, %c0_372] : memref<1x3x128x32xf32, #tpu.memory_space<vmem>>, vector<1x1x128x32xf32>
    %501 = vector.shape_cast %500 : vector<1x1x128x32xf32> to vector<128x32xf32>
    %cst_373 = arith.constant dense<0.000000e+00> : vector<32x32xf32>
    %502 = tpu.matmul %499, %501, %cst_373 {dimension_numbers = #tpu.dot_dimension_numbers<[1], [0], [0], [1], [0, 0, 1, 1], [], []>} : vector<32x128xf32>, vector<128x32xf32>, vector<32x32xf32> -> vector<32x32xf32>
    %503 = arith.addf %453, %502 : vector<32x32xf32>
    %c0_374 = arith.constant 0 : index
    %c2_375 = arith.constant 2 : index
    %c0_376 = arith.constant 0 : index
    %c0_377 = arith.constant 0 : index
    %504 = vector.load %arg19[%c0_374, %c2_375, %c0_376, %c0_377] : memref<1x3x1x32xf32, #tpu.memory_space<vmem>>, vector<1x1x1x32xf32>
    %505 = vector.shape_cast %504 : vector<1x1x1x32xf32> to vector<1x32xf32>
    %506 = vector.broadcast %505 : vector<1x32xf32> to vector<32x32xf32>
    %507 = arith.addf %503, %506 : vector<32x32xf32>
    %c0_i32 = arith.constant 0 : i32
    %508 = arith.cmpi eq, %arg0, %c0_i32 : i32
    %509 = arith.extui %508 : i1 to i32
    %c0_i32_378 = arith.constant 0 : i32
    %510 = arith.cmpi ne, %509, %c0_i32_378 : i32
    scf.if %510 {
      %c0_416 = arith.constant 0 : index
      %c0_417 = arith.constant 0 : index
      %552 = vector.load %arg23[%c0_416, %c0_417] : memref<32x32xf32, #tpu.memory_space<vmem>>, vector<32x32xf32>
      tpu.vector_store %arg23[%c0_416, %c0_417], %507 {strides = array<i32>} : memref<32x32xf32, #tpu.memory_space<vmem>>, vector<32x32xf32>,
    } else {
    }
    %c1_i32 = arith.constant 1 : i32
    %511 = arith.cmpi eq, %arg0, %c1_i32 : i32
    %512 = arith.extui %511 : i1 to i32
    %c0_i32_379 = arith.constant 0 : i32
    %513 = arith.cmpi ne, %512, %c0_i32_379 : i32
    scf.if %513 {
      %cst_416 = arith.constant dense<0.000000e+00> : vector<32xf32>
      %552 = vector.multi_reduction <add>, %345, %cst_416 [1] : vector<32x32xf32> to vector<32xf32>
      %553 = vector.shape_cast %552 : vector<32xf32> to vector<32x1xf32>
      %cst_417 = arith.constant 3.200000e+01 : f32
      %554 = vector.broadcast %cst_417 : f32 to vector<32x1xf32>
      %555 = arith.divf %553, %554 : vector<32x1xf32>
      %556 = vector.broadcast %555 : vector<32x1xf32> to vector<32x32xf32>
      %557 = arith.subf %345, %556 : vector<32x32xf32>
      %558 = arith.mulf %557, %557 : vector<32x32xf32>
      %cst_418 = arith.constant dense<0.000000e+00> : vector<32xf32>
      %559 = vector.multi_reduction <add>, %558, %cst_418 [1] : vector<32x32xf32> to vector<32xf32>
      %560 = vector.shape_cast %559 : vector<32xf32> to vector<32x1xf32>
      %cst_419 = arith.constant 3.200000e+01 : f32
      %561 = vector.broadcast %cst_419 : f32 to vector<32x1xf32>
      %562 = arith.divf %560, %561 : vector<32x1xf32>
      %563 = vector.broadcast %555 : vector<32x1xf32> to vector<32x32xf32>
      %564 = arith.subf %345, %563 : vector<32x32xf32>
      %cst_420 = arith.constant 9.99999974E-6 : f32
      %565 = vector.broadcast %cst_420 : f32 to vector<32x1xf32>
      %566 = arith.addf %562, %565 : vector<32x1xf32>
      %567 = math.rsqrt %566 : vector<32x1xf32>
      %568 = vector.broadcast %567 : vector<32x1xf32> to vector<32x32xf32>
      %569 = arith.mulf %564, %568 : vector<32x32xf32>
      %cst_421 = arith.constant dense<0.000000e+00> : vector<32xf32>
      %570 = vector.multi_reduction <add>, %507, %cst_421 [1] : vector<32x32xf32> to vector<32xf32>
      %571 = vector.shape_cast %570 : vector<32xf32> to vector<32x1xf32>
      %cst_422 = arith.constant 3.200000e+01 : f32
      %572 = vector.broadcast %cst_422 : f32 to vector<32x1xf32>
      %573 = arith.divf %571, %572 : vector<32x1xf32>
      %574 = vector.broadcast %573 : vector<32x1xf32> to vector<32x32xf32>
      %575 = arith.subf %507, %574 : vector<32x32xf32>
      %576 = arith.mulf %575, %575 : vector<32x32xf32>
      %cst_423 = arith.constant dense<0.000000e+00> : vector<32xf32>
      %577 = vector.multi_reduction <add>, %576, %cst_423 [1] : vector<32x32xf32> to vector<32xf32>
      %578 = vector.shape_cast %577 : vector<32xf32> to vector<32x1xf32>
      %cst_424 = arith.constant 3.200000e+01 : f32
      %579 = vector.broadcast %cst_424 : f32 to vector<32x1xf32>
      %580 = arith.divf %578, %579 : vector<32x1xf32>
      %581 = vector.broadcast %573 : vector<32x1xf32> to vector<32x32xf32>
      %582 = arith.subf %507, %581 : vector<32x32xf32>
      %cst_425 = arith.constant 9.99999974E-6 : f32
      %583 = vector.broadcast %cst_425 : f32 to vector<32x1xf32>
      %584 = arith.addf %580, %583 : vector<32x1xf32>
      %585 = math.rsqrt %584 : vector<32x1xf32>
      %586 = vector.broadcast %585 : vector<32x1xf32> to vector<32x32xf32>
      %587 = arith.mulf %582, %586 : vector<32x32xf32>
      %588 = arith.addf %569, %587 : vector<32x32xf32>
      %cst_426 = arith.constant 5.000000e-01 : f32
      %589 = vector.broadcast %cst_426 : f32 to vector<32x32xf32>
      %590 = arith.mulf %588, %589 : vector<32x32xf32>
      %cst_427 = arith.constant dense<0.000000e+00> : vector<32xf32>
      %591 = vector.multi_reduction <add>, %590, %cst_427 [1] : vector<32x32xf32> to vector<32xf32>
      %592 = vector.shape_cast %591 : vector<32xf32> to vector<32x1xf32>
      %cst_428 = arith.constant 3.200000e+01 : f32
      %593 = vector.broadcast %cst_428 : f32 to vector<32x1xf32>
      %594 = arith.divf %592, %593 : vector<32x1xf32>
      %595 = vector.broadcast %594 : vector<32x1xf32> to vector<32x32xf32>
      %596 = arith.subf %590, %595 : vector<32x32xf32>
      %597 = arith.mulf %596, %596 : vector<32x32xf32>
      %cst_429 = arith.constant dense<0.000000e+00> : vector<32xf32>
      %598 = vector.multi_reduction <add>, %597, %cst_429 [1] : vector<32x32xf32> to vector<32xf32>
      %599 = vector.shape_cast %598 : vector<32xf32> to vector<32x1xf32>
      %cst_430 = arith.constant 3.200000e+01 : f32
      %600 = vector.broadcast %cst_430 : f32 to vector<32x1xf32>
      %601 = arith.divf %599, %600 : vector<32x1xf32>
      %602 = vector.broadcast %594 : vector<32x1xf32> to vector<32x32xf32>
      %603 = arith.subf %590, %602 : vector<32x32xf32>
      %cst_431 = arith.constant 9.99999974E-6 : f32
      %604 = vector.broadcast %cst_431 : f32 to vector<32x1xf32>
      %605 = arith.addf %601, %604 : vector<32x1xf32>
      %606 = math.rsqrt %605 : vector<32x1xf32>
      %607 = vector.broadcast %606 : vector<32x1xf32> to vector<32x32xf32>
      %608 = arith.mulf %603, %607 : vector<32x32xf32>
      %c0_432 = arith.constant 0 : index
      %c0_433 = arith.constant 0 : index
      %609 = vector.load %arg23[%c0_432, %c0_433] : memref<32x32xf32, #tpu.memory_space<vmem>>, vector<32x32xf32>
      tpu.vector_store %arg23[%c0_432, %c0_433], %608 {strides = array<i32>} : memref<32x32xf32, #tpu.memory_space<vmem>>, vector<32x32xf32>,
    } else {
    }
    %c0_380 = arith.constant 0 : index
    %514 = memref.load %arg1[%c0_380] : memref<8xi32, #tpu.memory_space<smem>>
    %515 = arith.index_cast %514 : i32 to index
    %c0_381 = arith.constant 0 : index
    %516 = vector.load %arg23[%515, %c0_381] : memref<32x32xf32, #tpu.memory_space<vmem>>, vector<1x32xf32>
    %c0_382 = arith.constant 0 : index
    %c0_383 = arith.constant 0 : index
    %517 = vector.load %arg24[%c0_382, %c0_383] : memref<8x32xf32, #tpu.memory_space<vmem>>, vector<1x32xf32>
    tpu.vector_store %arg24[%c0_382, %c0_383], %516 {strides = array<i32>} : memref<8x32xf32, #tpu.memory_space<vmem>>, vector<1x32xf32>,
    %c1_384 = arith.constant 1 : index
    %518 = memref.load %arg1[%c1_384] : memref<8xi32, #tpu.memory_space<smem>>
    %519 = arith.index_cast %518 : i32 to index
    %c0_385 = arith.constant 0 : index
    %520 = vector.load %arg23[%519, %c0_385] : memref<32x32xf32, #tpu.memory_space<vmem>>, vector<1x32xf32>
    %c1_386 = arith.constant 1 : index
    %c0_387 = arith.constant 0 : index
    %521 = vector.load %arg24[%c1_386, %c0_387] : memref<8x32xf32, #tpu.memory_space<vmem>>, vector<1x32xf32>
    tpu.vector_store %arg24[%c1_386, %c0_387], %520 {strides = array<i32>} : memref<8x32xf32, #tpu.memory_space<vmem>>, vector<1x32xf32>,
    %c2_388 = arith.constant 2 : index
    %522 = memref.load %arg1[%c2_388] : memref<8xi32, #tpu.memory_space<smem>>
    %523 = arith.index_cast %522 : i32 to index
    %c0_389 = arith.constant 0 : index
    %524 = vector.load %arg23[%523, %c0_389] : memref<32x32xf32, #tpu.memory_space<vmem>>, vector<1x32xf32>
    %c2_390 = arith.constant 2 : index
    %c0_391 = arith.constant 0 : index
    %525 = vector.load %arg24[%c2_390, %c0_391] : memref<8x32xf32, #tpu.memory_space<vmem>>, vector<1x32xf32>
    tpu.vector_store %arg24[%c2_390, %c0_391], %524 {strides = array<i32>} : memref<8x32xf32, #tpu.memory_space<vmem>>, vector<1x32xf32>,
    %c3_392 = arith.constant 3 : index
    %526 = memref.load %arg1[%c3_392] : memref<8xi32, #tpu.memory_space<smem>>
    %527 = arith.index_cast %526 : i32 to index
    %c0_393 = arith.constant 0 : index
    %528 = vector.load %arg23[%527, %c0_393] : memref<32x32xf32, #tpu.memory_space<vmem>>, vector<1x32xf32>
    %c3_394 = arith.constant 3 : index
    %c0_395 = arith.constant 0 : index
    %529 = vector.load %arg24[%c3_394, %c0_395] : memref<8x32xf32, #tpu.memory_space<vmem>>, vector<1x32xf32>
    tpu.vector_store %arg24[%c3_394, %c0_395], %528 {strides = array<i32>} : memref<8x32xf32, #tpu.memory_space<vmem>>, vector<1x32xf32>,
    %c4_396 = arith.constant 4 : index
    %530 = memref.load %arg1[%c4_396] : memref<8xi32, #tpu.memory_space<smem>>
    %531 = arith.index_cast %530 : i32 to index
    %c0_397 = arith.constant 0 : index
    %532 = vector.load %arg23[%531, %c0_397] : memref<32x32xf32, #tpu.memory_space<vmem>>, vector<1x32xf32>
    %c4_398 = arith.constant 4 : index
    %c0_399 = arith.constant 0 : index
    %533 = vector.load %arg24[%c4_398, %c0_399] : memref<8x32xf32, #tpu.memory_space<vmem>>, vector<1x32xf32>
    tpu.vector_store %arg24[%c4_398, %c0_399], %532 {strides = array<i32>} : memref<8x32xf32, #tpu.memory_space<vmem>>, vector<1x32xf32>,
    %c5_400 = arith.constant 5 : index
    %534 = memref.load %arg1[%c5_400] : memref<8xi32, #tpu.memory_space<smem>>
    %535 = arith.index_cast %534 : i32 to index
    %c0_401 = arith.constant 0 : index
    %536 = vector.load %arg23[%535, %c0_401] : memref<32x32xf32, #tpu.memory_space<vmem>>, vector<1x32xf32>
    %c5_402 = arith.constant 5 : index
    %c0_403 = arith.constant 0 : index
    %537 = vector.load %arg24[%c5_402, %c0_403] : memref<8x32xf32, #tpu.memory_space<vmem>>, vector<1x32xf32>
    tpu.vector_store %arg24[%c5_402, %c0_403], %536 {strides = array<i32>} : memref<8x32xf32, #tpu.memory_space<vmem>>, vector<1x32xf32>,
    %c6_404 = arith.constant 6 : index
    %538 = memref.load %arg1[%c6_404] : memref<8xi32, #tpu.memory_space<smem>>
    %539 = arith.index_cast %538 : i32 to index
    %c0_405 = arith.constant 0 : index
    %540 = vector.load %arg23[%539, %c0_405] : memref<32x32xf32, #tpu.memory_space<vmem>>, vector<1x32xf32>
    %c6_406 = arith.constant 6 : index
    %c0_407 = arith.constant 0 : index
    %541 = vector.load %arg24[%c6_406, %c0_407] : memref<8x32xf32, #tpu.memory_space<vmem>>, vector<1x32xf32>
    tpu.vector_store %arg24[%c6_406, %c0_407], %540 {strides = array<i32>} : memref<8x32xf32, #tpu.memory_space<vmem>>, vector<1x32xf32>,
    %c7_408 = arith.constant 7 : index
    %542 = memref.load %arg1[%c7_408] : memref<8xi32, #tpu.memory_space<smem>>
    %543 = arith.index_cast %542 : i32 to index
    %c0_409 = arith.constant 0 : index
    %544 = vector.load %arg23[%543, %c0_409] : memref<32x32xf32, #tpu.memory_space<vmem>>, vector<1x32xf32>
    %c7_410 = arith.constant 7 : index
    %c0_411 = arith.constant 0 : index
    %545 = vector.load %arg24[%c7_410, %c0_411] : memref<8x32xf32, #tpu.memory_space<vmem>>, vector<1x32xf32>
    tpu.vector_store %arg24[%c7_410, %c0_411], %544 {strides = array<i32>} : memref<8x32xf32, #tpu.memory_space<vmem>>, vector<1x32xf32>,
    %c0_i32_412 = arith.constant 0 : i32
    %546 = arith.cmpi eq, %arg0, %c0_i32_412 : i32
    %547 = arith.extui %546 : i1 to i32
    %c0_i32_413 = arith.constant 0 : i32
    %548 = arith.cmpi ne, %547, %c0_i32_413 : i32
    scf.if %548 {
      %c0_416 = arith.constant 0 : index
      %c0_417 = arith.constant 0 : index
      %552 = vector.load %arg24[%c0_416, %c0_417] : memref<8x32xf32, #tpu.memory_space<vmem>>, vector<8x32xf32>
      %c0_418 = arith.constant 0 : index
      %c0_419 = arith.constant 0 : index
      %553 = vector.load %arg20[%c0_418, %c0_419] : memref<32x32xf32, #tpu.memory_space<vmem>>, vector<32x32xf32>
      %cst_420 = arith.constant dense<0.000000e+00> : vector<8x32xf32>
      %554 = tpu.matmul %552, %553, %cst_420 {dimension_numbers = #tpu.dot_dimension_numbers<[1], [0], [0], [1], [0, 0, 1, 1], [], []>} : vector<8x32xf32>, vector<32x32xf32>, vector<8x32xf32> -> vector<8x32xf32>
      %c0_421 = arith.constant 0 : index
      %c0_422 = arith.constant 0 : index
      %555 = vector.load %arg21[%c0_421, %c0_422] : memref<1x32xf32, #tpu.memory_space<vmem>>, vector<1x32xf32>
      %556 = vector.broadcast %555 : vector<1x32xf32> to vector<8x32xf32>
      %557 = arith.addf %554, %556 : vector<8x32xf32>
      %c0_423 = arith.constant 0 : index
      %c0_424 = arith.constant 0 : index
      %c0_425 = arith.constant 0 : index
      %558 = vector.load %arg22[%c0_423, %c0_424, %c0_425] : memref<1x8x32xf32, #tpu.memory_space<vmem>>, vector<1x8x32xf32>
      %559 = vector.shape_cast %558 : vector<1x8x32xf32> to vector<8x32xf32>
      %560 = vector.shape_cast %557 : vector<8x32xf32> to vector<1x8x32xf32>
      tpu.vector_store %arg22[%c0_423, %c0_424, %c0_425], %560 {strides = array<i32>} : memref<1x8x32xf32, #tpu.memory_space<vmem>>, vector<1x8x32xf32>,
    } else {
    }
    %c1_i32_414 = arith.constant 1 : i32
    %549 = arith.cmpi eq, %arg0, %c1_i32_414 : i32
    %550 = arith.extui %549 : i1 to i32
    %c0_i32_415 = arith.constant 0 : i32
    %551 = arith.cmpi ne, %550, %c0_i32_415 : i32
    scf.if %551 {
      %c0_416 = arith.constant 0 : index
      %c0_417 = arith.constant 0 : index
      %552 = vector.load %arg24[%c0_416, %c0_417] : memref<8x32xf32, #tpu.memory_space<vmem>>, vector<8x32xf32>
      %c0_418 = arith.constant 0 : index
      %c0_419 = arith.constant 0 : index
      %c0_420 = arith.constant 0 : index
      %553 = vector.load %arg22[%c0_418, %c0_419, %c0_420] : memref<1x8x32xf32, #tpu.memory_space<vmem>>, vector<1x8x32xf32>
      %554 = vector.shape_cast %553 : vector<1x8x32xf32> to vector<8x32xf32>
      %555 = vector.shape_cast %552 : vector<8x32xf32> to vector<1x8x32xf32>
      tpu.vector_store %arg22[%c0_418, %c0_419, %c0_420], %555 {strides = array<i32>} : memref<1x8x32xf32, #tpu.memory_space<vmem>>, vector<1x8x32xf32>,
    } else {
    }
    return
  }
  func.func @transform_0(%arg0: i32, %arg1: memref<8xi32, #tpu.memory_space<smem>>) -> (i32, i32, i32) {
    %c0_i32 = arith.constant 0 : i32
    %c0_i32_0 = arith.constant 0 : i32
    %c0_i32_1 = arith.constant 0 : i32
    return %arg0, %c0_i32, %c0_i32_0 : i32, i32, i32
  }
  func.func @transform_1(%arg0: i32, %arg1: memref<8xi32, #tpu.memory_space<smem>>) -> (i32, i32, i32) {
    %c0_i32 = arith.constant 0 : i32
    %c0_i32_0 = arith.constant 0 : i32
    %c0_i32_1 = arith.constant 0 : i32
    return %arg0, %c0_i32, %c0_i32_0 : i32, i32, i32
  }
  func.func @transform_2(%arg0: i32, %arg1: memref<8xi32, #tpu.memory_space<smem>>) -> (i32, i32) {
    %c0_i32 = arith.constant 0 : i32
    %c0_i32_0 = arith.constant 0 : i32
    %c0_i32_1 = arith.constant 0 : i32
    return %c0_i32, %c0_i32_0 : i32, i32
  }
  func.func @transform_3(%arg0: i32, %arg1: memref<8xi32, #tpu.memory_space<smem>>) -> (i32, i32, i32) {
    %c0_i32 = arith.constant 0 : i32
    %c0_i32_0 = arith.constant 0 : i32
    %c0_i32_1 = arith.constant 0 : i32
    return %arg0, %c0_i32, %c0_i32_0 : i32, i32, i32
  }
  func.func @transform_4(%arg0: i32, %arg1: memref<8xi32, #tpu.memory_space<smem>>) -> (i32, i32, i32) {
    %c0_i32 = arith.constant 0 : i32
    %c0_i32_0 = arith.constant 0 : i32
    %c0_i32_1 = arith.constant 0 : i32
    return %arg0, %c0_i32, %c0_i32_0 : i32, i32, i32
  }
  func.func @transform_5(%arg0: i32, %arg1: memref<8xi32, #tpu.memory_space<smem>>) -> (i32, i32, i32) {
    %c0_i32 = arith.constant 0 : i32
    %c0_i32_0 = arith.constant 0 : i32
    %c0_i32_1 = arith.constant 0 : i32
    return %arg0, %c0_i32, %c0_i32_0 : i32, i32, i32
  }
  func.func @transform_6(%arg0: i32, %arg1: memref<8xi32, #tpu.memory_space<smem>>) -> (i32, i32, i32, i32) {
    %c0_i32 = arith.constant 0 : i32
    %c0_i32_0 = arith.constant 0 : i32
    %c0_i32_1 = arith.constant 0 : i32
    %c0_i32_2 = arith.constant 0 : i32
    return %arg0, %c0_i32, %c0_i32_0, %c0_i32_1 : i32, i32, i32, i32
  }
  func.func @transform_7(%arg0: i32, %arg1: memref<8xi32, #tpu.memory_space<smem>>) -> (i32, i32, i32, i32) {
    %c0_i32 = arith.constant 0 : i32
    %c0_i32_0 = arith.constant 0 : i32
    %c0_i32_1 = arith.constant 0 : i32
    %c0_i32_2 = arith.constant 0 : i32
    return %arg0, %c0_i32, %c0_i32_0, %c0_i32_1 : i32, i32, i32, i32
  }
  func.func @transform_8(%arg0: i32, %arg1: memref<8xi32, #tpu.memory_space<smem>>) -> (i32, i32, i32, i32) {
    %c0_i32 = arith.constant 0 : i32
    %c0_i32_0 = arith.constant 0 : i32
    %c0_i32_1 = arith.constant 0 : i32
    %c0_i32_2 = arith.constant 0 : i32
    return %arg0, %c0_i32, %c0_i32_0, %c0_i32_1 : i32, i32, i32, i32
  }
  func.func @transform_9(%arg0: i32, %arg1: memref<8xi32, #tpu.memory_space<smem>>) -> (i32, i32, i32, i32) {
    %c0_i32 = arith.constant 0 : i32
    %c0_i32_0 = arith.constant 0 : i32
    %c0_i32_1 = arith.constant 0 : i32
    %c0_i32_2 = arith.constant 0 : i32
    return %arg0, %c0_i32, %c0_i32_0, %c0_i32_1 : i32, i32, i32, i32
  }
  func.func @transform_10(%arg0: i32, %arg1: memref<8xi32, #tpu.memory_space<smem>>) -> (i32, i32, i32, i32) {
    %c0_i32 = arith.constant 0 : i32
    %c0_i32_0 = arith.constant 0 : i32
    %c0_i32_1 = arith.constant 0 : i32
    %c0_i32_2 = arith.constant 0 : i32
    return %arg0, %c0_i32, %c0_i32_0, %c0_i32_1 : i32, i32, i32, i32
  }
  func.func @transform_11(%arg0: i32, %arg1: memref<8xi32, #tpu.memory_space<smem>>) -> (i32, i32, i32, i32) {
    %c0_i32 = arith.constant 0 : i32
    %c0_i32_0 = arith.constant 0 : i32
    %c0_i32_1 = arith.constant 0 : i32
    %c0_i32_2 = arith.constant 0 : i32
    return %arg0, %c0_i32, %c0_i32_0, %c0_i32_1 : i32, i32, i32, i32
  }
  func.func @transform_12(%arg0: i32, %arg1: memref<8xi32, #tpu.memory_space<smem>>) -> (i32, i32, i32, i32) {
    %c0_i32 = arith.constant 0 : i32
    %c0_i32_0 = arith.constant 0 : i32
    %c0_i32_1 = arith.constant 0 : i32
    %c0_i32_2 = arith.constant 0 : i32
    return %arg0, %c0_i32, %c0_i32_0, %c0_i32_1 : i32, i32, i32, i32
  }
  func.func @transform_13(%arg0: i32, %arg1: memref<8xi32, #tpu.memory_space<smem>>) -> (i32, i32, i32, i32) {
    %c0_i32 = arith.constant 0 : i32
    %c0_i32_0 = arith.constant 0 : i32
    %c0_i32_1 = arith.constant 0 : i32
    %c0_i32_2 = arith.constant 0 : i32
    return %arg0, %c0_i32, %c0_i32_0, %c0_i32_1 : i32, i32, i32, i32
  }
  func.func @transform_14(%arg0: i32, %arg1: memref<8xi32, #tpu.memory_space<smem>>) -> (i32, i32, i32, i32) {
    %c0_i32 = arith.constant 0 : i32
    %c0_i32_0 = arith.constant 0 : i32
    %c0_i32_1 = arith.constant 0 : i32
    %c0_i32_2 = arith.constant 0 : i32
    return %arg0, %c0_i32, %c0_i32_0, %c0_i32_1 : i32, i32, i32, i32
  }
  func.func @transform_15(%arg0: i32, %arg1: memref<8xi32, #tpu.memory_space<smem>>) -> (i32, i32, i32, i32) {
    %c0_i32 = arith.constant 0 : i32
    %c0_i32_0 = arith.constant 0 : i32
    %c0_i32_1 = arith.constant 0 : i32
    %c0_i32_2 = arith.constant 0 : i32
    return %arg0, %c0_i32, %c0_i32_0, %c0_i32_1 : i32, i32, i32, i32
  }
  func.func @transform_16(%arg0: i32, %arg1: memref<8xi32, #tpu.memory_space<smem>>) -> (i32, i32, i32, i32) {
    %c0_i32 = arith.constant 0 : i32
    %c0_i32_0 = arith.constant 0 : i32
    %c0_i32_1 = arith.constant 0 : i32
    %c0_i32_2 = arith.constant 0 : i32
    return %arg0, %c0_i32, %c0_i32_0, %c0_i32_1 : i32, i32, i32, i32
  }
  func.func @transform_17(%arg0: i32, %arg1: memref<8xi32, #tpu.memory_space<smem>>) -> (i32, i32, i32, i32) {
    %c0_i32 = arith.constant 0 : i32
    %c0_i32_0 = arith.constant 0 : i32
    %c0_i32_1 = arith.constant 0 : i32
    %c0_i32_2 = arith.constant 0 : i32
    return %arg0, %c0_i32, %c0_i32_0, %c0_i32_1 : i32, i32, i32, i32
  }
  func.func @transform_18(%arg0: i32, %arg1: memref<8xi32, #tpu.memory_space<smem>>) -> (i32, i32) {
    %c0_i32 = arith.constant 0 : i32
    %c0_i32_0 = arith.constant 0 : i32
    %c0_i32_1 = arith.constant 0 : i32
    return %c0_i32, %c0_i32_0 : i32, i32
  }
  func.func @transform_19(%arg0: i32, %arg1: memref<8xi32, #tpu.memory_space<smem>>) -> (i32, i32) {
    %c0_i32 = arith.constant 0 : i32
    %c0_i32_0 = arith.constant 0 : i32
    %c0_i32_1 = arith.constant 0 : i32
    return %c0_i32, %c0_i32_0 : i32, i32
  }
  func.func @transform_20(%arg0: i32, %arg1: memref<8xi32, #tpu.memory_space<smem>>) -> (i32, i32, i32) {
    %c0_i32 = arith.constant 0 : i32
    %c0_i32_0 = arith.constant 0 : i32
    %c0_i32_1 = arith.constant 0 : i32
    return %arg0, %c0_i32, %c0_i32_0 : i32, i32, i32
  }
}

</mosaic_0001>

<bundles_post_ra>
// kernel: tpu_custom_call.1
= control target key start
LH: loop header
LB: loop body
LE: loop exit
PB: predicated region body
PF: predicated region fallthrough
CT: control target
= control target key end

     0   :  { %s5625_s27 = smov [#allocation5]   ;;  %s7053_s0 = inlined_call_operand.vmem [shape: s32[8], index: 0, kind: input, shape index: {}]   ;;  %s7054_s1 = inlined_call_operand.vmem [shape: f32[2,32,64], index: 1, kind: input, shape index: {}]   ;;  %s7055_s2 = inlined_call_operand.vmem [shape: f32[2,32,1], index: 2, kind: input, shape index: {}]   ;;  %s7056_s3 = inlined_call_operand.vmem [shape: f32[32,32], index: 3, kind: input, shape index: {}]   ;;  %s7057_s4 = inlined_call_operand.vmem [shape: f32[2,64,32], index: 4, kind: input, shape index: {}]   ;;  %s7058_s5 = inlined_call_operand.vmem [shape: f32[2,1,32], index: 5, kind: input, shape index: {}]   ;;  %s7059_s6 = inlined_call_operand.vmem [shape: f32[2,1,32], index: 6, kind: input, shape index: {}]   ;;  %s7060_s7 = inlined_call_operand.vmem [shape: f32[2,3,1,32], index: 7, kind: input, shape index: {}]   ;;  %s7061_s8 = inlined_call_operand.vmem [shape: f32[2,3,1,32], index: 8, kind: input, shape index: {}]   ;;  %s7062_s9 = inlined_call_operand.vmem [shape: f32[2,18,32,16], index: 9, kind: input, shape index: {}]   ;;  %s7063_s10 = inlined_call_operand.vmem [shape: f32[2,18,1,16], index: 10, kind: input, shape index: {}]   ;;  %s7064_s11 = inlined_call_operand.vmem [shape: f32[2,6,16,32], index: 11, kind: input, shape index: {}]   ;;  %s7065_s12 = inlined_call_operand.vmem [shape: f32[2,3,1,32], index: 12, kind: input, shape index: {}]   ;;  %s7066_s13 = inlined_call_operand.vmem [shape: f32[2,3,1,32], index: 13, kind: input, shape index: {}]   ;;  %s7067_s14 = inlined_call_operand.vmem [shape: f32[2,3,1,32], index: 14, kind: input, shape index: {}]   ;;  %s7068_s15 = inlined_call_operand.vmem [shape: f32[2,3,32,128], index: 15, kind: input, shape index: {}]   ;;  %s7069_s16 = inlined_call_operand.vmem [shape: f32[2,3,1,128], index: 16, kind: input, shape index: {}]   ;;  %s7070_s17 = inlined_call_operand.vmem [shape: f32[2,3,128,32], index: 17, kind: input, shape index: {}]   ;;  %s7071_s18 = inlined_call_operand.vmem [shape: f32[2,3,1,32], index: 18, kind: input, shape index: {}]   ;;  %s7072_s19 = inlined_call_operand.vmem [shape: f32[32,32], index: 19, kind: input, shape index: {}]   ;;  %s7073_s20 = inlined_call_operand.vmem [shape: f32[1,32], index: 20, kind: input, shape index: {}]   ;;  %s7074_s21 = inlined_call_operand.hbm [shape: f32[2,8,32], index: 21, kind: output, shape index: {}]  }
   0x1   :  { %7087 = sst [smem:[#allocation18_spill]] %s7053_s0 }
   0x2   :  { %7088 = sst [smem:[#allocation19_spill]] %s7054_s1 }
   0x3   :  { %7089 = sst [smem:[#allocation20_spill]] %s7055_s2 }
   0x4   :  { %7090 = sst [smem:[#allocation21_spill]] %s7056_s3 }
   0x5   :  { %7091 = sst [smem:[#allocation22_spill]] %s7057_s4 }
   0x6   :  { %7092 = sst [smem:[#allocation23_spill]] %s7058_s5 }
   0x7   :  { %7093 = sst [smem:[#allocation24_spill]] %s7059_s6 }
   0x8   :  { %7094 = sst [smem:[#allocation25_spill]] %s7060_s7 }
   0x9   :  { %7095 = sst [smem:[#allocation26_spill]] %s7061_s8 }
   0xa   :  { %7096 = sst [smem:[#allocation27_spill]] %s7062_s9 }
   0xb   :  { %7097 = sst [smem:[#allocation28_spill]] %s7068_s15 }
   0xc   :  { %7098 = sst [smem:[#allocation29_spill]] %s7074_s21 }
   0xd   :  { %s7099_s26 = sld [smem:[#allocation18_spill]] }
  0x13   :  { %s27_s15 = sshll.u32 %s7099_s26, 4  ;;  %s28_s15 = int_to_ptr.vmem [resolvable:$true] %s27_s15 }
  0x14   :  { %30 = dma.vmem_to_smem %s28_s15, 16, %s5625_s27, [#allocation4] }
  0x15   :  { %5603 = dma.done.wait [#allocation4], 16 }
  0x16   :  { %5604 = vsyncadd [#allocation4], 4294967280 }
  0x17   :  { %33 = sfence }
  0x18   :  { %34 = vsyncpa [#allocation7], 0 }
  0x19   :  { %36 = vsyncpa [#allocation7 + $0x1], 0  ;;  %s5741_s3 = smov 0   ;;  %s5743_s28 = smov 0  }
  0x1a   :  { %s5745_s29 = smov 0   ;;  %s5747_s0 = smov 0  }
  0x1b LB: > { %7100 = sst [smem:[#allocation10_spill]] %s5611_s3  ;;  %s5762_s15 = sadd.s32 4294967295, %s5623_s0   ;;  %s5623_s0 = sphi %s5747_s0, %s7127_s0   ;;  %s5619_s29 = sphi %s5745_s29, %s7130_s29   ;;  %s5615_s28 = sphi %s5743_s28, %s7129_s28   ;;  %s5611_s3 = sphi %s5741_s3, %s7128_s3  }
  0x1c   : > { %7101 = sst [smem:[#allocation11_spill]] %s5615_s28  ;;  %s4890_s4 = sadd.s32 4294967294, %s5623_s0  }
  0x1d   : > { %7102 = sst [smem:[#allocation12_spill]] %s5619_s29  ;;  %s5766_s30 = sadd.s32 1, %s5623_s0  }
  0x1e   : > { %7103 = sst [smem:[#allocation13_spill]] %s5623_s0  ;;  %s554_s5 = sadd.s32 1, %s5619_s29 }
  0x1f   : > { %7104 = sst [smem:[#allocation14_spill]] %s5766_s30  ;;  %s551_s22 = ssub.s32 %s5623_s0, %s5766_s30 }
  0x20   : > { %p564_p0 = scmp.ne.s32.totalorder %s5619_s29, %s5615_s28  ;;  %p552_p1 = scmp.eq.s32.totalorder %s551_s22, 0 }
  0x21   : > { %p565_p2 = scmp.eq.s32.totalorder %s5762_s15, 1  ;;  %p570_p3 = scmp.ne.s32.totalorder %s5615_s28, %s5611_s3 }
  0x22   : > { %p571_p4 = scmp.eq.s32.totalorder %s4890_s4, 1  ;;  %p4893_p7 = scmp.ge.s32.totalorder %s5623_s0, 1 }
  0x23   : > { %s5777_s23 = scalar_select %p552_p1, %s5619_s29, %s554_s5  }
  0x24   : > { %p5779_p5 = por %p565_p2, %p564_p0  ;;  %p5783_p6 = por %p571_p4, %p570_p3 }
  0x25   : > { %7105 = sst [smem:[#allocation15_spill]] %s5777_s23  ;;  %p722_p8 = scmp.lt.s32.totalorder %s5623_s0, 3 }
  0x26   : > { %s7106_s1 = scalar_select %p5779_p5, 1, 0 }
  0x27   : > { %s7108_s24 = scalar_select %p5783_p6, 1, 0 }
  0x28   : > { %7107 = sst [smem:[#allocation16_spill]] %s7106_s1  ;;  %p723_p9 = pnand %p4893_p7, %p722_p8 }
  0x29   : > { %7109 = sst [smem:[#allocation17_spill]] %s7108_s24  ;;  %s7077_s2 = sand.u32 (!%p723_p9), 1, %s5615_s28  }
  0x2a   : > { %726 = sbr.rel (%p723_p9) target bundleno = 7215 (0x1c2f), region = 100  ;;  %p848_p10 = scmp.lt.s32.totalorder (!%p723_p9), %s5762_s15, 1 }
  0x2b   : > { %s5793_s25 = sshll.u32 (!%p723_p9), %s7077_s2, 3  ;;  %s7110_s22 = sld [smem:[#allocation22_spill]] (!%p723_p9) }
  0x2c   : > { %s7111_s24 = sld [smem:[#allocation20_spill]] (!%p723_p9)  ;;  %p5238_p11 = scmp.ne.s32.totalorder (!%p723_p9), %s5762_s15, 0 }
  0x2d   : > { %s7112_s6 = sld [smem:[#allocation24_spill]] (!%p723_p9) }
  0x2e   : > { %s7113_s30 = sld [smem:[#allocation23_spill]] (!%p723_p9) }
  0x2f   : > { %v5626_v0 = vmov 0   ;;  %s5796_s26 = scalar_select %p848_p10, %s5762_s15, 1  ;;  %vm937_vm0 = vcmask 523264   ;;  %vm1049_vm1 = vcmask 261120   ;;  %v5627_v55 = vmov 32.0  }
  0x30   : > { %5308 = vset.pattern.permute.xlu0 %v5626_v0  ;;  %5309 = vset.pattern.permute.xlu1 %v5626_v0  ;;  %s7114_s1 = sld [smem:[#allocation19_spill]]  ;;  %5352 = vrcp.f32 %v5627_v55  ;;  %vm1286_vm15 = vcmask 130048  }
  0x31   : > { %5310 = vset.pattern.permute.xlu2 %v5626_v0  ;;  %s5256_s27 = sshll.u32 %s5796_s26, 6  ;;  %s5254_s29 = sshll.u32 %s5796_s26, 5 }
  0x32   : > { %s862_s23 = scalar_lea.vmem %s7110_s22, %s5256_s27  ;;  %s857_s3 = scalar_lea.vmem %s7111_s24, %s5254_s29 }
  0x33   : > { %v932_v1 = vld [vmem:[%s862_s23 + $0x38] sm:$0xff]  ;;  %v931_v2 = vld [vmem:[%s862_s23 + $0x30] sm:$0xff]  ;;  %v930_v3 = vld [vmem:[%s862_s23 + $0x28] sm:$0xff]  ;;  %s868_s27 = scalar_lea.vmem %s7112_s6, %s5796_s26  ;;  %s7115_s7 = sld [smem:[#allocation25_spill]] }
  0x34   : > { %958 = vmatpush.msra.mxu0 %v932_v1  ;;  %v979_v4 = vld [vmem:[%s857_s3] sm:$0xff]  ;;  %v980_v5 = vld [vmem:[%s857_s3 + $0x8] sm:$0xff]  ;;  %v928_v9 = vld [vmem:[%s862_s23 + $0x18] sm:$0xff]  ;;  %s865_s24 = scalar_lea.vmem %s7113_s30, %s5796_s26  ;;  %s7116_s8 = sld [smem:[#allocation26_spill]] }
  0x35   : > { %v983_v6 = vsub.f32 1.0, %v979_v4  ;;  %v984_v7 = vsub.f32 1.0, %v980_v5  ;;  %v929_v8 = vld [vmem:[%s862_s23 + $0x20] sm:$0xff]  ;;  %v927_v10 = vld [vmem:[%s862_s23 + $0x10] sm:$0xff]  ;;  %v926_v13 = vld [vmem:[%s862_s23 + $0x8] sm:$0xff]  ;;  %s5263_s5 = smul.u32 18, %s5796_s26 }
  0x36   : > { %959 = vmatpush.msra.mxu0 %v931_v2  ;;  %v981_v11 = vld [vmem:[%s857_s3 + $0x10] sm:$0xff]  ;;  %s852_s28 = scalar_lea.vmem %s7114_s1, %s5254_s29  ;;  %v925_v14 = vld [vmem:[%s862_s23] sm:$0xff]  ;;  %v982_v16 = vld [vmem:[%s857_s3 + $0x18] sm:$0xff]  ;;  %s5835_s3 = smul.u32 3, %s5796_s26  ;;  %v5353_v56 = vpop.eup %5352 }
  0x37   : > { %989 = vperm.xlu0 %5308, %v983_v6   ;;  %994 = vperm.xlu1 %5309, %v984_v7   ;;  %v985_v12 = vsub.f32 1.0, %v981_v11  ;;  %v921_v15 = vld [vmem:[%s852_s28] sm:$0xff]  ;;  %v986_v17 = vsub.f32 1.0, %v982_v16  ;;  %v922_v18 = vld [vmem:[%s852_s28 + $0x8] sm:$0xff]  ;;  %v923_v19 = vld [vmem:[%s852_s28 + $0x10] sm:$0xff]  ;;  %v1063_v57 = vmul.f32 32.0, %v5353_v56  ;;  %vm1067_vm2 = vweird.f32 %v5353_v56  ;;  %s5887_s2 = scalar_lea.vmem %s7063_s10, %s5263_s5 }
  0x38   : > { %960 = vmatpush.msra.mxu0 %v930_v3  ;;  %v924_v20 = vld [vmem:[%s852_s28 + $0x18] sm:$0xff]  ;;  %v5312_v22 = vld [vmem:[%s865_s24] ss:$0 sm:$0xff]  ;;  %s5262_s22 = smul.u32 576, %s5796_s26  ;;  %s7117_s9 = sld [smem:[#allocation27_spill]] }
  0x39   : > { %999 = vperm.xlu2 %5310, %v985_v12   ;;  %v5311_v23 = vld [vmem:[%s868_s27] ss:$0 sm:$0xff]  ;;  %s5843_s23 = scalar_lea.vmem %s7115_s7, %s5835_s3  ;;  %v1064_v58 = vsub.f32 1.0, %v1063_v57  ;;  %s7118_s27 = sld [smem:[#allocation21_spill]] }
  0x3a   : > { %961 = vmatpush.msra.mxu0 %v929_v8  ;;  %s5849_s4 = scalar_lea.vmem %s7116_s8, %s5835_s3  ;;  %v5915_v55 = vld [vmem:[%s5843_s23] ss:$0 sm:$0xff]  ;;  %s5264_s0 = smul.u32 96, %s5796_s26 }
  0x3b   : > { %v1065_v59 = vmul.f32 %v5353_v56, %v1064_v58  ;;  %s6102_s21 = scalar_lea.vmem %s7065_s12, %s5835_s3  ;;  %s6128_s5 = scalar_lea.vmem %s7066_s13, %s5835_s3 }
  0x3c   : > { %962 = vmatpush.msra.mxu0 %v928_v9  ;;  %s6056_s30 = scalar_lea.vmem %s7064_s11, %s5264_s0  ;;  %s6156_s29 = scalar_lea.vmem %s7067_s14, %s5835_s3 }
  0x3d   : > { %v1066_v60 = vadd.f32 %v5353_v56, %v1065_v59  ;;  %s7119_s8 = sld [smem:[#allocation28_spill]]  ;;  %s5265_s6 = smul.u32 384, %s5796_s26 }
  0x3e   : > { %963 = vmatpush.msra.mxu0 %v927_v10  ;;  %s5893_s28 = scalar_lea.vmem %s7117_s9, %s5262_s22  ;;  %s6172_s22 = scalar_lea.vmem %s7069_s16, %s5835_s3 }
  0x3f   : > { %1017 = vperm.xlu0 %5308, %v979_v4   ;;  %1022 = vperm.xlu1 %5309, %v980_v5   ;;  %v5853_v61 = vsel %vm1067_vm2, %v5353_v56, %v1066_v60  ;;  %v4946_v58 = vld [vmem:[%s5893_s28 + $0x38] sm:$0xff]  ;;  %v4945_v59 = vld [vmem:[%s5893_s28 + $0x30] sm:$0xff]  ;;  %v5314_v60 = vld [vmem:[%s5849_s4] ss:$0 sm:$0xff]  ;;  %s6212_s24 = scalar_lea.vmem %s7071_s18, %s5835_s3 }
  0x40   : > { %964 = vmatpush.msra.mxu0 %v926_v13 }
  0x41   : > { %1027 = vperm.xlu2 %5310, %v981_v11  }
  0x42   : > { %965 = vmatpush.msra.mxu0 %v925_v14 }
  0x43   : > { %4905 = vmatmul.msk.f32.vlgmr.msra.gmra.mxu0 %vm937_vm0, %v921_v15  ;;  %s6179_s9 = scalar_lea.vmem %s7119_s8, %s5264_s0  ;;  %s6192_s0 = scalar_lea.vmem %s7070_s17, %s5265_s6 }
  0x47   : > { %1004 = vperm.xlu0 %5308, %v986_v17   ;;  %1032 = vperm.xlu1 %5309, %v982_v16  }
  0x4b   : > { %4906 = vmatmul.msk.f32.gmra.mxu0 %vm937_vm0, %v922_v18  ;;  %v1162_v18 = vld [vmem:[%s5893_s28 + $0x18] sm:$0xff] }
  0x4c   : > { %1191 = vmatpush.msrb.mxu0 %v1162_v18  ;;  %5257 = vmatpush.msra.mxu1 %v1162_v18 }
  0x53   : > { %4907 = vmatmul.msk.f32.gmra.mxu0 %vm937_vm0, %v923_v19  ;;  %v4916_v19 = vld [vmem:[%s5893_s28 + $0x58] sm:$0xff] }
  0x54   : > { %1230 = vmatpush.msra.mxu2 %v4916_v19 }
  0x5b   : > { %4908 = vmatmul.msk.f32.gmra.mxu0 %vm937_vm0, %v924_v20  ;;  %v4925_v20 = vld [vmem:[%s5893_s28 + $0x98] sm:$0xff] }
  0x5c   : > { %1269 = vmatpush.msra.mxu3 %v4925_v20 }
  0x93   : > { %v1000_v31 = vpop.permute.xlu2 %999 }
  0x9b   : > { %v1028_v40 = vpop.permute.xlu2 %1027 }
  0x9c   : > { %v1037_v43 = vmul.f32 %v5311_v23, %v1028_v40 }
  0xa9   : > { %v990_v21 = vpop.permute.xlu0 %989  ;;  %v995_v24 = vpop.permute.xlu1 %994 }
  0xb1   : > { %v1018_v27 = vpop.permute.xlu0 %1017  ;;  %v1023_v35 = vpop.permute.xlu1 %1022 }
  0xb2   : > { %v1035_v28 = vmul.f32 %v5311_v23, %v1018_v27  ;;  %v1036_v36 = vmul.f32 %v5311_v23, %v1023_v35  ;;  %v1159_v27 = vld [vmem:[%s5893_s28] sm:$0xff] }
  0xb9   : > { %v1033_v47 = vpop.permute.xlu1 %1032  ;;  %v1005_v50 = vpop.permute.xlu0 %1004 }
  0xba   : > { %v1038_v51 = vmul.f32 %v5311_v23, %v1033_v47  ;;  %v4924_v23 = vld [vmem:[%s5893_s28 + $0x90] sm:$0xff] }
  0xbb   : > { %1270 = vmatpush.msra.mxu3 %v4924_v23 }
  0xc0   : > { %v967_v25 = vpop.f32.mrf.mxu0 }
  0xc1   : > { %v968_v26 = vadd.f32 %v5312_v22, %v967_v25  ;;  %v4914_v25 = vld [vmem:[%s5893_s28 + $0x48] sm:$0xff] }
  0xc3   : > { %v1007_v29 = vmul.f32 %v990_v21, %v968_v26  ;;  %v1161_v21 = vld [vmem:[%s5893_s28 + $0x10] sm:$0xff]  ;;  %v4923_v26 = vld [vmem:[%s5893_s28 + $0x88] sm:$0xff] }
  0xc4   : > { %1192 = vmatpush.msrb.mxu0 %v1161_v21  ;;  %5258 = vmatpush.msra.mxu1 %v1161_v21 }
  0xc5   : > { %v5822_v30 = vadd.f32 %v1035_v28, %v1007_v29  ;;  %1271 = vmatpush.msra.mxu3 %v4923_v26  ;;  %v4913_v28 = vld [vmem:[%s5893_s28 + $0x40] sm:$0xff] }
  0xc6   : > { %v4922_v29 = vld [vmem:[%s5893_s28 + $0x80] sm:$0xff] }
  0xc7   : > { %v1050_v32 = vsel %vm1049_vm1, %v5822_v30, 0.0  ;;  %1272 = vmatpush.msra.mxu3 %v4922_v29 }
  0xc8   : > { %v970_v33 = vpop.f32.mrf.mxu0  ;;  %1051 = vadd.xlane.f32.xlu2 %v1050_v32 }
  0xc9   : > { %v971_v34 = vadd.f32 %v5312_v22, %v970_v33  ;;  %1509 = vmatpush.msrb.mxu3 %v4946_v58 }
  0xcb   : > { %v1008_v37 = vmul.f32 %v995_v24, %v971_v34  ;;  %v1160_v24 = vld [vmem:[%s5893_s28 + $0x8] sm:$0xff]  ;;  %v4955_v34 = vld [vmem:[%s5893_s28 + $0x78] sm:$0xff]  ;;  %1510 = vmatpush.msrb.mxu3 %v4945_v59  ;;  %v5317_v59 = vld [vmem:[%s5887_s2 + $0x3] ss:$0 sm:$0xff] }
  0xcc   : > { %1193 = vmatpush.msrb.mxu0 %v1160_v24  ;;  %5259 = vmatpush.msra.mxu1 %v1160_v24 }
  0xcd   : > { %v5826_v38 = vadd.f32 %v1036_v36, %v1008_v37  ;;  %v4954_v36 = vld [vmem:[%s5893_s28 + $0x70] sm:$0xff] }
  0xce   : > { %1194 = vmatpush.msrb.mxu0 %v1159_v27  ;;  %5260 = vmatpush.msra.mxu1 %v1159_v27 }
  0xcf   : > { %v1053_v39 = vsel %vm1049_vm1, %v5826_v38, 0.0 }
  0xd0   : > { %v973_v41 = vpop.f32.mrf.mxu0  ;;  %1054 = vadd.xlane.f32.xlu0 %v1053_v39  ;;  %1548 = vmatpush.msra.mxu0 %v4955_v34  ;;  %v4953_v39 = vld [vmem:[%s5893_s28 + $0x68] sm:$0xff] }
  0xd1   : > { %v974_v42 = vadd.f32 %v5312_v22, %v973_v41 }
  0xd2   : > { %1549 = vmatpush.msra.mxu0 %v4954_v36 }
  0xd3   : > { %v1009_v44 = vmul.f32 %v1000_v31, %v974_v42 }
  0xd4   : > { %1550 = vmatpush.msra.mxu0 %v4953_v39 }
  0xd5   : > { %v5830_v45 = vadd.f32 %v1037_v43, %v1009_v44  ;;  %v4952_v43 = vld [vmem:[%s5893_s28 + $0x60] sm:$0xff] }
  0xd6   : > { %1551 = vmatpush.msra.mxu0 %v4952_v43 }
  0xd7   : > { %v1056_v46 = vsel %vm1049_vm1, %v5830_v45, 0.0 }
  0xd8   : > { %v976_v48 = vpop.f32.mrf.mxu0  ;;  %1057 = vadd.xlane.f32.xlu1 %v1056_v46 }
  0xd9   : > { %v977_v49 = vadd.f32 %v5312_v22, %v976_v48  ;;  %v4915_v22 = vld [vmem:[%s5893_s28 + $0x50] sm:$0xff] }
  0xda   : > { %1231 = vmatpush.msra.mxu2 %v4915_v22 }
  0xdb   : > { %v1010_v52 = vmul.f32 %v1005_v50, %v977_v49 }
  0xdc   : > { %1232 = vmatpush.msra.mxu2 %v4914_v25 }
  0xdd   : > { %v5837_v53 = vadd.f32 %v1038_v51, %v1010_v52 }
  0xde   : > { %1233 = vmatpush.msra.mxu2 %v4913_v28 }
  0xdf   : > { %v1059_v54 = vsel %vm1049_vm1, %v5837_v53, 0.0 }
  0xe0   : > { %1060 = vadd.xlane.f32.xlu2 %v1059_v54 }
 0x13b   : > { %v1052_v62 = vpop.xlane.xlu2 %1051 }
 0x13c   : > { %v1069_v63 = vmul.f32 %v5853_v61, %v1052_v62 }
 0x13e   : > { %v5857_v0 = vsub.f32 %v5822_v30, %v1069_v63 }
 0x140   : > { %v1077_v1 = vmul.f32 %v5857_v0, %v5857_v0 }
 0x142   : > { %v1081_v2 = vsel %vm1049_vm1, %v1077_v1, 0.0 }
 0x143   : > { %v1055_v3 = vpop.xlane.xlu0 %1054  ;;  %1082 = vadd.xlane.f32.xlu2 %v1081_v2  ;;  %v4944_v2 = vld [vmem:[%s5893_s28 + $0x28] sm:$0xff] }
 0x144   : > { %v1070_v4 = vmul.f32 %v5853_v61, %v1055_v3  ;;  %1511 = vmatpush.msrb.mxu3 %v4944_v2  ;;  %v4964_v2 = vld [vmem:[%s5893_s28 + $0xb8] sm:$0xff] }
 0x146   : > { %v5864_v5 = vsub.f32 %v5826_v38, %v1070_v4 }
 0x148   : > { %v1078_v6 = vmul.f32 %v5864_v5, %v5864_v5 }
 0x14a   : > { %v1084_v7 = vsel %vm1049_vm1, %v1078_v6, 0.0 }
 0x14b   : > { %v1058_v8 = vpop.xlane.xlu1 %1057  ;;  %1085 = vadd.xlane.f32.xlu0 %v1084_v7 }
 0x14c   : > { %v1071_v9 = vmul.f32 %v5853_v61, %v1058_v8 }
 0x14e   : > { %v5871_v10 = vsub.f32 %v5830_v45, %v1071_v9 }
 0x150   : > { %v1079_v11 = vmul.f32 %v5871_v10, %v5871_v10 }
 0x152   : > { %v1087_v12 = vsel %vm1049_vm1, %v1079_v11, 0.0 }
 0x153   : > { %1088 = vadd.xlane.f32.xlu1 %v1087_v12  ;;  %v1061_v13 = vpop.xlane.xlu2 %1060  ;;  %v4943_v12 = vld [vmem:[%s5893_s28 + $0x20] sm:$0xff] }
 0x154   : > { %v1072_v14 = vmul.f32 %v5853_v61, %v1061_v13  ;;  %1512 = vmatpush.msrb.mxu3 %v4943_v12 }
 0x156   : > { %v5878_v15 = vsub.f32 %v5837_v53, %v1072_v14 }
 0x158   : > { %v1080_v16 = vmul.f32 %v5878_v15, %v5878_v15 }
 0x15a   : > { %v1090_v17 = vsel %vm1049_vm1, %v1080_v16, 0.0 }
 0x15b   : > { %1091 = vadd.xlane.f32.xlu2 %v1090_v17 }
 0x1b6   : > { %v1083_v31 = vpop.xlane.xlu2 %1082 }
 0x1b7   : > { %v1093_v32 = vmul.f32 %v1083_v31, %v5853_v61 }
 0x1b9   : > { %v1097_v33 = vadd.f32 1e-05, %v1093_v32 }
 0x1bb   : > { %5354 = vrsqrt.f32 %v1097_v33  ;;  %vm1107_vm4 = vweird.f32 %v1097_v33 }
 0x1be   : > { %v1086_v35 = vpop.xlane.xlu0 %1085 }
 0x1bf   : > { %v1094_v37 = vmul.f32 %v1086_v35, %v5853_v61 }
 0x1c1   : > { %v5355_v40 = vpop.eup %5354  ;;  %v1098_v41 = vadd.f32 1e-05, %v1094_v37 }
 0x1c2   : > { %v1102_v42 = vmul.f32 %v5355_v40, %v1097_v33  ;;  %vm1108_vm3 = vweird.f32 %v5355_v40 }
 0x1c3   : > { %5356 = vrsqrt.f32 %v1098_v41  ;;  %vm1109_vm5 = vmor %vm1107_vm4, %vm1108_vm3  ;;  %vm1117_vm7 = vweird.f32 %v1098_v41 }
 0x1c4   : > { %v1103_v44 = vmul.f32 %v5355_v40, %v1102_v42 }
 0x1c6   : > { %v1104_v46 = vmul.f32 0.5, %v1103_v44  ;;  %v1089_v47 = vpop.xlane.xlu1 %1088 }
 0x1c7   : > { %v1095_v48 = vmul.f32 %v1089_v47, %v5853_v61 }
 0x1c8   : > { %v1105_v49 = vsub.f32 1.5, %v1104_v46  ;;  %v5316_v46 = vld [vmem:[%s5887_s2 + $0x2] ss:$0 sm:$0xff] }
 0x1c9   : > { %v5357_v50 = vpop.eup %5356  ;;  %v1099_v51 = vadd.f32 1e-05, %v1095_v48  ;;  %v5318_v48 = vld [vmem:[%s5887_s2 + $0x4] ss:$0 sm:$0xff] }
 0x1ca   : > { %v1106_v52 = vmul.f32 %v5355_v40, %v1105_v49  ;;  %v1112_v54 = vmul.f32 %v5357_v50, %v1098_v41  ;;  %vm1118_vm6 = vweird.f32 %v5357_v50 }
 0x1cb   : > { %5358 = vrsqrt.f32 %v1099_v51  ;;  %vm1119_vm8 = vmor %vm1117_vm7, %vm1118_vm6  ;;  %vm1127_vm10 = vweird.f32 %v1099_v51 }
 0x1cc   : > { %v1110_v56 = vsel %vm1109_vm5, %v5355_v40, %v1106_v52  ;;  %v1113_v57 = vmul.f32 %v5357_v50, %v1112_v54 }
 0x1cd   : > { %v1141_v62 = vmul.f32 %v1110_v56, %v5857_v0 }
 0x1ce   : > { %v1114_v63 = vmul.f32 0.5, %v1113_v57  ;;  %v1092_v1 = vpop.xlane.xlu2 %1091 }
 0x1cf   : > { %v1148_v3 = vmul.f32 %v5915_v55, %v1141_v62  ;;  %v1096_v4 = vmul.f32 %v1092_v1, %v5853_v61  ;;  %v5315_v62 = vld [vmem:[%s5887_s2] ss:$0 sm:$0xff] }
 0x1d0   : > { %v1115_v6 = vsub.f32 1.5, %v1114_v63 }
 0x1d1   : > { %v5359_v7 = vpop.eup %5358  ;;  %v5924_v8 = vadd.f32 %v5314_v60, %v1148_v3  ;;  %v1100_v9 = vadd.f32 1e-05, %v1096_v4 }
 0x1d2   : > { %v1116_v11 = vmul.f32 %v5357_v50, %v1115_v6  ;;  %v1122_v0 = vmul.f32 %v5359_v7, %v1099_v51  ;;  %vm1128_vm9 = vweird.f32 %v5359_v7  ;;  %v4963_v6 = vld [vmem:[%s5893_s28 + $0xb0] sm:$0xff] }
 0x1d3   : > { %5360 = vrsqrt.f32 %v1100_v9  ;;  %4909 = vmatmul.msk.f32.vlgmr.msrb.gmra.mxu0 %vm1049_vm1, %v5924_v8  ;;  %4918 = vmatmul.msk.f32.vlgmr.msra.gmra.mxu2 %vm1049_vm1, %v5924_v8  ;;  %vm1129_vm11 = vmor %vm1127_vm10, %vm1128_vm9  ;;  %vm1137_vm13 = vweird.f32 %v1100_v9 }
 0x1d4   : > { %v1120_v13 = vsel %vm1119_vm8, %v5357_v50, %v1116_v11  ;;  %v1123_v14 = vmul.f32 %v5359_v7, %v1122_v0  ;;  %4927 = vmatmul.msk.f32.vlgmr.msra.gmra.mxu3 %vm1049_vm1, %v5924_v8  ;;  %v4961_v11 = vld [vmem:[%s5893_s28 + $0xa0] sm:$0xff] }
 0x1d5   : > { %v1142_v16 = vmul.f32 %v1120_v13, %v5864_v5 }
 0x1d6   : > { %v1124_v17 = vmul.f32 0.5, %v1123_v14 }
 0x1d7   : > { %v1149_v18 = vmul.f32 %v5915_v55, %v1142_v16 }
 0x1d8   : > { %v1125_v19 = vsub.f32 1.5, %v1124_v17 }
 0x1d9   : > { %v5361_v20 = vpop.eup %5360  ;;  %v5935_v21 = vadd.f32 %v5314_v60, %v1149_v18 }
 0x1da   : > { %v1126_v22 = vmul.f32 %v5359_v7, %v1125_v19  ;;  %v1132_v23 = vmul.f32 %v5361_v20, %v1100_v9  ;;  %vm1138_vm12 = vweird.f32 %v5361_v20  ;;  %v6010_v19 = vld [vmem:[%s7118_s27] sm:$0xff] }
 0x1db   : > { %4910 = vmatmul.msk.f32.gmra.mxu0 %vm1049_vm1, %v5935_v21  ;;  %4919 = vmatmul.msk.f32.gmra.mxu2 %vm1049_vm1, %v5935_v21  ;;  %vm1139_vm14 = vmor %vm1137_vm13, %vm1138_vm12 }
 0x1dc   : > { %v1130_v5 = vsel %vm1129_vm11, %v5359_v7, %v1126_v22  ;;  %v1133_v24 = vmul.f32 %v5361_v20, %v1132_v23  ;;  %4928 = vmatmul.msk.f32.gmra.mxu3 %vm1049_vm1, %v5935_v21  ;;  %v4962_v7 = vld [vmem:[%s5893_s28 + $0xa8] sm:$0xff] }
 0x1dd   : > { %v1143_v25 = vmul.f32 %v1130_v5, %v5871_v10 }
 0x1de   : > { %v1134_v26 = vmul.f32 0.5, %v1133_v24 }
 0x1df   : > { %v1150_v27 = vmul.f32 %v5915_v55, %v1143_v25 }
 0x1e0   : > { %v1135_v28 = vsub.f32 1.5, %v1134_v26 }
 0x1e1   : > { %v5945_v29 = vadd.f32 %v5314_v60, %v1150_v27  ;;  %v6024_v27 = vld [vmem:[%s7118_s27 + $0x10] sm:$0xff] }
 0x1e2   : > { %v1136_v31 = vmul.f32 %v5361_v20, %v1135_v28 }
 0x1e3   : > { %4911 = vmatmul.msk.f32.vlgmr.msra.gmra.mxu1 %vm1049_vm1, %v5945_v29  ;;  %4920 = vmatmul.msk.f32.gmra.mxu2 %vm1049_vm1, %v5945_v29 }
 0x1e4   : > { %v1140_v32 = vsel %vm1139_vm14, %v5361_v20, %v1136_v31  ;;  %4929 = vmatmul.msk.f32.gmra.mxu3 %vm1049_vm1, %v5945_v29  ;;  %4957 = vmatmul.msk.f32.vlgmr.msra.gmra.mxu0 %vm1049_vm1, %v5924_v8 }
 0x1e5   : > { %v1144_v10 = vmul.f32 %v1140_v32, %v5878_v15 }
 0x1e7   : > { %v1151_v33 = vmul.f32 %v5915_v55, %v1144_v10  ;;  %v6031_v10 = vld [vmem:[%s7118_s27 + $0x18] sm:$0xff] }
 0x1e9   : > { %v5957_v34 = vadd.f32 %v5314_v60, %v1151_v33 }
 0x1eb   : > { %4912 = vmatmul.msk.f32.gmra.mxu1 %vm1049_vm1, %v5957_v34  ;;  %4921 = vmatmul.msk.f32.gmra.mxu2 %vm1049_vm1, %v5957_v34 }
 0x1ec   : > { %4930 = vmatmul.msk.f32.gmra.mxu3 %vm1049_vm1, %v5957_v34  ;;  %4958 = vmatmul.msk.f32.gmra.mxu0 %vm1049_vm1, %v5935_v21 }
 0x1f4   : > { %4948 = vmatmul.msk.f32.vlgmr.msrb.gmra.mxu3 %vm1049_vm1, %v5924_v8  ;;  %4959 = vmatmul.msk.f32.gmra.mxu0 %vm1049_vm1, %v5945_v29 }
 0x1fc   : > { %4949 = vmatmul.msk.f32.gmra.mxu3 %vm1049_vm1, %v5935_v21  ;;  %4960 = vmatmul.msk.f32.gmra.mxu0 %vm1049_vm1, %v5957_v34 }
 0x204   : > { %4950 = vmatmul.msk.f32.gmra.mxu3 %vm1049_vm1, %v5945_v29 }
 0x20c   : > { %4951 = vmatmul.msk.f32.gmra.mxu3 %vm1049_vm1, %v5957_v34 }
 0x250   : > { %v1196_v15 = vpop.f32.mrf.mxu0 }
 0x251   : > { %v1197_v3 = vadd.f32 %v5315_v62, %v1196_v15 }
 0x256   : > { %v1235_v35 = vpop.f32.mrf.mxu2 }
 0x257   : > { %v1274_v36 = vpop.f32.mrf.mxu3  ;;  %v1236_v1 = vadd.f32 %v5316_v46, %v1235_v35 }
 0x258   : > { %v1199_v37 = vpop.f32.mrf.mxu0  ;;  %v1275_v57 = vadd.f32 %v5318_v48, %v1274_v36 }
 0x259   : > { %v1200_v0 = vadd.f32 %v5315_v62, %v1199_v37 }
 0x25e   : > { %v1238_v39 = vpop.f32.mrf.mxu2 }
 0x25f   : > { %v1277_v40 = vpop.f32.mrf.mxu3  ;;  %v1239_v58 = vadd.f32 %v5316_v46, %v1238_v39  ;;  %v5320_v39 = vld [vmem:[%s5887_s2 + $0x5] ss:$0 sm:$0xff] }
 0x260   : > { %v1278_v56 = vadd.f32 %v5318_v48, %v1277_v40  ;;  %v1202_v13 = vpop.f32.mrf.mxu1 }
 0x261   : > { %v1553_v41 = vpop.f32.mrf.mxu0  ;;  %v1203_v14 = vadd.f32 %v5315_v62, %v1202_v13 }
 0x262   : > { %v1554_v12 = vadd.f32 %v5317_v59, %v1553_v41 }
 0x266   : > { %v1241_v42 = vpop.f32.mrf.mxu2 }
 0x267   : > { %v1280_v43 = vpop.f32.mrf.mxu3  ;;  %v1242_v55 = vadd.f32 %v5316_v46, %v1241_v42 }
 0x268   : > { %v1281_v54 = vadd.f32 %v5318_v48, %v1280_v43  ;;  %v1205_v16 = vpop.f32.mrf.mxu1 }
 0x269   : > { %v1556_v44 = vpop.f32.mrf.mxu0  ;;  %v1206_v17 = vadd.f32 %v5315_v62, %v1205_v16 }
 0x26a   : > { %v1557_v9 = vadd.f32 %v5317_v59, %v1556_v44 }
 0x26e   : > { %v1244_v47 = vpop.f32.mrf.mxu2 }
 0x26f   : > { %v1245_v49 = vadd.f32 %v5316_v46, %v1244_v47  ;;  %v1283_v50 = vpop.f32.mrf.mxu3 }
 0x270   : > { %v1284_v51 = vadd.f32 %v5318_v48, %v1283_v50 }
 0x271   : > { %v1559_v52 = vpop.f32.mrf.mxu0  ;;  %4931 = vmatpush.xpose.msk.msrb.mxu1 %vm1286_vm15, %v1245_v49 }
 0x272   : > { %1468 = vmatpush.msrb.mxu2 %v1284_v51  ;;  %v1560_v4 = vadd.f32 %v5317_v59, %v1559_v52 }
 0x274   : > { %1469 = vmatpush.msrb.mxu2 %v1281_v54 }
 0x275   : > { %4932 = vmatpush.xpose.msk.msrb.mxu1 %vm1286_vm15, %v1242_v55 }
 0x276   : > { %1470 = vmatpush.msrb.mxu2 %v1278_v56 }
 0x278   : > { %1471 = vmatpush.msrb.mxu2 %v1275_v57 }
 0x279   : > { %v1562_v60 = vpop.f32.mrf.mxu0  ;;  %4933 = vmatpush.xpose.msk.msrb.mxu1 %vm1286_vm15, %v1239_v58 }
 0x27a   : > { %v1563_v63 = vadd.f32 %v5317_v59, %v1562_v60 }
 0x27c   : > { %4970 = vmatpush.xpose.msk.msra.mxu2 %vm1286_vm15, %v1563_v63 }
 0x27d   : > { %4934 = vmatpush.xpose.msk.msrb.mxu1 %vm1286_vm15, %v1236_v1 }
 0x280   : > { %4971 = vmatpush.xpose.msk.msra.mxu2 %vm1286_vm15, %v1560_v4  ;;  %4935 = vmatmul.msk.f32.vlgmr.msrb.gmra.mxu1 %vm1286_vm15, %v1197_v3 }
 0x281   : > { %1587 = vmatpush.msra.mxu1 %v4964_v2 }
 0x283   : > { %1588 = vmatpush.msra.mxu1 %v4963_v6 }
 0x284   : > { %4972 = vmatpush.xpose.msk.msra.mxu2 %vm1286_vm15, %v1557_v9 }
 0x285   : > { %1589 = vmatpush.msra.mxu1 %v4962_v7 }
 0x287   : > { %1590 = vmatpush.msra.mxu1 %v4961_v11 }
 0x288   : > { %4973 = vmatpush.xpose.msk.msra.mxu2 %vm1286_vm15, %v1554_v12  ;;  %4936 = vmatmul.msk.f32.gmra.mxu1 %vm1286_vm15, %v1200_v0 }
 0x290   : > { %4937 = vmatmul.msk.f32.gmra.mxu1 %vm1286_vm15, %v1203_v14 }
 0x298   : > { %4938 = vmatmul.msk.f32.gmra.mxu1 %vm1286_vm15, %v1206_v17 }
 0x2a0   : > { %4966 = vmatmul.msk.f32.vlgmr.msra.gmra.mxu1 %vm1049_vm1, %v5924_v8 }
 0x2a8   : > { %4967 = vmatmul.msk.f32.gmra.mxu1 %vm1049_vm1, %v5935_v21  ;;  %v6017_v21 = vld [vmem:[%s7118_s27 + $0x8] sm:$0xff] }
 0x2b0   : > { %4968 = vmatmul.msk.f32.gmra.mxu1 %vm1049_vm1, %v5945_v29 }
 0x2b8   : > { %4969 = vmatmul.msk.f32.gmra.mxu1 %vm1049_vm1, %v5957_v34 }
 0x2fd   : > { %v1328_v18 = vpop.f32.mrf.mxu1 }
 0x2fe   : > { %v1340_v20 = vmul.f32 0.25, %v1328_v18 }
 0x300   : > { %v1344_v22 = vadd.f32 %v1340_v20, %v6010_v19 }
 0x302   : > { %v1348_v8 = vsel %vm1049_vm1, %v1344_v22, -inf }
 0x303   : > { %1349 = vmax.xlane.f32.xlu0 %v1348_v8 }
 0x305   : > { %v1331_v23 = vpop.f32.mrf.mxu1 }
 0x306   : > { %v1341_v5 = vmul.f32 0.25, %v1331_v23 }
 0x308   : > { %v1345_v24 = vadd.f32 %v1341_v5, %v6017_v21 }
 0x30a   : > { %v1351_v25 = vsel %vm1049_vm1, %v1345_v24, -inf }
 0x30b   : > { %1352 = vmax.xlane.f32.xlu1 %v1351_v25 }
 0x30d   : > { %v1334_v26 = vpop.f32.mrf.mxu1 }
 0x30e   : > { %v1342_v28 = vmul.f32 0.25, %v1334_v26 }
 0x310   : > { %v1346_v29 = vadd.f32 %v1342_v28, %v6024_v27 }
 0x312   : > { %v1354_v31 = vsel %vm1049_vm1, %v1346_v29, -inf }
 0x313   : > { %1355 = vmax.xlane.f32.xlu2 %v1354_v31 }
 0x315   : > { %v1337_v32 = vpop.f32.mrf.mxu1 }
 0x316   : > { %v1343_v33 = vmul.f32 0.25, %v1337_v32 }
 0x318   : > { %v1347_v34 = vadd.f32 %v1343_v33, %v6031_v10 }
 0x31a   : > { %v1357_v15 = vsel %vm1049_vm1, %v1347_v34, -inf }
 0x31b   : > { %1358 = vmax.xlane.f32.xlu0 %v1357_v15 }
 0x31d   : > { %v1592_v35 = vpop.f32.mrf.mxu1 }
 0x31e   : > { %v1593_v44 = vadd.f32 %v5320_v39, %v1592_v35 }
 0x325   : > { %v1595_v36 = vpop.f32.mrf.mxu1 }
 0x326   : > { %v1596_v43 = vadd.f32 %v5320_v39, %v1595_v36 }
 0x32d   : > { %v1598_v37 = vpop.f32.mrf.mxu1 }
 0x32e   : > { %v1599_v42 = vadd.f32 %v5320_v39, %v1598_v37 }
 0x335   : > { %v1601_v40 = vpop.f32.mrf.mxu1 }
 0x336   : > { %v1602_v41 = vadd.f32 %v5320_v39, %v1601_v40 }
 0x338   : > { %1785 = vmatpush.msra.mxu3 %v1602_v41 }
 0x33a   : > { %1786 = vmatpush.msra.mxu3 %v1599_v42 }
 0x33c   : > { %1787 = vmatpush.msra.mxu3 %v1596_v43 }
 0x33e   : > { %1788 = vmatpush.msra.mxu3 %v1593_v44 }
 0x376   : > { %v1350_v46 = vpop.xlane.xlu0 %1349 }
 0x377   : > { %v1360_v47 = vsub.f32 %v1344_v22, %v1350_v46 }
 0x379   : > { %v1364_v48 = vmul.f32 1.442695, %v1360_v47 }
 0x37b   : > { %5362 = vpow2.f32 %v1364_v48 }
 0x37e   : > { %v1353_v49 = vpop.xlane.xlu1 %1352 }
 0x37f   : > { %v1361_v50 = vsub.f32 %v1345_v24, %v1353_v49 }
 0x381   : > { %v5363_v51 = vpop.eup %5362  ;;  %v1366_v52 = vmul.f32 1.442695, %v1361_v50 }
 0x382   : > { %v1372_v54 = vsel %vm1049_vm1, %v5363_v51, 0.0 }
 0x383   : > { %5364 = vpow2.f32 %v1366_v52  ;;  %1373 = vadd.xlane.f32.xlu1 %v1372_v54 }
 0x386   : > { %v1356_v55 = vpop.xlane.xlu2 %1355 }
 0x387   : > { %v1362_v56 = vsub.f32 %v1346_v29, %v1356_v55 }
 0x389   : > { %v5365_v57 = vpop.eup %5364  ;;  %v1368_v58 = vmul.f32 1.442695, %v1362_v56 }
 0x38a   : > { %v1375_v59 = vsel %vm1049_vm1, %v5365_v57, 0.0 }
 0x38b   : > { %5366 = vpow2.f32 %v1368_v58  ;;  %1376 = vadd.xlane.f32.xlu2 %v1375_v59  ;;  %v1514_v58 = vpop.f32.mrf.mxu3 }
 0x38e   : > { %v1359_v60 = vpop.xlane.xlu0 %1358 }
 0x38f   : > { %v1363_v62 = vsub.f32 %v1347_v34, %v1359_v60 }
 0x391   : > { %v6038_v63 = vpop.eup %5366  ;;  %v1370_v1 = vmul.f32 1.442695, %v1363_v62  ;;  %v1486_v62 = vld [vmem:[%s6056_s30 + $0x8] sm:$0xff] }
 0x392   : > { %v1378_v2 = vsel %vm1049_vm1, %v6038_v63, 0.0  ;;  %1872 = vmatpush.msrb.mxu1 %v1486_v62 }
 0x393   : > { %5368 = vpow2.f32 %v1370_v1  ;;  %1379 = vadd.xlane.f32.xlu0 %v1378_v2  ;;  %v1517_v2 = vpop.f32.mrf.mxu3 }
 0x399   : > { %v6042_v3 = vpop.eup %5368 }
 0x39a   : > { %v1381_v4 = vsel %vm1049_vm1, %v6042_v3, 0.0 }
 0x39b   : > { %1382 = vadd.xlane.f32.xlu1 %v1381_v4 }
 0x3f6   : > { %v1374_v6 = vpop.xlane.xlu1 %1373 }
 0x3f7   : > { %5370 = vrcp.f32 %v1374_v6  ;;  %v1395_v12 = vand.u32 2147483648, %v1374_v6  ;;  %v1393_v14 = vand.u32 2147483647, %v1374_v6  ;;  %vm1389_vm2 = vweird.f32 %v1374_v6 }
 0x3f9   : > { %v1396_v18 = vor.u32 1.1754944e-38, %v1395_v12  ;;  %vm1394_vm4 = vcmp.eq.f32.partialorder %v1393_v14, 8.507059e+37 }
 0x3fd   : > { %v5371_v7 = vpop.eup %5370 }
 0x3fe   : > { %v1385_v9 = vmul.f32 %v5371_v7, %v1374_v6  ;;  %v1377_v11 = vpop.xlane.xlu2 %1376  ;;  %vm1390_vm0 = vweird.f32 %v5371_v7  ;;  %v1520_v6 = vpop.f32.mrf.mxu3 }
 0x3ff   : > { %5372 = vrcp.f32 %v1377_v11  ;;  %vm1391_vm3 = vmor %vm1389_vm2, %vm1390_vm0  ;;  %v1410_v25 = vand.u32 2147483648, %v1377_v11  ;;  %v1408_v28 = vand.u32 2147483647, %v1377_v11  ;;  %vm1404_vm6 = vweird.f32 %v1377_v11 }
 0x400   : > { %v1386_v0 = vsub.f32 1.0, %v1385_v9 }
 0x401   : > { %v1411_v32 = vor.u32 1.1754944e-38, %v1410_v25  ;;  %vm1409_vm8 = vcmp.eq.f32.partialorder %v1408_v28, 8.507059e+37 }
 0x402   : > { %v1387_v13 = vmul.f32 %v5371_v7, %v1386_v0 }
 0x404   : > { %v1388_v16 = vadd.f32 %v5371_v7, %v1387_v13 }
 0x405   : > { %v5373_v17 = vpop.eup %5372 }
 0x406   : > { %v1400_v20 = vmul.f32 %v5373_v17, %v1377_v11  ;;  %v1380_v22 = vpop.xlane.xlu0 %1379  ;;  %v1392_v8 = vsel %vm1391_vm3, %v5371_v7, %v1388_v16  ;;  %vm1405_vm5 = vweird.f32 %v5373_v17  ;;  %v1523_v9 = vpop.f32.mrf.mxu3 }
 0x407   : > { %5374 = vrcp.f32 %v1380_v22  ;;  %v1397_v23 = vsel %vm1394_vm4, %v1396_v18, %v1392_v8  ;;  %vm1406_vm7 = vmor %vm1404_vm6, %vm1405_vm5  ;;  %v1425_v39 = vand.u32 2147483648, %v1380_v22  ;;  %v1423_v41 = vand.u32 2147483647, %v1380_v22 }
 0x408   : > { %v1401_v5 = vsub.f32 1.0, %v1400_v20  ;;  %v1398_v24 = vmul.f32 %v5363_v51, %v1397_v23  ;;  %vm1419_vm10 = vweird.f32 %v1380_v22 }
 0x409   : > { %v1426_v44 = vor.u32 1.1754944e-38, %v1425_v39  ;;  %vm1424_vm12 = vcmp.eq.f32.partialorder %v1423_v41, 8.507059e+37 }
 0x40a   : > { %v1402_v26 = vmul.f32 %v5373_v17, %v1401_v5  ;;  %4939 = vmatmul.msk.f32.vlgmr.msrb.gmra.mxu2 %vm1049_vm1, %v1398_v24 }
 0x40c   : > { %v1403_v29 = vadd.f32 %v5373_v17, %v1402_v26 }
 0x40d   : > { %v5375_v31 = vpop.eup %5374 }
 0x40e   : > { %v1415_v33 = vmul.f32 %v5375_v31, %v1380_v22  ;;  %v1383_v34 = vpop.xlane.xlu1 %1382  ;;  %v1407_v15 = vsel %vm1406_vm7, %v5373_v17, %v1403_v29  ;;  %vm1420_vm9 = vweird.f32 %v5375_v31 }
 0x40f   : > { %5376 = vrcp.f32 %v1383_v34  ;;  %v1412_v35 = vsel %vm1409_vm8, %v1411_v32, %v1407_v15  ;;  %vm1421_vm11 = vmor %vm1419_vm10, %vm1420_vm9  ;;  %v1440_v51 = vand.u32 2147483648, %v1383_v34  ;;  %v1438_v54 = vand.u32 2147483647, %v1383_v34 }
 0x410   : > { %v1416_v36 = vsub.f32 1.0, %v1415_v33  ;;  %v1413_v37 = vmul.f32 %v5365_v57, %v1412_v35  ;;  %vm1434_vm14 = vweird.f32 %v1383_v34 }
 0x411   : > { %v1441_v56 = vor.u32 1.1754944e-38, %v1440_v51  ;;  %vm1439_vm2 = vcmp.eq.f32.partialorder %v1438_v54, 8.507059e+37 }
 0x412   : > { %v1417_v40 = vmul.f32 %v5375_v31, %v1416_v36  ;;  %4940 = vmatmul.msk.f32.gmra.mxu2 %vm1049_vm1, %v1413_v37 }
 0x414   : > { %v1418_v42 = vadd.f32 %v5375_v31, %v1417_v40 }
 0x415   : > { %v5377_v43 = vpop.eup %5376 }
 0x416   : > { %v1430_v46 = vmul.f32 %v5377_v43, %v1383_v34  ;;  %v1422_v47 = vsel %vm1421_vm11, %v5375_v31, %v1418_v42  ;;  %vm1435_vm13 = vweird.f32 %v5377_v43 }
 0x417   : > { %v1427_v48 = vsel %vm1424_vm12, %v1426_v44, %v1422_v47  ;;  %vm1436_vm0 = vmor %vm1434_vm14, %vm1435_vm13 }
 0x418   : > { %v1431_v49 = vsub.f32 1.0, %v1430_v46  ;;  %v1428_v50 = vmul.f32 %v6038_v63, %v1427_v48  ;;  %v5319_v63 = vld [vmem:[%s5887_s2 + $0x1] ss:$0 sm:$0xff] }
 0x419   : > { %v1515_v1 = vadd.f32 %v5319_v63, %v1514_v58  ;;  %v1518_v4 = vadd.f32 %v5319_v63, %v1517_v2  ;;  %v1521_v7 = vadd.f32 %v5319_v63, %v1520_v6  ;;  %v1524_v11 = vadd.f32 %v5319_v63, %v1523_v9 }
 0x41a   : > { %v1432_v52 = vmul.f32 %v5377_v43, %v1431_v49  ;;  %4941 = vmatmul.msk.f32.gmra.mxu2 %vm1049_vm1, %v1428_v50 }
 0x41c   : > { %v1433_v55 = vadd.f32 %v5377_v43, %v1432_v52 }
 0x41e   : > { %v1437_v57 = vsel %vm1436_vm0, %v5377_v43, %v1433_v55 }
 0x41f   : > { %v1442_v59 = vsel %vm1439_vm2, %v1441_v56, %v1437_v57 }
 0x420   : > { %v1443_v60 = vmul.f32 %v6042_v3, %v1442_v59  ;;  %v1485_v3 = vld [vmem:[%s6056_s30] sm:$0xff] }
 0x421   : > { %1873 = vmatpush.msrb.mxu1 %v1485_v3 }
 0x422   : > { %4942 = vmatmul.msk.f32.gmra.mxu2 %vm1049_vm1, %v1443_v60  ;;  %v4983_v60 = vld [vmem:[%s6056_s30 + $0x18] sm:$0xff] }
 0x423   : > { %1831 = vmatpush.msrb.mxu0 %v4983_v60 }
 0x42a   : > { %4974 = vmatmul.msk.f32.vlgmr.msra.gmra.mxu2 %vm1286_vm15, %v1515_v1 }
 0x432   : > { %4975 = vmatmul.msk.f32.gmra.mxu2 %vm1286_vm15, %v1518_v4 }
 0x43a   : > { %4976 = vmatmul.msk.f32.gmra.mxu2 %vm1286_vm15, %v1521_v7 }
 0x442   : > { %4977 = vmatmul.msk.f32.gmra.mxu2 %vm1286_vm15, %v1524_v11 }
 0x48d   : > { %v1473_v0 = vpop.f32.mrf.mxu2 }
 0x48e   : > { %4988 = vmatmul.msk.f32.vlgmr.msrb.gmra.mxu1 %vm1286_vm15, %v1473_v0 }
 0x495   : > { %v1476_v12 = vpop.f32.mrf.mxu2 }
 0x496   : > { %4989 = vmatmul.msk.f32.gmra.mxu1 %vm1286_vm15, %v1476_v12 }
 0x49d   : > { %v1479_v13 = vpop.f32.mrf.mxu2 }
 0x49e   : > { %4990 = vmatmul.msk.f32.gmra.mxu1 %vm1286_vm15, %v1479_v13 }
 0x4a5   : > { %v1482_v14 = vpop.f32.mrf.mxu2 }
 0x4a6   : > { %4991 = vmatmul.msk.f32.gmra.mxu1 %vm1286_vm15, %v1482_v14 }
 0x4ad   : > { %v1645_v16 = vpop.f32.mrf.mxu2 }
 0x4ae   : > { %v1657_v17 = vmul.f32 0.25, %v1645_v16 }
 0x4b0   : > { %v1661_v18 = vadd.f32 %v1657_v17, %v6010_v19 }
 0x4b2   : > { %v1665_v20 = vsel %vm1049_vm1, %v1661_v18, -inf }
 0x4b3   : > { %1666 = vmax.xlane.f32.xlu2 %v1665_v20 }
 0x4b5   : > { %v1648_v22 = vpop.f32.mrf.mxu2 }
 0x4b6   : > { %v1658_v8 = vmul.f32 0.25, %v1648_v22 }
 0x4b8   : > { %v1662_v23 = vadd.f32 %v1658_v8, %v6017_v21 }
 0x4ba   : > { %v1668_v5 = vsel %vm1049_vm1, %v1662_v23, -inf }
 0x4bb   : > { %1669 = vmax.xlane.f32.xlu0 %v1668_v5 }
 0x4bd   : > { %v1651_v24 = vpop.f32.mrf.mxu2 }
 0x4be   : > { %v1659_v25 = vmul.f32 0.25, %v1651_v24 }
 0x4c0   : > { %v1663_v26 = vadd.f32 %v1659_v25, %v6024_v27 }
 0x4c2   : > { %v1671_v28 = vsel %vm1049_vm1, %v1663_v26, -inf }
 0x4c3   : > { %1672 = vmax.xlane.f32.xlu1 %v1671_v28 }
 0x4c5   : > { %v1654_v29 = vpop.f32.mrf.mxu2 }
 0x4c6   : > { %v1660_v31 = vmul.f32 0.25, %v1654_v29 }
 0x4c8   : > { %v1664_v19 = vadd.f32 %v1660_v31, %v6031_v10 }
 0x4ca   : > { %v1674_v32 = vsel %vm1049_vm1, %v1664_v19, -inf }
 0x4cb   : > { %1675 = vmax.xlane.f32.xlu2 %v1674_v32 }
 0x526   : > { %v1667_v33 = vpop.xlane.xlu2 %1666 }
 0x527   : > { %v1677_v34 = vsub.f32 %v1661_v18, %v1667_v33 }
 0x529   : > { %v1681_v21 = vmul.f32 1.442695, %v1677_v34 }
 0x52b   : > { %5378 = vpow2.f32 %v1681_v21 }
 0x52e   : > { %v1670_v15 = vpop.xlane.xlu0 %1669 }
 0x52f   : > { %v1678_v35 = vsub.f32 %v1662_v23, %v1670_v15 }
 0x531   : > { %v5379_v36 = vpop.eup %5378  ;;  %v1683_v37 = vmul.f32 1.442695, %v1678_v35 }
 0x532   : > { %v1689_v27 = vsel %vm1049_vm1, %v5379_v36, 0.0 }
 0x533   : > { %5380 = vpow2.f32 %v1683_v37  ;;  %1690 = vadd.xlane.f32.xlu0 %v1689_v27 }
 0x536   : > { %v1673_v39 = vpop.xlane.xlu1 %1672 }
 0x537   : > { %v1679_v40 = vsub.f32 %v1663_v26, %v1673_v39 }
 0x539   : > { %v5381_v41 = vpop.eup %5380  ;;  %v1685_v42 = vmul.f32 1.442695, %v1679_v40 }
 0x53a   : > { %v1692_v10 = vsel %vm1049_vm1, %v5381_v41, 0.0 }
 0x53b   : > { %5382 = vpow2.f32 %v1685_v42  ;;  %1693 = vadd.xlane.f32.xlu1 %v1692_v10 }
 0x53e   : > { %v1676_v43 = vpop.xlane.xlu2 %1675 }
 0x53f   : > { %v1680_v44 = vsub.f32 %v1664_v19, %v1676_v43 }
 0x541   : > { %v6081_v46 = vpop.eup %5382  ;;  %v1687_v47 = vmul.f32 1.442695, %v1680_v44 }
 0x542   : > { %v1695_v48 = vsel %vm1049_vm1, %v6081_v46, 0.0 }
 0x543   : > { %5384 = vpow2.f32 %v1687_v47  ;;  %1696 = vadd.xlane.f32.xlu2 %v1695_v48 }
 0x549   : > { %v6085_v49 = vpop.eup %5384 }
 0x54a   : > { %v1698_v50 = vsel %vm1049_vm1, %v6085_v49, 0.0 }
 0x54b   : > { %1699 = vadd.xlane.f32.xlu0 %v1698_v50 }
 0x5a6   : > { %v1691_v51 = vpop.xlane.xlu0 %1690 }
 0x5a7   : > { %5386 = vrcp.f32 %v1691_v51  ;;  %v1712_v57 = vand.u32 2147483648, %v1691_v51  ;;  %v1710_v59 = vand.u32 2147483647, %v1691_v51  ;;  %vm1706_vm4 = vweird.f32 %v1691_v51 }
 0x5a9   : > { %v1713_v1 = vor.u32 1.1754944e-38, %v1712_v57  ;;  %vm1711_vm6 = vcmp.eq.f32.partialorder %v1710_v59, 8.507059e+37 }
 0x5ad   : > { %v5387_v52 = vpop.eup %5386 }
 0x5ae   : > { %v1702_v54 = vmul.f32 %v5387_v52, %v1691_v51  ;;  %v1694_v55 = vpop.xlane.xlu1 %1693  ;;  %vm1707_vm3 = vweird.f32 %v5387_v52 }
 0x5af   : > { %5388 = vrcp.f32 %v1694_v55  ;;  %vm1708_vm5 = vmor %vm1706_vm4, %vm1707_vm3  ;;  %v1727_v3 = vand.u32 2147483648, %v1694_v55  ;;  %v1725_v12 = vand.u32 2147483647, %v1694_v55  ;;  %vm1721_vm8 = vweird.f32 %v1694_v55 }
 0x5b0   : > { %v1703_v56 = vsub.f32 1.0, %v1702_v54 }
 0x5b1   : > { %v1728_v16 = vor.u32 1.1754944e-38, %v1727_v3  ;;  %vm1726_vm10 = vcmp.eq.f32.partialorder %v1725_v12, 8.507059e+37 }
 0x5b2   : > { %v1704_v58 = vmul.f32 %v5387_v52, %v1703_v56 }
 0x5b4   : > { %v1705_v62 = vadd.f32 %v5387_v52, %v1704_v58 }
 0x5b5   : > { %v5389_v63 = vpop.eup %5388 }
 0x5b6   : > { %v1709_v2 = vsel %vm1708_vm5, %v5387_v52, %v1705_v62  ;;  %v1717_v4 = vmul.f32 %v5389_v63, %v1694_v55  ;;  %v1697_v6 = vpop.xlane.xlu2 %1696  ;;  %vm1722_vm7 = vweird.f32 %v5389_v63 }
 0x5b7   : > { %v1714_v7 = vsel %vm1711_vm6, %v1713_v1, %v1709_v2  ;;  %5390 = vrcp.f32 %v1697_v6  ;;  %vm1723_vm9 = vmor %vm1721_vm8, %vm1722_vm7  ;;  %v1742_v5 = vand.u32 2147483648, %v1697_v6  ;;  %v1740_v25 = vand.u32 2147483647, %v1697_v6 }
 0x5b8   : > { %v1718_v9 = vsub.f32 1.0, %v1717_v4  ;;  %v1715_v11 = vmul.f32 %v5379_v36, %v1714_v7  ;;  %vm1736_vm12 = vweird.f32 %v1697_v6 }
 0x5b9   : > { %v1743_v29 = vor.u32 1.1754944e-38, %v1742_v5  ;;  %vm1741_vm14 = vcmp.eq.f32.partialorder %v1740_v25, 8.507059e+37 }
 0x5ba   : > { %v1719_v0 = vmul.f32 %v5389_v63, %v1718_v9  ;;  %4978 = vmatmul.msk.f32.vlgmr.msra.gmra.mxu3 %vm1049_vm1, %v1715_v11 }
 0x5bc   : > { %v1720_v13 = vadd.f32 %v5389_v63, %v1719_v0 }
 0x5bd   : > { %v5391_v14 = vpop.eup %5390 }
 0x5be   : > { %v1732_v17 = vmul.f32 %v5391_v14, %v1697_v6  ;;  %v1700_v18 = vpop.xlane.xlu0 %1699  ;;  %v1724_v20 = vsel %vm1723_vm9, %v5389_v63, %v1720_v13  ;;  %vm1737_vm11 = vweird.f32 %v5391_v14 }
 0x5bf   : > { %5392 = vrcp.f32 %v1700_v18  ;;  %v1729_v22 = vsel %vm1726_vm10, %v1728_v16, %v1724_v20  ;;  %vm1738_vm13 = vmor %vm1736_vm12, %vm1737_vm11  ;;  %v1757_v21 = vand.u32 2147483648, %v1700_v18  ;;  %v1755_v35 = vand.u32 2147483647, %v1700_v18 }
 0x5c0   : > { %v1733_v8 = vsub.f32 1.0, %v1732_v17  ;;  %v1730_v23 = vmul.f32 %v5381_v41, %v1729_v22  ;;  %vm1751_vm2 = vweird.f32 %v1700_v18  ;;  %v4982_v41 = vld [vmem:[%s6056_s30 + $0x10] sm:$0xff] }
 0x5c1   : > { %v1758_v37 = vor.u32 1.1754944e-38, %v1757_v21  ;;  %vm1756_vm4 = vcmp.eq.f32.partialorder %v1755_v35, 8.507059e+37  ;;  %1832 = vmatpush.msrb.mxu0 %v4982_v41 }
 0x5c2   : > { %v1734_v24 = vmul.f32 %v5391_v14, %v1733_v8  ;;  %4979 = vmatmul.msk.f32.gmra.mxu3 %vm1049_vm1, %v1730_v23 }
 0x5c4   : > { %v1735_v26 = vadd.f32 %v5391_v14, %v1734_v24 }
 0x5c5   : > { %v5393_v28 = vpop.eup %5392 }
 0x5c6   : > { %v1747_v31 = vmul.f32 %v5393_v28, %v1700_v18  ;;  %v1739_v19 = vsel %vm1738_vm13, %v5391_v14, %v1735_v26  ;;  %vm1752_vm0 = vweird.f32 %v5393_v28 }
 0x5c7   : > { %v1744_v32 = vsel %vm1741_vm14, %v1743_v29, %v1739_v19  ;;  %vm1753_vm3 = vmor %vm1751_vm2, %vm1752_vm0  ;;  %v2005_v19 = vld [vmem:[%s6179_s9 + $0x10] sm:$0xff] }
 0x5c8   : > { %v1748_v33 = vsub.f32 1.0, %v1747_v31  ;;  %v1745_v34 = vmul.f32 %v6081_v46, %v1744_v32  ;;  %v1875_v46 = vpop.f32.mrf.mxu1  ;;  %v2006_v31 = vld [vmem:[%s6179_s9 + $0x18] sm:$0xff]  ;;  %v2004_v32 = vld [vmem:[%s6179_s9 + $0x8] sm:$0xff] }
 0x5c9   : > { %2035 = vmatpush.msrb.mxu2 %v2006_v31 }
 0x5ca   : > { %v1749_v15 = vmul.f32 %v5393_v28, %v1748_v33  ;;  %4980 = vmatmul.msk.f32.gmra.mxu3 %vm1049_vm1, %v1745_v34  ;;  %v2003_v33 = vld [vmem:[%s6179_s9] sm:$0xff] }
 0x5cb   : > { %2036 = vmatpush.msrb.mxu2 %v2005_v19 }
 0x5cc   : > { %v1750_v36 = vadd.f32 %v5393_v28, %v1749_v15 }
 0x5cd   : > { %2037 = vmatpush.msrb.mxu2 %v2004_v32 }
 0x5ce   : > { %v1754_v27 = vsel %vm1753_vm3, %v5393_v28, %v1750_v36 }
 0x5cf   : > { %v1759_v39 = vsel %vm1756_vm4, %v1758_v37, %v1754_v27  ;;  %2038 = vmatpush.msrb.mxu2 %v2003_v33  ;;  %v2100_v33 = vld [vmem:[%s6192_s0 + $0x60] sm:$0xff] }
 0x5d0   : > { %v1760_v40 = vmul.f32 %v6085_v49, %v1759_v39  ;;  %v5321_v49 = vld [vmem:[%s6102_s21] ss:$0 sm:$0xff]  ;;  %v1878_v51 = vpop.f32.mrf.mxu1 }
 0x5d2   : > { %4981 = vmatmul.msk.f32.gmra.mxu3 %vm1049_vm1, %v1760_v40 }
 0x5d8   : > { %v1881_v59 = vpop.f32.mrf.mxu1 }
 0x5e0   : > { %v1884_v4 = vpop.f32.mrf.mxu1 }
 0x63d   : > { %v1790_v42 = vpop.f32.mrf.mxu3 }
 0x63e   : > { %4984 = vmatmul.msk.f32.vlgmr.msrb.gmra.mxu0 %vm1286_vm15, %v1790_v42 }
 0x645   : > { %v1793_v10 = vpop.f32.mrf.mxu3 }
 0x646   : > { %4985 = vmatmul.msk.f32.gmra.mxu0 %vm1286_vm15, %v1793_v10 }
 0x64d   : > { %v1796_v43 = vpop.f32.mrf.mxu3 }
 0x64e   : > { %4986 = vmatmul.msk.f32.gmra.mxu0 %vm1286_vm15, %v1796_v43 }
 0x655   : > { %v1799_v44 = vpop.f32.mrf.mxu3 }
 0x656   : > { %4987 = vmatmul.msk.f32.gmra.mxu0 %vm1286_vm15, %v1799_v44 }
 0x6bb   : > { %v1834_v47 = vpop.f32.mrf.mxu0 }
 0x6bc   : > { %v1876_v48 = vadd.f32 %v1875_v46, %v1834_v47  ;;  %v5322_v47 = vld [vmem:[%s6128_s5] ss:$0 sm:$0xff] }
 0x6be   : > { %v1887_v50 = vadd.f32 %v1876_v48, %v5822_v30 }
 0x6c0   : > { %v6109_v52 = vadd.f32 %v5321_v49, %v1887_v50  ;;  %v2103_v50 = vld [vmem:[%s6192_s0 + $0x78] sm:$0xff] }
 0x6c1   : > { %2104 = vmatpush.msrb.mxu3 %v2103_v50 }
 0x6c2   : > { %v1901_v54 = vsel %vm1049_vm1, %v6109_v52, 0.0 }
 0x6c3   : > { %1902 = vadd.xlane.f32.xlu1 %v1901_v54  ;;  %v1837_v55 = vpop.f32.mrf.mxu0 }
 0x6c4   : > { %v1879_v56 = vadd.f32 %v1878_v51, %v1837_v55  ;;  %v2102_v51 = vld [vmem:[%s6192_s0 + $0x70] sm:$0xff] }
 0x6c5   : > { %2105 = vmatpush.msrb.mxu3 %v2102_v51 }
 0x6c6   : > { %v1888_v57 = vadd.f32 %v1879_v56, %v5826_v38 }
 0x6c8   : > { %v6114_v58 = vadd.f32 %v5321_v49, %v1888_v57  ;;  %v5323_v57 = vld [vmem:[%s6156_s29] ss:$0 sm:$0xff] }
 0x6ca   : > { %v1904_v60 = vsel %vm1049_vm1, %v6114_v58, 0.0 }
 0x6cb   : > { %1905 = vadd.xlane.f32.xlu2 %v1904_v60  ;;  %v1840_v30 = vpop.f32.mrf.mxu0 }
 0x6cc   : > { %v1882_v62 = vadd.f32 %v1881_v59, %v1840_v30  ;;  %v2101_v59 = vld [vmem:[%s6192_s0 + $0x68] sm:$0xff] }
 0x6cd   : > { %2106 = vmatpush.msrb.mxu3 %v2101_v59 }
 0x6ce   : > { %v1889_v63 = vadd.f32 %v1882_v62, %v5830_v45 }
 0x6cf   : > { %2107 = vmatpush.msrb.mxu3 %v2100_v33 }
 0x6d0   : > { %v6119_v1 = vadd.f32 %v5321_v49, %v1889_v63 }
 0x6d2   : > { %v1907_v2 = vsel %vm1049_vm1, %v6119_v1, 0.0 }
 0x6d3   : > { %1908 = vadd.xlane.f32.xlu0 %v1907_v2  ;;  %v1843_v6 = vpop.f32.mrf.mxu0 }
 0x6d4   : > { %v1885_v38 = vadd.f32 %v1884_v4, %v1843_v6 }
 0x6d6   : > { %v1890_v7 = vadd.f32 %v1885_v38, %v5837_v53 }
 0x6d8   : > { %v6130_v9 = vadd.f32 %v5321_v49, %v1890_v7 }
 0x6da   : > { %v1910_v45 = vsel %vm1049_vm1, %v6130_v9, 0.0 }
 0x6db   : > { %1911 = vadd.xlane.f32.xlu1 %v1910_v45 }
 0x736   : > { %v1903_v11 = vpop.xlane.xlu1 %1902 }
 0x737   : > { %v1913_v3 = vmul.f32 %v1903_v11, %v5853_v61 }
 0x739   : > { %v6136_v0 = vsub.f32 %v6109_v52, %v1913_v3 }
 0x73b   : > { %v1921_v53 = vmul.f32 %v6136_v0, %v6136_v0 }
 0x73d   : > { %v1925_v12 = vsel %vm1049_vm1, %v1921_v53, 0.0 }
 0x73e   : > { %1926 = vadd.xlane.f32.xlu2 %v1925_v12  ;;  %v1906_v13 = vpop.xlane.xlu2 %1905 }
 0x73f   : > { %v1914_v14 = vmul.f32 %v1906_v13, %v5853_v61 }
 0x741   : > { %v6143_v16 = vsub.f32 %v6114_v58, %v1914_v14 }
 0x743   : > { %v1922_v17 = vmul.f32 %v6143_v16, %v6143_v16 }
 0x745   : > { %v1928_v18 = vsel %vm1049_vm1, %v1922_v17, 0.0 }
 0x746   : > { %v1909_v20 = vpop.xlane.xlu0 %1908  ;;  %1929 = vadd.xlane.f32.xlu0 %v1928_v18 }
 0x747   : > { %v1915_v22 = vmul.f32 %v1909_v20, %v5853_v61 }
 0x749   : > { %v6150_v8 = vsub.f32 %v6119_v1, %v1915_v22 }
 0x74b   : > { %v1923_v23 = vmul.f32 %v6150_v8, %v6150_v8 }
 0x74d   : > { %v1931_v5 = vsel %vm1049_vm1, %v1923_v23, 0.0 }
 0x74e   : > { %1932 = vadd.xlane.f32.xlu1 %v1931_v5  ;;  %v1912_v24 = vpop.xlane.xlu1 %1911 }
 0x74f   : > { %v1916_v25 = vmul.f32 %v1912_v24, %v5853_v61 }
 0x751   : > { %v6163_v26 = vsub.f32 %v6130_v9, %v1916_v25 }
 0x753   : > { %v1924_v28 = vmul.f32 %v6163_v26, %v6163_v26 }
 0x755   : > { %v1934_v29 = vsel %vm1049_vm1, %v1924_v28, 0.0 }
 0x756   : > { %1935 = vadd.xlane.f32.xlu2 %v1934_v29 }
 0x7b1   : > { %v1927_v34 = vpop.xlane.xlu2 %1926 }
 0x7b2   : > { %v1937_v21 = vmul.f32 %v1927_v34, %v5853_v61  ;;  %v2099_v34 = vld [vmem:[%s6192_s0 + $0x58] sm:$0xff] }
 0x7b3   : > { %2108 = vmatpush.msrb.mxu3 %v2099_v34 }
 0x7b4   : > { %v1941_v15 = vadd.f32 1e-05, %v1937_v21  ;;  %v2098_v21 = vld [vmem:[%s6192_s0 + $0x50] sm:$0xff] }
 0x7b5   : > { %2109 = vmatpush.msrb.mxu3 %v2098_v21 }
 0x7b6   : > { %5394 = vrsqrt.f32 %v1941_v15  ;;  %vm1951_vm6 = vweird.f32 %v1941_v15 }
 0x7b9   : > { %v1930_v35 = vpop.xlane.xlu0 %1929 }
 0x7ba   : > { %v1938_v36 = vmul.f32 %v1930_v35, %v5853_v61  ;;  %v2095_v35 = vld [vmem:[%s6192_s0 + $0x38] sm:$0xff] }
 0x7bc   : > { %v5395_v37 = vpop.eup %5394  ;;  %v1942_v27 = vadd.f32 1e-05, %v1938_v36  ;;  %v2094_v36 = vld [vmem:[%s6192_s0 + $0x30] sm:$0xff] }
 0x7bd   : > { %v1946_v39 = vmul.f32 %v5395_v37, %v1941_v15  ;;  %vm1952_vm5 = vweird.f32 %v5395_v37  ;;  %v2096_v15 = vld [vmem:[%s6192_s0 + $0x40] sm:$0xff] }
 0x7be   : > { %5396 = vrsqrt.f32 %v1942_v27  ;;  %vm1953_vm7 = vmor %vm1951_vm6, %vm1952_vm5  ;;  %vm1961_vm9 = vweird.f32 %v1942_v27 }
 0x7bf   : > { %v1947_v40 = vmul.f32 %v5395_v37, %v1946_v39  ;;  %v2091_v39 = vld [vmem:[%s6192_s0 + $0x18] sm:$0xff] }
 0x7c1   : > { %v1948_v41 = vmul.f32 0.5, %v1947_v40  ;;  %v1933_v42 = vpop.xlane.xlu1 %1932  ;;  %v2090_v40 = vld [vmem:[%s6192_s0 + $0x10] sm:$0xff] }
 0x7c2   : > { %v1939_v10 = vmul.f32 %v1933_v42, %v5853_v61  ;;  %v2088_v42 = vld [vmem:[%s6192_s0] sm:$0xff] }
 0x7c3   : > { %v1949_v43 = vsub.f32 1.5, %v1948_v41  ;;  %v2089_v41 = vld [vmem:[%s6192_s0 + $0x8] sm:$0xff] }
 0x7c4   : > { %v5397_v44 = vpop.eup %5396  ;;  %v1943_v46 = vadd.f32 1e-05, %v1939_v10  ;;  %v5324_v10 = vld [vmem:[%s6172_s22] ss:$0 sm:$0xff] }
 0x7c5   : > { %v1950_v48 = vmul.f32 %v5395_v37, %v1949_v43  ;;  %v1956_v49 = vmul.f32 %v5397_v44, %v1942_v27  ;;  %vm1962_vm8 = vweird.f32 %v5397_v44  ;;  %v2092_v27 = vld [vmem:[%s6192_s0 + $0x20] sm:$0xff] }
 0x7c6   : > { %5398 = vrsqrt.f32 %v1943_v46  ;;  %vm1963_vm10 = vmor %vm1961_vm9, %vm1962_vm8  ;;  %vm1971_vm12 = vweird.f32 %v1943_v46 }
 0x7c7   : > { %v1954_v54 = vsel %vm1953_vm7, %v5395_v37, %v1950_v48  ;;  %v1957_v55 = vmul.f32 %v5397_v44, %v1956_v49  ;;  %v2093_v37 = vld [vmem:[%s6192_s0 + $0x28] sm:$0xff] }
 0x7c8   : > { %v1985_v56 = vmul.f32 %v1954_v54, %v6136_v0 }
 0x7c9   : > { %v1958_v60 = vmul.f32 0.5, %v1957_v55  ;;  %v1936_v30 = vpop.xlane.xlu2 %1935 }
 0x7ca   : > { %v1992_v62 = vmul.f32 %v5322_v47, %v1985_v56  ;;  %v1940_v63 = vmul.f32 %v1936_v30, %v5853_v61 }
 0x7cb   : > { %v1959_v2 = vsub.f32 1.5, %v1958_v60 }
 0x7cc   : > { %v5399_v4 = vpop.eup %5398  ;;  %v1944_v6 = vadd.f32 1e-05, %v1940_v63  ;;  %v1999_v38 = vadd.f32 %v5323_v57, %v1992_v62 }
 0x7cd   : > { %v1960_v7 = vmul.f32 %v5397_v44, %v1959_v2  ;;  %v1966_v45 = vmul.f32 %v5399_v4, %v1943_v46  ;;  %vm1972_vm11 = vweird.f32 %v5399_v4 }
 0x7ce   : > { %5400 = vrsqrt.f32 %v1944_v6  ;;  %4992 = vmatmul.msk.f32.vlgmr.msrb.gmra.mxu2 %vm1049_vm1, %v1999_v38  ;;  %vm1973_vm13 = vmor %vm1971_vm12, %vm1972_vm11  ;;  %vm1981_vm0 = vweird.f32 %v1944_v6 }
 0x7cf   : > { %v1964_v11 = vsel %vm1963_vm10, %v5397_v44, %v1960_v7  ;;  %v1967_v3 = vmul.f32 %v5399_v4, %v1966_v45 }
 0x7d0   : > { %v1986_v0 = vmul.f32 %v1964_v11, %v6143_v16 }
 0x7d1   : > { %v1968_v53 = vmul.f32 0.5, %v1967_v3 }
 0x7d2   : > { %v1993_v12 = vmul.f32 %v5322_v47, %v1986_v0 }
 0x7d3   : > { %v1969_v13 = vsub.f32 1.5, %v1968_v53 }
 0x7d4   : > { %v5401_v14 = vpop.eup %5400  ;;  %v2000_v17 = vadd.f32 %v5323_v57, %v1993_v12 }
 0x7d5   : > { %v1970_v18 = vmul.f32 %v5399_v4, %v1969_v13  ;;  %v1976_v20 = vmul.f32 %v5401_v14, %v1944_v6  ;;  %vm1982_vm14 = vweird.f32 %v5401_v14 }
 0x7d6   : > { %4993 = vmatmul.msk.f32.gmra.mxu2 %vm1049_vm1, %v2000_v17  ;;  %vm1983_vm2 = vmor %vm1981_vm0, %vm1982_vm14 }
 0x7d7   : > { %v1974_v22 = vsel %vm1973_vm13, %v5399_v4, %v1970_v18  ;;  %v1977_v23 = vmul.f32 %v5401_v14, %v1976_v20 }
 0x7d8   : > { %v1987_v5 = vmul.f32 %v1974_v22, %v6150_v8 }
 0x7d9   : > { %v1978_v24 = vmul.f32 0.5, %v1977_v23 }
 0x7da   : > { %v1994_v16 = vmul.f32 %v5322_v47, %v1987_v5 }
 0x7db   : > { %v1979_v25 = vsub.f32 1.5, %v1978_v24 }
 0x7dc   : > { %v2001_v28 = vadd.f32 %v5323_v57, %v1994_v16 }
 0x7dd   : > { %v1980_v29 = vmul.f32 %v5401_v14, %v1979_v25 }
 0x7de   : > { %4994 = vmatmul.msk.f32.gmra.mxu2 %vm1049_vm1, %v2001_v28 }
 0x7df   : > { %v1984_v31 = vsel %vm1983_vm2, %v5401_v14, %v1980_v29 }
 0x7e0   : > { %v1988_v19 = vmul.f32 %v1984_v31, %v6163_v26  ;;  %v2097_v26 = vld [vmem:[%s6192_s0 + $0x48] sm:$0xff] }
 0x7e1   : > { %2110 = vmatpush.msrb.mxu3 %v2097_v26 }
 0x7e2   : > { %v1995_v8 = vmul.f32 %v5322_v47, %v1988_v19 }
 0x7e3   : > { %2111 = vmatpush.msrb.mxu3 %v2096_v15 }
 0x7e4   : > { %v2002_v32 = vadd.f32 %v5323_v57, %v1995_v8 }
 0x7e5   : > { %2112 = vmatpush.msrb.mxu3 %v2095_v35 }
 0x7e6   : > { %4995 = vmatmul.msk.f32.gmra.mxu2 %vm1049_vm1, %v2002_v32  ;;  %v5325_v32 = vld [vmem:[%s6212_s24] ss:$0 sm:$0xff] }
 0x7e7   : > { %2113 = vmatpush.msrb.mxu3 %v2094_v36 }
 0x7e9   : > { %2114 = vmatpush.msrb.mxu3 %v2093_v37 }
 0x7eb   : > { %2115 = vmatpush.msrb.mxu3 %v2092_v27 }
 0x7ed   : > { %2116 = vmatpush.msrb.mxu3 %v2091_v39 }
 0x7ef   : > { %2117 = vmatpush.msrb.mxu3 %v2090_v40 }
 0x7f1   : > { %2118 = vmatpush.msrb.mxu3 %v2089_v41 }
 0x7f3   : > { %2119 = vmatpush.msrb.mxu3 %v2088_v42 }
 0x851   : > { %v2040_v43 = vpop.f32.mrf.mxu2 }
 0x852   : > { %v2041_v44 = vadd.f32 %v5324_v10, %v2040_v43 }
 0x854   : > { %v2052_v46 = vmul.f32 %v2041_v44, %v2041_v44 }
 0x856   : > { %v2056_v47 = vmul.f32 %v2052_v46, %v2041_v44 }
 0x858   : > { %v2060_v48 = vmul.f32 0.044715, %v2056_v47 }
 0x859   : > { %v2043_v49 = vpop.f32.mrf.mxu2 }
 0x85a   : > { %v2064_v50 = vadd.f32 %v2060_v48, %v2041_v44  ;;  %v2044_v51 = vadd.f32 %v5324_v10, %v2043_v49 }
 0x85c   : > { %v2068_v54 = vmul.f32 0.7978846, %v2064_v50  ;;  %v2053_v55 = vmul.f32 %v2044_v51, %v2044_v51 }
 0x85e   : > { %5402 = vtanh.f32 %v2068_v54  ;;  %v2057_v56 = vmul.f32 %v2053_v55, %v2044_v51 }
 0x860   : > { %v2061_v57 = vmul.f32 0.044715, %v2057_v56 }
 0x861   : > { %v2046_v59 = vpop.f32.mrf.mxu2 }
 0x862   : > { %v2047_v60 = vadd.f32 %v5324_v10, %v2046_v59  ;;  %v2065_v30 = vadd.f32 %v2061_v57, %v2044_v51 }
 0x864   : > { %v5403_v62 = vpop.eup %5402  ;;  %v2054_v63 = vmul.f32 %v2047_v60, %v2047_v60  ;;  %v2069_v2 = vmul.f32 0.7978846, %v2065_v30 }
 0x865   : > { %v2076_v4 = vadd.f32 1.0, %v5403_v62 }
 0x866   : > { %5404 = vtanh.f32 %v2069_v2  ;;  %v2058_v6 = vmul.f32 %v2054_v63, %v2047_v60 }
 0x867   : > { %v2080_v38 = vmul.f32 0.5, %v2076_v4  ;;  %v5010_v4 = vld [vmem:[%s5893_s28 + $0x118] sm:$0xff] }
 0x868   : > { %v2062_v7 = vmul.f32 0.044715, %v2058_v6  ;;  %v5001_v6 = vld [vmem:[%s5893_s28 + $0xd8] sm:$0xff]  ;;  %2324 = vmatpush.msra.mxu1 %v5010_v4 }
 0x869   : > { %v2049_v45 = vpop.f32.mrf.mxu2  ;;  %v2084_v11 = vmul.f32 %v2080_v38, %v2041_v44  ;;  %v5019_v38 = vld [vmem:[%s5893_s28 + $0x158] sm:$0xff]  ;;  %2285 = vmatpush.msra.mxu0 %v5001_v6 }
 0x86a   : > { %v2050_v3 = vadd.f32 %v5324_v10, %v2049_v45  ;;  %v2066_v0 = vadd.f32 %v2062_v7, %v2047_v60  ;;  %v5009_v7 = vld [vmem:[%s5893_s28 + $0x110] sm:$0xff]  ;;  %2363 = vmatpush.msra.mxu2 %v5019_v38 }
 0x86b   : > { %2120 = vmatmul.f32.vlgmr.msrb.gmra.mxu3 %v2084_v11  ;;  %v5000_v45 = vld [vmem:[%s5893_s28 + $0xd0] sm:$0xff]  ;;  %2325 = vmatpush.msra.mxu1 %v5009_v7 }
 0x86c   : > { %v5405_v53 = vpop.eup %5404  ;;  %v2055_v12 = vmul.f32 %v2050_v3, %v2050_v3  ;;  %v2070_v13 = vmul.f32 0.7978846, %v2066_v0  ;;  %v5018_v11 = vld [vmem:[%s5893_s28 + $0x150] sm:$0xff]  ;;  %2286 = vmatpush.msra.mxu0 %v5000_v45  ;;  %v5008_v0 = vld [vmem:[%s5893_s28 + $0x108] sm:$0xff] }
 0x86d   : > { %v2077_v14 = vadd.f32 1.0, %v5405_v53  ;;  %2364 = vmatpush.msra.mxu2 %v5018_v11  ;;  %v5017_v53 = vld [vmem:[%s5893_s28 + $0x148] sm:$0xff]  ;;  %2326 = vmatpush.msra.mxu1 %v5008_v0 }
 0x86e   : > { %5406 = vtanh.f32 %v2070_v13  ;;  %v2059_v17 = vmul.f32 %v2055_v12, %v2050_v3  ;;  %v4998_v12 = vld [vmem:[%s5893_s28 + $0xc0] sm:$0xff] }
 0x86f   : > { %v2081_v18 = vmul.f32 0.5, %v2077_v14  ;;  %2365 = vmatpush.msra.mxu2 %v5017_v53  ;;  %v5007_v13 = vld [vmem:[%s5893_s28 + $0x100] sm:$0xff] }
 0x870   : > { %v2063_v20 = vmul.f32 0.044715, %v2059_v17  ;;  %v5016_v14 = vld [vmem:[%s5893_s28 + $0x140] sm:$0xff]  ;;  %2327 = vmatpush.msra.mxu1 %v5007_v13 }
 0x871   : > { %v2085_v22 = vmul.f32 %v2081_v18, %v2044_v51  ;;  %2366 = vmatpush.msra.mxu2 %v5016_v14 }
 0x872   : > { %v2067_v23 = vadd.f32 %v2063_v20, %v2050_v3 }
 0x873   : > { %2123 = vmatmul.f32.gmra.mxu3 %v2085_v22 }
 0x874   : > { %v5407_v5 = vpop.eup %5406  ;;  %v2071_v24 = vmul.f32 0.7978846, %v2067_v23 }
 0x875   : > { %v2078_v16 = vadd.f32 1.0, %v5407_v5 }
 0x876   : > { %5408 = vtanh.f32 %v2071_v24 }
 0x877   : > { %v2082_v25 = vmul.f32 0.5, %v2078_v16 }
 0x879   : > { %v2086_v28 = vmul.f32 %v2082_v25, %v2047_v60 }
 0x87b   : > { %2126 = vmatmul.f32.gmra.mxu3 %v2086_v28 }
 0x87c   : > { %v5409_v29 = vpop.eup %5408 }
 0x87d   : > { %v2079_v31 = vadd.f32 1.0, %v5409_v29 }
 0x87f   : > { %v2083_v19 = vmul.f32 0.5, %v2079_v31 }
 0x881   : > { %v2087_v8 = vmul.f32 %v2083_v19, %v2050_v3  ;;  %v4999_v3 = vld [vmem:[%s5893_s28 + $0xc8] sm:$0xff] }
 0x882   : > { %2287 = vmatpush.msra.mxu0 %v4999_v3 }
 0x883   : > { %2129 = vmatmul.f32.gmra.mxu3 %v2087_v8 }
 0x884   : > { %2288 = vmatpush.msra.mxu0 %v4998_v12 }
 0x8ee   : > { %v2121_v33 = vpop.f32.mrf.mxu3 }
 0x8ef   : > { %v2133_v34 = vadd.f32 %v2121_v33, %v6109_v52 }
 0x8f1   : > { %v6230_v21 = vadd.f32 %v5325_v32, %v2133_v34 }
 0x8f3   : > { %v2149_v26 = vsel %vm1049_vm1, %v6230_v21, 0.0 }
 0x8f4   : > { %2150 = vadd.xlane.f32.xlu0 %v2149_v26  ;;  %v6293_v26 = vld [vmem:[%s5843_s23 + $0x1] ss:$0 sm:$0xff] }
 0x8f6   : > { %v2124_v15 = vpop.f32.mrf.mxu3 }
 0x8f7   : > { %v2134_v35 = vadd.f32 %v2124_v15, %v6114_v58 }
 0x8f9   : > { %v6235_v36 = vadd.f32 %v5325_v32, %v2134_v35 }
 0x8fb   : > { %v2152_v37 = vsel %vm1049_vm1, %v6235_v36, 0.0 }
 0x8fc   : > { %2153 = vadd.xlane.f32.xlu1 %v2152_v37  ;;  %v5042_v37 = vld [vmem:[%s5893_s28 + $0xf8] sm:$0xff] }
 0x8fd   : > { %2603 = vmatpush.msrb.mxu1 %v5042_v37 }
 0x8fe   : > { %v2127_v27 = vpop.f32.mrf.mxu3 }
 0x8ff   : > { %v2135_v39 = vadd.f32 %v2127_v27, %v6119_v1  ;;  %v5051_v27 = vld [vmem:[%s5893_s28 + $0x138] sm:$0xff] }
 0x900   : > { %2642 = vmatpush.msrb.mxu2 %v5051_v27 }
 0x901   : > { %v6240_v40 = vadd.f32 %v5325_v32, %v2135_v39  ;;  %v5041_v39 = vld [vmem:[%s5893_s28 + $0xf0] sm:$0xff] }
 0x902   : > { %2604 = vmatpush.msrb.mxu1 %v5041_v39  ;;  %v5060_v39 = vld [vmem:[%s5893_s28 + $0x178] sm:$0xff] }
 0x903   : > { %v2155_v52 = vsel %vm1049_vm1, %v6240_v40, 0.0 }
 0x904   : > { %2156 = vadd.xlane.f32.xlu2 %v2155_v52  ;;  %v6299_v52 = vld [vmem:[%s5849_s4 + $0x1] ss:$0 sm:$0xff] }
 0x906   : > { %v2130_v41 = vpop.f32.mrf.mxu3 }
 0x907   : > { %v2136_v42 = vadd.f32 %v2130_v41, %v6130_v9 }
 0x909   : > { %v6245_v10 = vadd.f32 %v5325_v32, %v2136_v42  ;;  %v5050_v42 = vld [vmem:[%s5893_s28 + $0x130] sm:$0xff] }
 0x90a   : > { %2643 = vmatpush.msrb.mxu2 %v5050_v42 }
 0x90b   : > { %v2158_v58 = vsel %vm1049_vm1, %v6245_v10, 0.0 }
 0x90c   : > { %2159 = vadd.xlane.f32.xlu0 %v2158_v58 }
 0x967   : > { %v2151_v43 = vpop.xlane.xlu0 %2150 }
 0x968   : > { %v2161_v44 = vmul.f32 %v2151_v43, %v5853_v61 }
 0x96a   : > { %v6251_v1 = vsub.f32 %v6230_v21, %v2161_v44  ;;  %v5040_v44 = vld [vmem:[%s5893_s28 + $0xe8] sm:$0xff] }
 0x96b   : > { %2605 = vmatpush.msrb.mxu1 %v5040_v44  ;;  %v5058_v44 = vld [vmem:[%s5893_s28 + $0x168] sm:$0xff] }
 0x96c   : > { %v2169_v46 = vmul.f32 %v6251_v1, %v6251_v1 }
 0x96e   : > { %v2173_v47 = vsel %vm1049_vm1, %v2169_v46, 0.0  ;;  %v5049_v46 = vld [vmem:[%s5893_s28 + $0x128] sm:$0xff] }
 0x96f   : > { %2174 = vadd.xlane.f32.xlu1 %v2173_v47  ;;  %v2154_v48 = vpop.xlane.xlu1 %2153  ;;  %2644 = vmatpush.msrb.mxu2 %v5049_v46  ;;  %v5057_v46 = vld [vmem:[%s5893_s28 + $0x160] sm:$0xff] }
 0x970   : > { %v2162_v9 = vmul.f32 %v2154_v48, %v5853_v61 }
 0x972   : > { %v6258_v49 = vsub.f32 %v6235_v36, %v2162_v9 }
 0x974   : > { %v2170_v50 = vmul.f32 %v6258_v49, %v6258_v49 }
 0x976   : > { %v2176_v51 = vsel %vm1049_vm1, %v2170_v50, 0.0 }
 0x977   : > { %2177 = vadd.xlane.f32.xlu2 %v2176_v51  ;;  %v2157_v54 = vpop.xlane.xlu2 %2156 }
 0x978   : > { %v2163_v55 = vmul.f32 %v2157_v54, %v5853_v61  ;;  %v5039_v54 = vld [vmem:[%s5893_s28 + $0xe0] sm:$0xff] }
 0x979   : > { %2606 = vmatpush.msrb.mxu1 %v5039_v54 }
 0x97a   : > { %v6265_v56 = vsub.f32 %v6240_v40, %v2163_v55 }
 0x97c   : > { %v2171_v57 = vmul.f32 %v6265_v56, %v6265_v56 }
 0x97e   : > { %v2179_v59 = vsel %vm1049_vm1, %v2171_v57, 0.0 }
 0x97f   : > { %v2160_v60 = vpop.xlane.xlu0 %2159  ;;  %2180 = vadd.xlane.f32.xlu0 %v2179_v59  ;;  %v5048_v59 = vld [vmem:[%s5893_s28 + $0x120] sm:$0xff] }
 0x980   : > { %v2164_v30 = vmul.f32 %v2160_v60, %v5853_v61  ;;  %2645 = vmatpush.msrb.mxu2 %v5048_v59 }
 0x982   : > { %v6272_v62 = vsub.f32 %v6245_v10, %v2164_v30 }
 0x984   : > { %v2172_v63 = vmul.f32 %v6272_v62, %v6272_v62 }
 0x986   : > { %v2182_v2 = vsel %vm1049_vm1, %v2172_v63, 0.0 }
 0x987   : > { %2183 = vadd.xlane.f32.xlu1 %v2182_v2 }
 0x9e2   : > { %v2175_v17 = vpop.xlane.xlu1 %2174 }
 0x9e3   : > { %v2185_v18 = vmul.f32 %v2175_v17, %v5853_v61 }
 0x9e5   : > { %v2189_v20 = vadd.f32 1e-05, %v2185_v18 }
 0x9e7   : > { %5410 = vrsqrt.f32 %v2189_v20  ;;  %vm2199_vm4 = vweird.f32 %v2189_v20 }
 0x9ea   : > { %v2178_v22 = vpop.xlane.xlu2 %2177 }
 0x9eb   : > { %v2186_v23 = vmul.f32 %v2178_v22, %v5853_v61 }
 0x9ed   : > { %v5411_v5 = vpop.eup %5410  ;;  %v2190_v24 = vadd.f32 1e-05, %v2186_v23 }
 0x9ee   : > { %v2194_v16 = vmul.f32 %v5411_v5, %v2189_v20  ;;  %vm2200_vm3 = vweird.f32 %v5411_v5 }
 0x9ef   : > { %5412 = vrsqrt.f32 %v2190_v24  ;;  %vm2201_vm5 = vmor %vm2199_vm4, %vm2200_vm3  ;;  %vm2209_vm7 = vweird.f32 %v2190_v24 }
 0x9f0   : > { %v2195_v25 = vmul.f32 %v5411_v5, %v2194_v16 }
 0x9f2   : > { %v2196_v28 = vmul.f32 0.5, %v2195_v25  ;;  %v2181_v29 = vpop.xlane.xlu0 %2180  ;;  %v5329_v25 = vld [vmem:[%s5887_s2 + $0x8] ss:$0 sm:$0xff] }
 0x9f3   : > { %v2187_v31 = vmul.f32 %v2181_v29, %v5853_v61 }
 0x9f4   : > { %v2197_v19 = vsub.f32 1.5, %v2196_v28 }
 0x9f5   : > { %v5413_v8 = vpop.eup %5412  ;;  %v2191_v32 = vadd.f32 1e-05, %v2187_v31 }
 0x9f6   : > { %v2198_v33 = vmul.f32 %v5411_v5, %v2197_v19  ;;  %v2204_v34 = vmul.f32 %v5413_v8, %v2190_v24  ;;  %vm2210_vm6 = vweird.f32 %v5413_v8 }
 0x9f7   : > { %5414 = vrsqrt.f32 %v2191_v32  ;;  %vm2211_vm8 = vmor %vm2209_vm7, %vm2210_vm6  ;;  %vm2219_vm10 = vweird.f32 %v2191_v32 }
 0x9f8   : > { %v2202_v15 = vsel %vm2201_vm5, %v5411_v5, %v2198_v33  ;;  %v2205_v35 = vmul.f32 %v5413_v8, %v2204_v34 }
 0x9f9   : > { %v2233_v41 = vmul.f32 %v2202_v15, %v6251_v1 }
 0x9fa   : > { %v2206_v58 = vmul.f32 0.5, %v2205_v35  ;;  %v2184_v43 = vpop.xlane.xlu1 %2183  ;;  %v5328_v35 = vld [vmem:[%s5887_s2 + $0x6] ss:$0 sm:$0xff] }
 0x9fb   : > { %v2240_v47 = vmul.f32 %v6293_v26, %v2233_v41  ;;  %v2188_v48 = vmul.f32 %v2184_v43, %v5853_v61 }
 0x9fc   : > { %v2207_v9 = vsub.f32 1.5, %v2206_v58  ;;  %v5059_v58 = vld [vmem:[%s5893_s28 + $0x170] sm:$0xff] }
 0x9fd   : > { %v5415_v50 = vpop.eup %5414  ;;  %v6308_v1 = vadd.f32 %v6299_v52, %v2240_v47  ;;  %v2192_v51 = vadd.f32 1e-05, %v2188_v48 }
 0x9fe   : > { %v2208_v55 = vmul.f32 %v5413_v8, %v2207_v9  ;;  %v2214_v57 = vmul.f32 %v5415_v50, %v2191_v32  ;;  %vm2220_vm9 = vweird.f32 %v5415_v50 }
 0x9ff   : > { %5416 = vrsqrt.f32 %v2192_v51  ;;  %5003 = vmatmul.msk.f32.vlgmr.msra.gmra.mxu0 %vm1049_vm1, %v6308_v1  ;;  %5012 = vmatmul.msk.f32.vlgmr.msra.gmra.mxu1 %vm1049_vm1, %v6308_v1  ;;  %vm2221_vm11 = vmor %vm2219_vm10, %vm2220_vm9  ;;  %vm2229_vm13 = vweird.f32 %v2192_v51 }
 0xa00   : > { %v2212_v60 = vsel %vm2211_vm8, %v5413_v8, %v2208_v55  ;;  %v2215_v30 = vmul.f32 %v5415_v50, %v2214_v57  ;;  %5021 = vmatmul.msk.f32.vlgmr.msra.gmra.mxu2 %vm1049_vm1, %v6308_v1  ;;  %v5330_v8 = vld [vmem:[%s5887_s2 + $0xa] ss:$0 sm:$0xff]  ;;  %v5332_v55 = vld [vmem:[%s5887_s2 + $0x9] ss:$0 sm:$0xff] }
 0xa01   : > { %v2234_v63 = vmul.f32 %v2212_v60, %v6258_v49 }
 0xa02   : > { %v2216_v2 = vmul.f32 0.5, %v2215_v30 }
 0xa03   : > { %v2241_v4 = vmul.f32 %v6293_v26, %v2234_v63 }
 0xa04   : > { %v2217_v6 = vsub.f32 1.5, %v2216_v2 }
 0xa05   : > { %v5417_v38 = vpop.eup %5416  ;;  %v6321_v7 = vadd.f32 %v6299_v52, %v2241_v4 }
 0xa06   : > { %v2218_v45 = vmul.f32 %v5415_v50, %v2217_v6  ;;  %v2224_v11 = vmul.f32 %v5417_v38, %v2192_v51  ;;  %vm2230_vm12 = vweird.f32 %v5417_v38 }
 0xa07   : > { %5004 = vmatmul.msk.f32.gmra.mxu0 %vm1049_vm1, %v6321_v7  ;;  %5013 = vmatmul.msk.f32.gmra.mxu1 %vm1049_vm1, %v6321_v7  ;;  %vm2231_vm14 = vmor %vm2229_vm13, %vm2230_vm12 }
 0xa08   : > { %v2222_v49 = vsel %vm2221_vm11, %v5415_v50, %v2218_v45  ;;  %v2225_v3 = vmul.f32 %v5417_v38, %v2224_v11  ;;  %5022 = vmatmul.msk.f32.gmra.mxu2 %vm1049_vm1, %v6321_v7 }
 0xa09   : > { %v2235_v0 = vmul.f32 %v2222_v49, %v6265_v56  ;;  %v6405_v49 = vld [vmem:[%s7118_s27 + $0x8] sm:$0xff] }
 0xa0a   : > { %v2226_v53 = vmul.f32 0.5, %v2225_v3 }
 0xa0b   : > { %v2242_v12 = vmul.f32 %v6293_v26, %v2235_v0 }
 0xa0c   : > { %v2227_v13 = vsub.f32 1.5, %v2226_v53 }
 0xa0d   : > { %v6332_v14 = vadd.f32 %v6299_v52, %v2242_v12 }
 0xa0e   : > { %v2228_v17 = vmul.f32 %v5417_v38, %v2227_v13  ;;  %v6412_v13 = vld [vmem:[%s7118_s27 + $0x10] sm:$0xff] }
 0xa0f   : > { %5005 = vmatmul.msk.f32.gmra.mxu0 %vm1049_vm1, %v6332_v14  ;;  %5014 = vmatmul.msk.f32.gmra.mxu1 %vm1049_vm1, %v6332_v14 }
 0xa10   : > { %v2232_v18 = vsel %vm2231_vm14, %v5417_v38, %v2228_v17  ;;  %5023 = vmatmul.msk.f32.gmra.mxu2 %vm1049_vm1, %v6332_v14  ;;  %v6398_v38 = vld [vmem:[%s7118_s27] sm:$0xff] }
 0xa11   : > { %v2236_v56 = vmul.f32 %v2232_v18, %v6272_v62 }
 0xa13   : > { %v2243_v20 = vmul.f32 %v6293_v26, %v2236_v56 }
 0xa15   : > { %v6343_v22 = vadd.f32 %v6299_v52, %v2243_v20  ;;  %v6419_v20 = vld [vmem:[%s7118_s27 + $0x18] sm:$0xff] }
 0xa17   : > { %5006 = vmatmul.msk.f32.gmra.mxu0 %vm1049_vm1, %v6343_v22  ;;  %5015 = vmatmul.msk.f32.gmra.mxu1 %vm1049_vm1, %v6343_v22 }
 0xa18   : > { %5024 = vmatmul.msk.f32.gmra.mxu2 %vm1049_vm1, %v6343_v22 }
 0xa1f   : > { %5044 = vmatmul.msk.f32.vlgmr.msrb.gmra.mxu1 %vm1049_vm1, %v6308_v1 }
 0xa20   : > { %5053 = vmatmul.msk.f32.vlgmr.msrb.gmra.mxu2 %vm1049_vm1, %v6308_v1 }
 0xa27   : > { %5045 = vmatmul.msk.f32.gmra.mxu1 %vm1049_vm1, %v6321_v7 }
 0xa28   : > { %5054 = vmatmul.msk.f32.gmra.mxu2 %vm1049_vm1, %v6321_v7 }
 0xa2f   : > { %5046 = vmatmul.msk.f32.gmra.mxu1 %vm1049_vm1, %v6332_v14 }
 0xa30   : > { %5055 = vmatmul.msk.f32.gmra.mxu2 %vm1049_vm1, %v6332_v14 }
 0xa37   : > { %5047 = vmatmul.msk.f32.gmra.mxu1 %vm1049_vm1, %v6343_v22 }
 0xa38   : > { %5056 = vmatmul.msk.f32.gmra.mxu2 %vm1049_vm1, %v6343_v22 }
 0xa7c   : > { %v2329_v62 = vpop.f32.mrf.mxu1  ;;  %v2290_v32 = vpop.f32.mrf.mxu0 }
 0xa7d   : > { %v2330_v27 = vadd.f32 %v5329_v25, %v2329_v62  ;;  %v2291_v42 = vadd.f32 %v5328_v35, %v2290_v32 }
 0xa83   : > { %v2368_v23 = vpop.f32.mrf.mxu2 }
 0xa84   : > { %v2332_v5 = vpop.f32.mrf.mxu1  ;;  %v2369_v52 = vadd.f32 %v5330_v8, %v2368_v23  ;;  %v2293_v43 = vpop.f32.mrf.mxu0 }
 0xa85   : > { %v2333_v26 = vadd.f32 %v5329_v25, %v2332_v5  ;;  %v2294_v48 = vadd.f32 %v5328_v35, %v2293_v43 }
 0xa8b   : > { %v2371_v24 = vpop.f32.mrf.mxu2 }
 0xa8c   : > { %v2335_v16 = vpop.f32.mrf.mxu1  ;;  %v2372_v37 = vadd.f32 %v5330_v8, %v2371_v24  ;;  %v2296_v9 = vpop.f32.mrf.mxu0 }
 0xa8d   : > { %v2336_v19 = vadd.f32 %v5329_v25, %v2335_v16  ;;  %v2297_v51 = vadd.f32 %v5328_v35, %v2296_v9  ;;  %v5333_v16 = vld [vmem:[%s5887_s2 + $0xb] ss:$0 sm:$0xff] }
 0xa93   : > { %v2374_v28 = vpop.f32.mrf.mxu2 }
 0xa94   : > { %v2338_v29 = vpop.f32.mrf.mxu1  ;;  %v2375_v15 = vadd.f32 %v5330_v8, %v2374_v28  ;;  %v2299_v54 = vpop.f32.mrf.mxu0 }
 0xa95   : > { %v2339_v31 = vadd.f32 %v5329_v25, %v2338_v29  ;;  %v2300_v59 = vadd.f32 %v5328_v35, %v2299_v54 }
 0xa97   : > { %5025 = vmatpush.xpose.msk.msra.mxu3 %vm1286_vm15, %v2339_v31 }
 0xa9b   : > { %v2377_v33 = vpop.f32.mrf.mxu2  ;;  %5026 = vmatpush.xpose.msk.msra.mxu3 %vm1286_vm15, %v2336_v19 }
 0xa9c   : > { %v2378_v34 = vadd.f32 %v5330_v8, %v2377_v33 }
 0xa9e   : > { %2561 = vmatpush.msrb.mxu0 %v2378_v34 }
 0xa9f   : > { %5027 = vmatpush.xpose.msk.msra.mxu3 %vm1286_vm15, %v2333_v26 }
 0xaa0   : > { %2562 = vmatpush.msrb.mxu0 %v2375_v15 }
 0xaa2   : > { %2563 = vmatpush.msrb.mxu0 %v2372_v37 }
 0xaa3   : > { %v2647_v41 = vpop.f32.mrf.mxu2  ;;  %5028 = vmatpush.xpose.msk.msra.mxu3 %vm1286_vm15, %v2330_v27 }
 0xaa4   : > { %2564 = vmatpush.msrb.mxu0 %v2369_v52  ;;  %v2648_v2 = vadd.f32 %v5332_v55, %v2647_v41 }
 0xaa6   : > { %5029 = vmatmul.msk.f32.vlgmr.msra.gmra.mxu3 %vm1286_vm15, %v2291_v42 }
 0xaa7   : > { %2681 = vmatpush.msrb.mxu3 %v5060_v39 }
 0xaa9   : > { %2682 = vmatpush.msrb.mxu3 %v5059_v58 }
 0xaab   : > { %2683 = vmatpush.msrb.mxu3 %v5058_v44  ;;  %v2650_v47 = vpop.f32.mrf.mxu2 }
 0xaac   : > { %v2651_v63 = vadd.f32 %v5332_v55, %v2650_v47 }
 0xaad   : > { %2684 = vmatpush.msrb.mxu3 %v5057_v46 }
 0xaae   : > { %5030 = vmatmul.msk.f32.gmra.mxu3 %vm1286_vm15, %v2294_v48 }
 0xab3   : > { %v2653_v50 = vpop.f32.mrf.mxu2 }
 0xab4   : > { %v2654_v30 = vadd.f32 %v5332_v55, %v2653_v50 }
 0xab6   : > { %5031 = vmatmul.msk.f32.gmra.mxu3 %vm1286_vm15, %v2297_v51 }
 0xabb   : > { %v2656_v57 = vpop.f32.mrf.mxu2 }
 0xabc   : > { %v2657_v60 = vadd.f32 %v5332_v55, %v2656_v57 }
 0xabe   : > { %5066 = vmatpush.xpose.msk.msra.mxu0 %vm1286_vm15, %v2657_v60  ;;  %5032 = vmatmul.msk.f32.gmra.mxu3 %vm1286_vm15, %v2300_v59 }
 0xac2   : > { %5067 = vmatpush.xpose.msk.msra.mxu0 %vm1286_vm15, %v2654_v30 }
 0xac6   : > { %5068 = vmatpush.xpose.msk.msra.mxu0 %vm1286_vm15, %v2651_v63  ;;  %5062 = vmatmul.msk.f32.vlgmr.msrb.gmra.mxu3 %vm1049_vm1, %v6308_v1 }
 0xaca   : > { %5069 = vmatpush.xpose.msk.msra.mxu0 %vm1286_vm15, %v2648_v2 }
 0xace   : > { %5063 = vmatmul.msk.f32.gmra.mxu3 %vm1049_vm1, %v6321_v7 }
 0xad6   : > { %5064 = vmatmul.msk.f32.gmra.mxu3 %vm1049_vm1, %v6332_v14 }
 0xade   : > { %5065 = vmatmul.msk.f32.gmra.mxu3 %vm1049_vm1, %v6343_v22 }
 0xb29   : > { %v2421_v4 = vpop.f32.mrf.mxu3 }
 0xb2a   : > { %v2433_v6 = vmul.f32 0.25, %v2421_v4 }
 0xb2c   : > { %v2437_v1 = vadd.f32 %v6398_v38, %v2433_v6 }
 0xb2e   : > { %v2441_v45 = vsel %vm1049_vm1, %v2437_v1, -inf }
 0xb2f   : > { %2442 = vmax.xlane.f32.xlu2 %v2441_v45 }
 0xb31   : > { %v2424_v11 = vpop.f32.mrf.mxu3 }
 0xb32   : > { %v2434_v7 = vmul.f32 0.25, %v2424_v11 }
 0xb34   : > { %v2438_v3 = vadd.f32 %v6405_v49, %v2434_v7 }
 0xb36   : > { %v2444_v0 = vsel %vm1049_vm1, %v2438_v3, -inf }
 0xb37   : > { %2445 = vmax.xlane.f32.xlu0 %v2444_v0 }
 0xb39   : > { %v2427_v53 = vpop.f32.mrf.mxu3 }
 0xb3a   : > { %v2435_v12 = vmul.f32 0.25, %v2427_v53 }
 0xb3c   : > { %v2439_v14 = vadd.f32 %v6412_v13, %v2435_v12 }
 0xb3e   : > { %v2447_v17 = vsel %vm1049_vm1, %v2439_v14, -inf }
 0xb3f   : > { %2448 = vmax.xlane.f32.xlu1 %v2447_v17 }
 0xb41   : > { %v2430_v18 = vpop.f32.mrf.mxu3 }
 0xb42   : > { %v2436_v56 = vmul.f32 0.25, %v2430_v18 }
 0xb44   : > { %v2440_v22 = vadd.f32 %v6419_v20, %v2436_v56 }
 0xb46   : > { %v2450_v62 = vsel %vm1049_vm1, %v2440_v22, -inf }
 0xb47   : > { %2451 = vmax.xlane.f32.xlu2 %v2450_v62 }
 0xb49   : > { %v2686_v23 = vpop.f32.mrf.mxu3 }
 0xb4a   : > { %v2687_v19 = vadd.f32 %v5333_v16, %v2686_v23 }
 0xb51   : > { %v2689_v5 = vpop.f32.mrf.mxu3 }
 0xb52   : > { %v2690_v31 = vadd.f32 %v5333_v16, %v2689_v5 }
 0xb59   : > { %v2692_v24 = vpop.f32.mrf.mxu3 }
 0xb5a   : > { %v2693_v29 = vadd.f32 %v5333_v16, %v2692_v24 }
 0xb61   : > { %v2695_v25 = vpop.f32.mrf.mxu3 }
 0xb62   : > { %v2696_v28 = vadd.f32 %v5333_v16, %v2695_v25 }
 0xb64   : > { %2879 = vmatpush.msra.mxu1 %v2696_v28 }
 0xb66   : > { %2880 = vmatpush.msra.mxu1 %v2693_v29 }
 0xb68   : > { %2881 = vmatpush.msra.mxu1 %v2690_v31 }
 0xb6a   : > { %2882 = vmatpush.msra.mxu1 %v2687_v19 }
 0xba2   : > { %v2443_v8 = vpop.xlane.xlu2 %2442 }
 0xba3   : > { %v2453_v32 = vsub.f32 %v2437_v1, %v2443_v8 }
 0xba5   : > { %v2457_v33 = vmul.f32 1.442695, %v2453_v32 }
 0xba7   : > { %5418 = vpow2.f32 %v2457_v33 }
 0xbaa   : > { %v2446_v34 = vpop.xlane.xlu0 %2445 }
 0xbab   : > { %v2454_v26 = vsub.f32 %v2438_v3, %v2446_v34 }
 0xbad   : > { %v5419_v15 = vpop.eup %5418  ;;  %v2459_v35 = vmul.f32 1.442695, %v2454_v26 }
 0xbae   : > { %v2465_v37 = vsel %vm1049_vm1, %v5419_v15, 0.0 }
 0xbaf   : > { %5420 = vpow2.f32 %v2459_v35  ;;  %2466 = vadd.xlane.f32.xlu0 %v2465_v37 }
 0xbb2   : > { %v2449_v27 = vpop.xlane.xlu1 %2448 }
 0xbb3   : > { %v2455_v39 = vsub.f32 %v2439_v14, %v2449_v27 }
 0xbb5   : > { %v5421_v52 = vpop.eup %5420  ;;  %v2461_v41 = vmul.f32 1.442695, %v2455_v39 }
 0xbb6   : > { %v2468_v42 = vsel %vm1049_vm1, %v5421_v52, 0.0 }
 0xbb7   : > { %5422 = vpow2.f32 %v2461_v41  ;;  %2469 = vadd.xlane.f32.xlu1 %v2468_v42  ;;  %v2608_v41 = vpop.f32.mrf.mxu1 }
 0xbba   : > { %v2452_v58 = vpop.xlane.xlu2 %2451 }
 0xbbb   : > { %v2456_v43 = vsub.f32 %v2440_v22, %v2452_v58 }
 0xbbd   : > { %v6426_v44 = vpop.eup %5422  ;;  %v2463_v46 = vmul.f32 1.442695, %v2456_v43  ;;  %v5038_v43 = vld [vmem:[%s6056_s30 + $0x28] sm:$0xff] }
 0xbbe   : > { %v2471_v47 = vsel %vm1049_vm1, %v6426_v44, 0.0  ;;  %2966 = vmatpush.msra.mxu3 %v5038_v43 }
 0xbbf   : > { %5424 = vpow2.f32 %v2463_v46  ;;  %2472 = vadd.xlane.f32.xlu2 %v2471_v47  ;;  %v2611_v47 = vpop.f32.mrf.mxu1 }
 0xbc5   : > { %v6430_v48 = vpop.eup %5424 }
 0xbc6   : > { %v2474_v9 = vsel %vm1049_vm1, %v6430_v48, 0.0 }
 0xbc7   : > { %2475 = vadd.xlane.f32.xlu0 %v2474_v9 }
 0xc22   : > { %v2467_v50 = vpop.xlane.xlu0 %2466 }
 0xc23   : > { %5426 = vrcp.f32 %v2467_v50  ;;  %v2488_v59 = vand.u32 2147483648, %v2467_v50  ;;  %v2486_v30 = vand.u32 2147483647, %v2467_v50  ;;  %vm2482_vm2 = vweird.f32 %v2467_v50 }
 0xc25   : > { %v2489_v4 = vor.u32 1.1754944e-38, %v2488_v59  ;;  %vm2487_vm4 = vcmp.eq.f32.partialorder %v2486_v30, 8.507059e+37 }
 0xc29   : > { %v5427_v51 = vpop.eup %5426 }
 0xc2a   : > { %v2478_v54 = vmul.f32 %v5427_v51, %v2467_v50  ;;  %v2470_v55 = vpop.xlane.xlu1 %2469  ;;  %vm2483_vm0 = vweird.f32 %v5427_v51  ;;  %v2614_v50 = vpop.f32.mrf.mxu1 }
 0xc2b   : > { %5428 = vrcp.f32 %v2470_v55  ;;  %vm2484_vm3 = vmor %vm2482_vm2, %vm2483_vm0  ;;  %v2503_v0 = vand.u32 2147483648, %v2470_v55  ;;  %v2501_v12 = vand.u32 2147483647, %v2470_v55  ;;  %vm2497_vm6 = vweird.f32 %v2470_v55 }
 0xc2c   : > { %v2479_v57 = vsub.f32 1.0, %v2478_v54 }
 0xc2d   : > { %v2504_v18 = vor.u32 1.1754944e-38, %v2503_v0  ;;  %vm2502_vm8 = vcmp.eq.f32.partialorder %v2501_v12, 8.507059e+37 }
 0xc2e   : > { %v2480_v60 = vmul.f32 %v5427_v51, %v2479_v57 }
 0xc30   : > { %v2481_v63 = vadd.f32 %v5427_v51, %v2480_v60 }
 0xc31   : > { %v5429_v2 = vpop.eup %5428 }
 0xc32   : > { %v2485_v6 = vsel %vm2484_vm3, %v5427_v51, %v2481_v63  ;;  %v2493_v1 = vmul.f32 %v5429_v2, %v2470_v55  ;;  %v2473_v45 = vpop.xlane.xlu2 %2472  ;;  %vm2498_vm5 = vweird.f32 %v5429_v2  ;;  %v2617_v54 = vpop.f32.mrf.mxu1 }
 0xc33   : > { %v2490_v11 = vsel %vm2487_vm4, %v2489_v4, %v2485_v6  ;;  %5430 = vrcp.f32 %v2473_v45  ;;  %vm2499_vm7 = vmor %vm2497_vm6, %vm2498_vm5  ;;  %v2518_v16 = vand.u32 2147483648, %v2473_v45  ;;  %v2516_v28 = vand.u32 2147483647, %v2473_v45 }
 0xc34   : > { %v2494_v7 = vsub.f32 1.0, %v2493_v1  ;;  %v2491_v3 = vmul.f32 %v5419_v15, %v2490_v11  ;;  %vm2512_vm10 = vweird.f32 %v2473_v45 }
 0xc35   : > { %v2519_v19 = vor.u32 1.1754944e-38, %v2518_v16  ;;  %vm2517_vm12 = vcmp.eq.f32.partialorder %v2516_v28, 8.507059e+37 }
 0xc36   : > { %v2495_v53 = vmul.f32 %v5429_v2, %v2494_v7  ;;  %5033 = vmatmul.msk.f32.vlgmr.msrb.gmra.mxu0 %vm1049_vm1, %v2491_v3 }
 0xc38   : > { %v2496_v14 = vadd.f32 %v5429_v2, %v2495_v53 }
 0xc39   : > { %v5431_v17 = vpop.eup %5430 }
 0xc3a   : > { %v2508_v56 = vmul.f32 %v5431_v17, %v2473_v45  ;;  %v2476_v22 = vpop.xlane.xlu0 %2475  ;;  %v2500_v62 = vsel %vm2499_vm7, %v5429_v2, %v2496_v14  ;;  %vm2513_vm9 = vweird.f32 %v5431_v17 }
 0xc3b   : > { %5432 = vrcp.f32 %v2476_v22  ;;  %v2505_v23 = vsel %vm2502_vm8, %v2504_v18, %v2500_v62  ;;  %vm2514_vm11 = vmor %vm2512_vm10, %vm2513_vm9  ;;  %v2533_v15 = vand.u32 2147483648, %v2476_v22  ;;  %v2531_v37 = vand.u32 2147483647, %v2476_v22 }
 0xc3c   : > { %v2509_v5 = vsub.f32 1.0, %v2508_v56  ;;  %v2506_v24 = vmul.f32 %v5421_v52, %v2505_v23  ;;  %vm2527_vm14 = vweird.f32 %v2476_v22 }
 0xc3d   : > { %v2534_v39 = vor.u32 1.1754944e-38, %v2533_v15  ;;  %vm2532_vm2 = vcmp.eq.f32.partialorder %v2531_v37, 8.507059e+37 }
 0xc3e   : > { %v2510_v25 = vmul.f32 %v5431_v17, %v2509_v5  ;;  %5034 = vmatmul.msk.f32.gmra.mxu0 %vm1049_vm1, %v2506_v24 }
 0xc40   : > { %v2511_v29 = vadd.f32 %v5431_v17, %v2510_v25 }
 0xc41   : > { %v5433_v31 = vpop.eup %5432 }
 0xc42   : > { %v2523_v8 = vmul.f32 %v5433_v31, %v2476_v22  ;;  %v2515_v32 = vsel %vm2514_vm11, %v5431_v17, %v2511_v29  ;;  %vm2528_vm13 = vweird.f32 %v5433_v31 }
 0xc43   : > { %v2520_v33 = vsel %vm2517_vm12, %v2519_v19, %v2515_v32  ;;  %vm2529_vm0 = vmor %vm2527_vm14, %vm2528_vm13 }
 0xc44   : > { %v2524_v34 = vsub.f32 1.0, %v2523_v8  ;;  %v2521_v26 = vmul.f32 %v6426_v44, %v2520_v33  ;;  %v5331_v44 = vld [vmem:[%s5887_s2 + $0x7] ss:$0 sm:$0xff] }
 0xc45   : > { %v2609_v46 = vadd.f32 %v5331_v44, %v2608_v41  ;;  %v2612_v9 = vadd.f32 %v5331_v44, %v2611_v47  ;;  %v2615_v51 = vadd.f32 %v5331_v44, %v2614_v50  ;;  %v2618_v55 = vadd.f32 %v5331_v44, %v2617_v54 }
 0xc46   : > { %v2525_v35 = vmul.f32 %v5433_v31, %v2524_v34  ;;  %5035 = vmatmul.msk.f32.gmra.mxu0 %vm1049_vm1, %v2521_v26 }
 0xc48   : > { %v2526_v27 = vadd.f32 %v5433_v31, %v2525_v35 }
 0xc4a   : > { %v2530_v52 = vsel %vm2529_vm0, %v5433_v31, %v2526_v27 }
 0xc4b   : > { %v2535_v42 = vsel %vm2532_vm2, %v2534_v39, %v2530_v52 }
 0xc4c   : > { %v2536_v58 = vmul.f32 %v6430_v48, %v2535_v42  ;;  %v5037_v48 = vld [vmem:[%s6056_s30 + $0x20] sm:$0xff] }
 0xc4d   : > { %2967 = vmatpush.msra.mxu3 %v5037_v48 }
 0xc4e   : > { %5036 = vmatmul.msk.f32.gmra.mxu0 %vm1049_vm1, %v2536_v58  ;;  %v5079_v58 = vld [vmem:[%s6056_s30 + $0x38] sm:$0xff] }
 0xc4f   : > { %2925 = vmatpush.msra.mxu2 %v5079_v58 }
 0xc56   : > { %5070 = vmatmul.msk.f32.vlgmr.msra.gmra.mxu0 %vm1286_vm15, %v2609_v46 }
 0xc5e   : > { %5071 = vmatmul.msk.f32.gmra.mxu0 %vm1286_vm15, %v2612_v9 }
 0xc66   : > { %5072 = vmatmul.msk.f32.gmra.mxu0 %vm1286_vm15, %v2615_v51 }
 0xc6e   : > { %5073 = vmatmul.msk.f32.gmra.mxu0 %vm1286_vm15, %v2618_v55 }
 0xcb3   : > { %v2566_v57 = vpop.f32.mrf.mxu0 }
 0xcb4   : > { %5084 = vmatmul.msk.f32.vlgmr.msra.gmra.mxu3 %vm1286_vm15, %v2566_v57 }
 0xcbb   : > { %v2569_v59 = vpop.f32.mrf.mxu0 }
 0xcbc   : > { %5085 = vmatmul.msk.f32.gmra.mxu3 %vm1286_vm15, %v2569_v59 }
 0xcc3   : > { %v2572_v60 = vpop.f32.mrf.mxu0 }
 0xcc4   : > { %5086 = vmatmul.msk.f32.gmra.mxu3 %vm1286_vm15, %v2572_v60 }
 0xccb   : > { %v2575_v30 = vpop.f32.mrf.mxu0 }
 0xccc   : > { %5087 = vmatmul.msk.f32.gmra.mxu3 %vm1286_vm15, %v2575_v30 }
 0xcd3   : > { %v2739_v63 = vpop.f32.mrf.mxu0 }
 0xcd4   : > { %v2751_v2 = vmul.f32 0.25, %v2739_v63 }
 0xcd6   : > { %v2755_v4 = vadd.f32 %v6398_v38, %v2751_v2 }
 0xcd8   : > { %v2759_v6 = vsel %vm1049_vm1, %v2755_v4, -inf }
 0xcd9   : > { %2760 = vmax.xlane.f32.xlu1 %v2759_v6 }
 0xcdb   : > { %v2742_v1 = vpop.f32.mrf.mxu0 }
 0xcdc   : > { %v2752_v45 = vmul.f32 0.25, %v2742_v1 }
 0xcde   : > { %v2756_v11 = vadd.f32 %v6405_v49, %v2752_v45 }
 0xce0   : > { %v2762_v7 = vsel %vm1049_vm1, %v2756_v11, -inf }
 0xce1   : > { %2763 = vmax.xlane.f32.xlu2 %v2762_v7 }
 0xce3   : > { %v2745_v3 = vpop.f32.mrf.mxu0 }
 0xce4   : > { %v2753_v0 = vmul.f32 0.25, %v2745_v3 }
 0xce6   : > { %v2757_v53 = vadd.f32 %v6412_v13, %v2753_v0 }
 0xce8   : > { %v2765_v12 = vsel %vm1049_vm1, %v2757_v53, -inf }
 0xce9   : > { %2766 = vmax.xlane.f32.xlu0 %v2765_v12 }
 0xceb   : > { %v2748_v14 = vpop.f32.mrf.mxu0 }
 0xcec   : > { %v2754_v17 = vmul.f32 0.25, %v2748_v14 }
 0xcee   : > { %v2758_v38 = vadd.f32 %v6419_v20, %v2754_v17 }
 0xcf0   : > { %v2768_v18 = vsel %vm1049_vm1, %v2758_v38, -inf }
 0xcf1   : > { %2769 = vmax.xlane.f32.xlu1 %v2768_v18 }
 0xd4c   : > { %v2761_v56 = vpop.xlane.xlu1 %2760 }
 0xd4d   : > { %v2771_v22 = vsub.f32 %v2755_v4, %v2761_v56 }
 0xd4f   : > { %v2775_v49 = vmul.f32 1.442695, %v2771_v22 }
 0xd51   : > { %5434 = vpow2.f32 %v2775_v49 }
 0xd54   : > { %v2764_v62 = vpop.xlane.xlu2 %2763 }
 0xd55   : > { %v2772_v23 = vsub.f32 %v2756_v11, %v2764_v62 }
 0xd57   : > { %v5435_v5 = vpop.eup %5434  ;;  %v2777_v24 = vmul.f32 1.442695, %v2772_v23 }
 0xd58   : > { %v2783_v13 = vsel %vm1049_vm1, %v5435_v5, 0.0 }
 0xd59   : > { %5436 = vpow2.f32 %v2777_v24  ;;  %2784 = vadd.xlane.f32.xlu2 %v2783_v13 }
 0xd5c   : > { %v2767_v16 = vpop.xlane.xlu0 %2766 }
 0xd5d   : > { %v2773_v25 = vsub.f32 %v2757_v53, %v2767_v16 }
 0xd5f   : > { %v5437_v28 = vpop.eup %5436  ;;  %v2779_v29 = vmul.f32 1.442695, %v2773_v25 }
 0xd60   : > { %v2786_v20 = vsel %vm1049_vm1, %v5437_v28, 0.0 }
 0xd61   : > { %5438 = vpow2.f32 %v2779_v29  ;;  %2787 = vadd.xlane.f32.xlu0 %v2786_v20 }
 0xd64   : > { %v2770_v31 = vpop.xlane.xlu1 %2769 }
 0xd65   : > { %v2774_v19 = vsub.f32 %v2758_v38, %v2770_v31 }
 0xd67   : > { %v6461_v8 = vpop.eup %5438  ;;  %v2781_v32 = vmul.f32 1.442695, %v2774_v19 }
 0xd68   : > { %v2789_v33 = vsel %vm1049_vm1, %v6461_v8, 0.0 }
 0xd69   : > { %5440 = vpow2.f32 %v2781_v32  ;;  %2790 = vadd.xlane.f32.xlu1 %v2789_v33 }
 0xd6f   : > { %v6465_v34 = vpop.eup %5440 }
 0xd70   : > { %v2792_v26 = vsel %vm1049_vm1, %v6465_v34, 0.0 }
 0xd71   : > { %2793 = vadd.xlane.f32.xlu2 %v2792_v26 }
 0xdcc   : > { %v2785_v15 = vpop.xlane.xlu2 %2784 }
 0xdcd   : > { %5442 = vrcp.f32 %v2785_v15  ;;  %v2806_v52 = vand.u32 2147483648, %v2785_v15  ;;  %v2804_v42 = vand.u32 2147483647, %v2785_v15  ;;  %vm2800_vm4 = vweird.f32 %v2785_v15 }
 0xdcf   : > { %v2807_v46 = vor.u32 1.1754944e-38, %v2806_v52  ;;  %vm2805_vm6 = vcmp.eq.f32.partialorder %v2804_v42, 8.507059e+37 }
 0xdd3   : > { %v5443_v35 = vpop.eup %5442 }
 0xdd4   : > { %v2796_v37 = vmul.f32 %v5443_v35, %v2785_v15  ;;  %v2788_v27 = vpop.xlane.xlu0 %2787  ;;  %vm2801_vm3 = vweird.f32 %v5443_v35 }
 0xdd5   : > { %5444 = vrcp.f32 %v2788_v27  ;;  %vm2802_vm5 = vmor %vm2800_vm4, %vm2801_vm3  ;;  %v2821_v57 = vand.u32 2147483648, %v2788_v27  ;;  %v2819_v59 = vand.u32 2147483647, %v2788_v27  ;;  %vm2815_vm8 = vweird.f32 %v2788_v27 }
 0xdd6   : > { %v2797_v39 = vsub.f32 1.0, %v2796_v37 }
 0xdd7   : > { %v2822_v63 = vor.u32 1.1754944e-38, %v2821_v57  ;;  %vm2820_vm10 = vcmp.eq.f32.partialorder %v2819_v59, 8.507059e+37 }
 0xdd8   : > { %v2798_v41 = vmul.f32 %v5443_v35, %v2797_v39 }
 0xdda   : > { %v2799_v43 = vadd.f32 %v5443_v35, %v2798_v41 }
 0xddb   : > { %v5445_v44 = vpop.eup %5444 }
 0xddc   : > { %v2803_v47 = vsel %vm2802_vm5, %v5443_v35, %v2799_v43  ;;  %v2811_v9 = vmul.f32 %v5445_v44, %v2788_v27  ;;  %v2791_v50 = vpop.xlane.xlu1 %2790  ;;  %vm2816_vm7 = vweird.f32 %v5445_v44 }
 0xddd   : > { %v2808_v51 = vsel %vm2805_vm6, %v2807_v46, %v2803_v47  ;;  %5446 = vrcp.f32 %v2791_v50  ;;  %vm2817_vm9 = vmor %vm2815_vm8, %vm2816_vm7  ;;  %v2836_v11 = vand.u32 2147483648, %v2791_v50  ;;  %v2834_v0 = vand.u32 2147483647, %v2791_v50 }
 0xdde   : > { %v2812_v54 = vsub.f32 1.0, %v2811_v9  ;;  %v2809_v55 = vmul.f32 %v5435_v5, %v2808_v51  ;;  %vm2830_vm12 = vweird.f32 %v2791_v50 }
 0xddf   : > { %v2837_v14 = vor.u32 1.1754944e-38, %v2836_v11  ;;  %vm2835_vm14 = vcmp.eq.f32.partialorder %v2834_v0, 8.507059e+37 }
 0xde0   : > { %v2813_v48 = vmul.f32 %v5445_v44, %v2812_v54  ;;  %5074 = vmatmul.msk.f32.vlgmr.msra.gmra.mxu1 %vm1049_vm1, %v2809_v55 }
 0xde2   : > { %v2814_v60 = vadd.f32 %v5445_v44, %v2813_v48 }
 0xde3   : > { %v5447_v30 = vpop.eup %5446 }
 0xde4   : > { %v2826_v2 = vmul.f32 %v5447_v30, %v2791_v50  ;;  %v2794_v4 = vpop.xlane.xlu2 %2793  ;;  %v2818_v6 = vsel %vm2817_vm9, %v5445_v44, %v2814_v60  ;;  %vm2831_vm11 = vweird.f32 %v5447_v30 }
 0xde5   : > { %5448 = vrcp.f32 %v2794_v4  ;;  %v2823_v45 = vsel %vm2820_vm10, %v2822_v63, %v2818_v6  ;;  %vm2832_vm13 = vmor %vm2830_vm12, %vm2831_vm11  ;;  %v2851_v49 = vand.u32 2147483648, %v2794_v4  ;;  %v2849_v23 = vand.u32 2147483647, %v2794_v4 }
 0xde6   : > { %v2827_v1 = vsub.f32 1.0, %v2826_v2  ;;  %v2824_v7 = vmul.f32 %v5437_v28, %v2823_v45  ;;  %vm2845_vm2 = vweird.f32 %v2794_v4  ;;  %v5078_v28 = vld [vmem:[%s6056_s30 + $0x30] sm:$0xff] }
 0xde7   : > { %v2852_v24 = vor.u32 1.1754944e-38, %v2851_v49  ;;  %vm2850_vm4 = vcmp.eq.f32.partialorder %v2849_v23, 8.507059e+37  ;;  %2926 = vmatpush.msra.mxu2 %v5078_v28 }
 0xde8   : > { %v2828_v3 = vmul.f32 %v5447_v30, %v2827_v1  ;;  %5075 = vmatmul.msk.f32.gmra.mxu1 %vm1049_vm1, %v2824_v7 }
 0xdea   : > { %v2829_v53 = vadd.f32 %v5447_v30, %v2828_v3 }
 0xdeb   : > { %v5449_v12 = vpop.eup %5448 }
 0xdec   : > { %v2841_v17 = vmul.f32 %v5449_v12, %v2794_v4  ;;  %v2833_v38 = vsel %vm2832_vm13, %v5447_v30, %v2829_v53  ;;  %vm2846_vm0 = vweird.f32 %v5449_v12 }
 0xded   : > { %v2838_v18 = vsel %vm2835_vm14, %v2837_v14, %v2833_v38  ;;  %vm2847_vm3 = vmor %vm2845_vm2, %vm2846_vm0  ;;  %v5093_v38 = vld [vmem:[%s6179_s9 + $0x30] sm:$0xff] }
 0xdee   : > { %v2842_v56 = vsub.f32 1.0, %v2841_v17  ;;  %v2839_v22 = vmul.f32 %v6461_v8, %v2838_v18  ;;  %v2969_v8 = vpop.f32.mrf.mxu3  ;;  %v5094_v17 = vld [vmem:[%s6179_s9 + $0x38] sm:$0xff]  ;;  %v5092_v18 = vld [vmem:[%s6179_s9 + $0x28] sm:$0xff] }
 0xdef   : > { %3134 = vmatpush.msrb.mxu0 %v5094_v17 }
 0xdf0   : > { %v2843_v62 = vmul.f32 %v5449_v12, %v2842_v56  ;;  %5076 = vmatmul.msk.f32.gmra.mxu1 %vm1049_vm1, %v2839_v22  ;;  %v5091_v56 = vld [vmem:[%s6179_s9 + $0x20] sm:$0xff] }
 0xdf1   : > { %3135 = vmatpush.msrb.mxu0 %v5093_v38 }
 0xdf2   : > { %v2844_v5 = vadd.f32 %v5449_v12, %v2843_v62 }
 0xdf3   : > { %3136 = vmatpush.msrb.mxu0 %v5092_v18 }
 0xdf4   : > { %v2848_v13 = vsel %vm2847_vm3, %v5449_v12, %v2844_v5 }
 0xdf5   : > { %v2853_v16 = vsel %vm2850_vm4, %v2852_v24, %v2848_v13  ;;  %3137 = vmatpush.msrb.mxu0 %v5091_v56  ;;  %v5112_v56 = vld [vmem:[%s6192_s0 + $0xe0] sm:$0xff] }
 0xdf6   : > { %v2854_v25 = vmul.f32 %v6465_v34, %v2853_v16  ;;  %v5334_v34 = vld [vmem:[%s6102_s21 + $0x1] ss:$0 sm:$0xff]  ;;  %v2972_v15 = vpop.f32.mrf.mxu3 }
 0xdf8   : > { %5077 = vmatmul.msk.f32.gmra.mxu1 %vm1049_vm1, %v2854_v25 }
 0xdfe   : > { %v2975_v42 = vpop.f32.mrf.mxu3 }
 0xe06   : > { %v2978_v9 = vpop.f32.mrf.mxu3 }
 0xe5d   : > { %v2884_v29 = vpop.f32.mrf.mxu1 }
 0xe5e   : > { %5080 = vmatmul.msk.f32.vlgmr.msra.gmra.mxu2 %vm1286_vm15, %v2884_v29 }
 0xe65   : > { %v2887_v20 = vpop.f32.mrf.mxu1 }
 0xe66   : > { %5081 = vmatmul.msk.f32.gmra.mxu2 %vm1286_vm15, %v2887_v20 }
 0xe6d   : > { %v2890_v31 = vpop.f32.mrf.mxu1 }
 0xe6e   : > { %5082 = vmatmul.msk.f32.gmra.mxu2 %vm1286_vm15, %v2890_v31 }
 0xe75   : > { %v2893_v19 = vpop.f32.mrf.mxu1 }
 0xe76   : > { %5083 = vmatmul.msk.f32.gmra.mxu2 %vm1286_vm15, %v2893_v19 }
 0xee1   : > { %v2928_v32 = vpop.f32.mrf.mxu2 }
 0xee2   : > { %v2970_v33 = vadd.f32 %v2969_v8, %v2928_v32 }
 0xee4   : > { %v2981_v26 = vadd.f32 %v2970_v33, %v6230_v21  ;;  %v5335_v33 = vld [vmem:[%s6128_s5 + $0x1] ss:$0 sm:$0xff] }
 0xee6   : > { %v6483_v35 = vadd.f32 %v5334_v34, %v2981_v26 }
 0xee8   : > { %v2998_v37 = vsel %vm1049_vm1, %v6483_v35, 0.0 }
 0xee9   : > { %2999 = vadd.xlane.f32.xlu0 %v2998_v37  ;;  %v2931_v27 = vpop.f32.mrf.mxu2  ;;  %v5114_v37 = vld [vmem:[%s6192_s0 + $0xf0] sm:$0xff] }
 0xeea   : > { %v2973_v39 = vadd.f32 %v2972_v15, %v2931_v27  ;;  %v5115_v15 = vld [vmem:[%s6192_s0 + $0xf8] sm:$0xff]  ;;  %v5336_v27 = vld [vmem:[%s6156_s29 + $0x1] ss:$0 sm:$0xff] }
 0xeeb   : > { %3204 = vmatpush.msrb.mxu1 %v5115_v15 }
 0xeec   : > { %v2982_v52 = vadd.f32 %v2973_v39, %v6235_v36 }
 0xeed   : > { %3205 = vmatpush.msrb.mxu1 %v5114_v37 }
 0xeee   : > { %v6488_v41 = vadd.f32 %v5334_v34, %v2982_v52 }
 0xef0   : > { %v3001_v58 = vsel %vm1049_vm1, %v6488_v41, 0.0 }
 0xef1   : > { %3002 = vadd.xlane.f32.xlu1 %v3001_v58  ;;  %v2934_v43 = vpop.f32.mrf.mxu2 }
 0xef2   : > { %v2976_v21 = vadd.f32 %v2975_v42, %v2934_v43  ;;  %v5113_v42 = vld [vmem:[%s6192_s0 + $0xe8] sm:$0xff] }
 0xef3   : > { %3206 = vmatpush.msrb.mxu1 %v5113_v42 }
 0xef4   : > { %v2983_v44 = vadd.f32 %v2976_v21, %v6240_v40 }
 0xef5   : > { %3207 = vmatpush.msrb.mxu1 %v5112_v56 }
 0xef6   : > { %v6493_v46 = vadd.f32 %v5334_v34, %v2983_v44 }
 0xef8   : > { %v3004_v47 = vsel %vm1049_vm1, %v6493_v46, 0.0 }
 0xef9   : > { %3005 = vadd.xlane.f32.xlu2 %v3004_v47  ;;  %v2937_v50 = vpop.f32.mrf.mxu2 }
 0xefa   : > { %v2979_v36 = vadd.f32 %v2978_v9, %v2937_v50 }
 0xefc   : > { %v2984_v51 = vadd.f32 %v2979_v36, %v6245_v10 }
 0xefe   : > { %v6498_v54 = vadd.f32 %v5334_v34, %v2984_v51 }
 0xf00   : > { %v3007_v55 = vsel %vm1049_vm1, %v6498_v54, 0.0 }
 0xf01   : > { %3008 = vadd.xlane.f32.xlu0 %v3007_v55 }
 0xf5c   : > { %v3000_v48 = vpop.xlane.xlu0 %2999 }
 0xf5d   : > { %v3010_v40 = vmul.f32 %v3000_v48, %v5853_v61 }
 0xf5f   : > { %v3014_v57 = vsub.f32 %v6483_v35, %v3010_v40 }
 0xf61   : > { %v3018_v59 = vmul.f32 %v3014_v57, %v3014_v57 }
 0xf63   : > { %v3022_v60 = vsel %vm1049_vm1, %v3018_v59, 0.0 }
 0xf64   : > { %3023 = vadd.xlane.f32.xlu1 %v3022_v60  ;;  %v3003_v30 = vpop.xlane.xlu1 %3002 }
 0xf65   : > { %v3011_v63 = vmul.f32 %v3003_v30, %v5853_v61 }
 0xf67   : > { %v6507_v10 = vsub.f32 %v6488_v41, %v3011_v63 }
 0xf69   : > { %v3019_v2 = vmul.f32 %v6507_v10, %v6507_v10 }
 0xf6b   : > { %v3025_v4 = vsel %vm1049_vm1, %v3019_v2, 0.0 }
 0xf6c   : > { %v3006_v6 = vpop.xlane.xlu2 %3005  ;;  %3026 = vadd.xlane.f32.xlu2 %v3025_v4 }
 0xf6d   : > { %v3012_v1 = vmul.f32 %v3006_v6, %v5853_v61 }
 0xf6f   : > { %v6514_v45 = vsub.f32 %v6493_v46, %v3012_v1 }
 0xf71   : > { %v3020_v11 = vmul.f32 %v6514_v45, %v6514_v45 }
 0xf73   : > { %v3028_v7 = vsel %vm1049_vm1, %v3020_v11, 0.0 }
 0xf74   : > { %3029 = vadd.xlane.f32.xlu0 %v3028_v7  ;;  %v3009_v3 = vpop.xlane.xlu0 %3008 }
 0xf75   : > { %v3013_v0 = vmul.f32 %v3009_v3, %v5853_v61 }
 0xf77   : > { %v6521_v53 = vsub.f32 %v6498_v54, %v3013_v0 }
 0xf79   : > { %v3021_v12 = vmul.f32 %v6521_v53, %v6521_v53 }
 0xf7b   : > { %v3031_v14 = vsel %vm1049_vm1, %v3021_v12, 0.0 }
 0xf7c   : > { %3032 = vadd.xlane.f32.xlu1 %v3031_v14 }
 0xfd7   : > { %v3024_v22 = vpop.xlane.xlu1 %3023 }
 0xfd8   : > { %v3034_v49 = vmul.f32 %v3024_v22, %v5853_v61  ;;  %v5111_v22 = vld [vmem:[%s6192_s0 + $0xd8] sm:$0xff] }
 0xfd9   : > { %3208 = vmatpush.msrb.mxu1 %v5111_v22 }
 0xfda   : > { %v3038_v62 = vadd.f32 1e-05, %v3034_v49  ;;  %v5110_v49 = vld [vmem:[%s6192_s0 + $0xd0] sm:$0xff] }
 0xfdb   : > { %3209 = vmatpush.msrb.mxu1 %v5110_v49 }
 0xfdc   : > { %5450 = vrsqrt.f32 %v3038_v62  ;;  %vm3048_vm6 = vweird.f32 %v3038_v62 }
 0xfdf   : > { %v3027_v23 = vpop.xlane.xlu2 %3026 }
 0xfe0   : > { %v3035_v5 = vmul.f32 %v3027_v23, %v5853_v61  ;;  %v5108_v23 = vld [vmem:[%s6192_s0 + $0xc0] sm:$0xff] }
 0xfe2   : > { %v5451_v24 = vpop.eup %5450  ;;  %v3039_v16 = vadd.f32 1e-05, %v3035_v5  ;;  %v5106_v5 = vld [vmem:[%s6192_s0 + $0xb0] sm:$0xff] }
 0xfe3   : > { %v3043_v13 = vmul.f32 %v5451_v24, %v3038_v62  ;;  %vm3049_vm5 = vweird.f32 %v5451_v24  ;;  %v5109_v62 = vld [vmem:[%s6192_s0 + $0xc8] sm:$0xff] }
 0xfe4   : > { %5452 = vrsqrt.f32 %v3039_v16  ;;  %vm3050_vm7 = vmor %vm3048_vm6, %vm3049_vm5  ;;  %vm3058_vm9 = vweird.f32 %v3039_v16  ;;  %3210 = vmatpush.msrb.mxu1 %v5109_v62 }
 0xfe5   : > { %v3044_v25 = vmul.f32 %v5451_v24, %v3043_v13  ;;  %v5104_v13 = vld [vmem:[%s6192_s0 + $0xa0] sm:$0xff] }
 0xfe6   : > { %3211 = vmatpush.msrb.mxu1 %v5108_v23 }
 0xfe7   : > { %v3045_v28 = vmul.f32 0.5, %v3044_v25  ;;  %v3030_v29 = vpop.xlane.xlu0 %3029  ;;  %v5102_v25 = vld [vmem:[%s6192_s0 + $0x90] sm:$0xff] }
 0xfe8   : > { %v3036_v31 = vmul.f32 %v3030_v29, %v5853_v61  ;;  %v5100_v29 = vld [vmem:[%s6192_s0 + $0x80] sm:$0xff] }
 0xfe9   : > { %v3046_v20 = vsub.f32 1.5, %v3045_v28  ;;  %v5101_v28 = vld [vmem:[%s6192_s0 + $0x88] sm:$0xff] }
 0xfea   : > { %v5453_v19 = vpop.eup %5452  ;;  %v3040_v32 = vadd.f32 1e-05, %v3036_v31 }
 0xfeb   : > { %v3047_v8 = vmul.f32 %v5451_v24, %v3046_v20  ;;  %v3053_v34 = vmul.f32 %v5453_v19, %v3039_v16  ;;  %vm3059_vm8 = vweird.f32 %v5453_v19  ;;  %v5103_v16 = vld [vmem:[%s6192_s0 + $0x98] sm:$0xff]  ;;  %v5337_v20 = vld [vmem:[%s6172_s22 + $0x1] ss:$0 sm:$0xff] }
 0xfec   : > { %5454 = vrsqrt.f32 %v3040_v32  ;;  %vm3060_vm10 = vmor %vm3058_vm9, %vm3059_vm8  ;;  %vm3068_vm12 = vweird.f32 %v3040_v32 }
 0xfed   : > { %v3051_v26 = vsel %vm3050_vm7, %v5451_v24, %v3047_v8  ;;  %v3054_v52 = vmul.f32 %v5453_v19, %v3053_v34  ;;  %v5105_v24 = vld [vmem:[%s6192_s0 + $0xa8] sm:$0xff] }
 0xfee   : > { %v3082_v39 = vmul.f32 %v3051_v26, %v3014_v57 }
 0xfef   : > { %v3055_v43 = vmul.f32 0.5, %v3054_v52  ;;  %v3033_v21 = vpop.xlane.xlu1 %3032 }
 0xff0   : > { %v3089_v58 = vmul.f32 %v5335_v33, %v3082_v39  ;;  %v3037_v44 = vmul.f32 %v3033_v21, %v5853_v61 }
 0xff1   : > { %v3056_v9 = vsub.f32 1.5, %v3055_v43 }
 0xff2   : > { %v3096_v47 = vadd.f32 %v5336_v27, %v3089_v58  ;;  %v5455_v50 = vpop.eup %5454  ;;  %v3041_v36 = vadd.f32 1e-05, %v3037_v44 }
 0xff3   : > { %v3057_v51 = vmul.f32 %v5453_v19, %v3056_v9  ;;  %v3063_v55 = vmul.f32 %v5455_v50, %v3040_v32  ;;  %vm3069_vm11 = vweird.f32 %v5455_v50 }
 0xff4   : > { %5096 = vmatmul.msk.f32.vlgmr.msrb.gmra.mxu0 %vm1049_vm1, %v3096_v47  ;;  %5456 = vrsqrt.f32 %v3041_v36  ;;  %vm3070_vm13 = vmor %vm3068_vm12, %vm3069_vm11  ;;  %vm3078_vm0 = vweird.f32 %v3041_v36 }
 0xff5   : > { %v3061_v48 = vsel %vm3060_vm10, %v5453_v19, %v3057_v51  ;;  %v3064_v40 = vmul.f32 %v5455_v50, %v3063_v55 }
 0xff6   : > { %v3083_v57 = vmul.f32 %v3061_v48, %v6507_v10 }
 0xff7   : > { %v3065_v59 = vmul.f32 0.5, %v3064_v40 }
 0xff8   : > { %v3090_v60 = vmul.f32 %v5335_v33, %v3083_v57 }
 0xff9   : > { %v3066_v30 = vsub.f32 1.5, %v3065_v59 }
 0xffa   : > { %v5457_v63 = vpop.eup %5456  ;;  %v3097_v2 = vadd.f32 %v5336_v27, %v3090_v60 }
 0xffb   : > { %v3067_v4 = vmul.f32 %v5455_v50, %v3066_v30  ;;  %v3073_v6 = vmul.f32 %v5457_v63, %v3041_v36  ;;  %vm3079_vm14 = vweird.f32 %v5457_v63 }
 0xffc   : > { %5097 = vmatmul.msk.f32.gmra.mxu0 %vm1049_vm1, %v3097_v2  ;;  %vm3080_vm2 = vmor %vm3078_vm0, %vm3079_vm14 }
 0xffd   : > { %v3071_v1 = vsel %vm3070_vm13, %v5455_v50, %v3067_v4  ;;  %v3074_v11 = vmul.f32 %v5457_v63, %v3073_v6 }
 0xffe   : > { %v3084_v7 = vmul.f32 %v3071_v1, %v6514_v45 }
 0xfff   : > { %v3075_v3 = vmul.f32 0.5, %v3074_v11 }
0x1000   : > { %v3091_v10 = vmul.f32 %v5335_v33, %v3084_v7 }
0x1001   : > { %v3076_v0 = vsub.f32 1.5, %v3075_v3 }
0x1002   : > { %v3098_v12 = vadd.f32 %v5336_v27, %v3091_v10 }
0x1003   : > { %v3077_v14 = vmul.f32 %v5457_v63, %v3076_v0 }
0x1004   : > { %5098 = vmatmul.msk.f32.gmra.mxu0 %vm1049_vm1, %v3098_v12 }
0x1005   : > { %v3081_v17 = vsel %vm3080_vm2, %v5457_v63, %v3077_v14 }
0x1006   : > { %v3085_v38 = vmul.f32 %v3081_v17, %v6521_v53  ;;  %v5107_v53 = vld [vmem:[%s6192_s0 + $0xb8] sm:$0xff] }
0x1007   : > { %3212 = vmatpush.msrb.mxu1 %v5107_v53 }
0x1008   : > { %v3092_v45 = vmul.f32 %v5335_v33, %v3085_v38 }
0x1009   : > { %3213 = vmatpush.msrb.mxu1 %v5106_v5 }
0x100a   : > { %v3099_v18 = vadd.f32 %v5336_v27, %v3092_v45 }
0x100b   : > { %3214 = vmatpush.msrb.mxu1 %v5105_v24 }
0x100c   : > { %5099 = vmatmul.msk.f32.gmra.mxu0 %vm1049_vm1, %v3099_v18  ;;  %v5338_v18 = vld [vmem:[%s6212_s24 + $0x1] ss:$0 sm:$0xff] }
0x100d   : > { %3215 = vmatpush.msrb.mxu1 %v5104_v13 }
0x100f   : > { %3216 = vmatpush.msrb.mxu1 %v5103_v16 }
0x1011   : > { %3217 = vmatpush.msrb.mxu1 %v5102_v25 }
0x1013   : > { %3218 = vmatpush.msrb.mxu1 %v5101_v28 }
0x1015   : > { %3219 = vmatpush.msrb.mxu1 %v5100_v29 }
0x1071   : > { %v3139_v31 = vpop.f32.mrf.mxu0 }
0x1072   : > { %v3140_v19 = vadd.f32 %v5337_v20, %v3139_v31 }
0x1074   : > { %v3151_v8 = vmul.f32 %v3140_v19, %v3140_v19 }
0x1076   : > { %v3155_v32 = vmul.f32 %v3151_v8, %v3140_v19 }
0x1078   : > { %v3159_v33 = vmul.f32 0.044715, %v3155_v32 }
0x1079   : > { %v3142_v26 = vpop.f32.mrf.mxu0 }
0x107a   : > { %v3163_v34 = vadd.f32 %v3159_v33, %v3140_v19  ;;  %v3143_v15 = vadd.f32 %v5337_v20, %v3142_v26 }
0x107c   : > { %v3167_v37 = vmul.f32 0.7978846, %v3163_v34  ;;  %v3152_v27 = vmul.f32 %v3143_v15, %v3143_v15 }
0x107e   : > { %5458 = vtanh.f32 %v3167_v37  ;;  %v3156_v39 = vmul.f32 %v3152_v27, %v3143_v15 }
0x1080   : > { %v3160_v52 = vmul.f32 0.044715, %v3156_v39 }
0x1081   : > { %v3145_v42 = vpop.f32.mrf.mxu0 }
0x1082   : > { %v3164_v58 = vadd.f32 %v3160_v52, %v3143_v15  ;;  %v3146_v43 = vadd.f32 %v5337_v20, %v3145_v42 }
0x1084   : > { %v5459_v21 = vpop.eup %5458  ;;  %v3153_v47 = vmul.f32 %v3146_v43, %v3146_v43  ;;  %v3168_v9 = vmul.f32 0.7978846, %v3164_v58 }
0x1085   : > { %v3175_v44 = vadd.f32 1.0, %v5459_v21 }
0x1086   : > { %v3157_v36 = vmul.f32 %v3153_v47, %v3146_v43  ;;  %5460 = vtanh.f32 %v3168_v9  ;;  %v5131_v9 = vld [vmem:[%s5893_s28 + $0x1d8] sm:$0xff] }
0x1087   : > { %v3179_v50 = vmul.f32 0.5, %v3175_v44  ;;  %3425 = vmatpush.msrb.mxu3 %v5131_v9 }
0x1088   : > { %v3161_v55 = vmul.f32 0.044715, %v3157_v36  ;;  %v5140_v36 = vld [vmem:[%s5893_s28 + $0x218] sm:$0xff] }
0x1089   : > { %v3183_v51 = vmul.f32 %v3179_v50, %v3140_v19  ;;  %v3148_v48 = vpop.f32.mrf.mxu0  ;;  %v5122_v50 = vld [vmem:[%s5893_s28 + $0x198] sm:$0xff]  ;;  %3464 = vmatpush.msra.mxu0 %v5140_v36 }
0x108a   : > { %v3165_v40 = vadd.f32 %v3161_v55, %v3146_v43  ;;  %v3149_v57 = vadd.f32 %v5337_v20, %v3148_v48  ;;  %3386 = vmatpush.msrb.mxu2 %v5122_v50  ;;  %v5121_v55 = vld [vmem:[%s5893_s28 + $0x190] sm:$0xff] }
0x108b   : > { %3220 = vmatmul.f32.vlgmr.msrb.gmra.mxu1 %v3183_v51  ;;  %v5130_v51 = vld [vmem:[%s5893_s28 + $0x1d0] sm:$0xff] }
0x108c   : > { %v5461_v59 = vpop.eup %5460  ;;  %v3154_v60 = vmul.f32 %v3149_v57, %v3149_v57  ;;  %v3169_v30 = vmul.f32 0.7978846, %v3165_v40  ;;  %v5139_v48 = vld [vmem:[%s5893_s28 + $0x210] sm:$0xff]  ;;  %3426 = vmatpush.msrb.mxu3 %v5130_v51  ;;  %3387 = vmatpush.msrb.mxu2 %v5121_v55  ;;  %v5120_v40 = vld [vmem:[%s5893_s28 + $0x188] sm:$0xff] }
0x108d   : > { %v3176_v63 = vadd.f32 1.0, %v5461_v59  ;;  %3465 = vmatpush.msra.mxu0 %v5139_v48  ;;  %v5138_v59 = vld [vmem:[%s5893_s28 + $0x208] sm:$0xff] }
0x108e   : > { %v3158_v2 = vmul.f32 %v3154_v60, %v3149_v57  ;;  %5462 = vtanh.f32 %v3169_v30  ;;  %3388 = vmatpush.msrb.mxu2 %v5120_v40  ;;  %v5119_v60 = vld [vmem:[%s5893_s28 + $0x180] sm:$0xff] }
0x108f   : > { %v3180_v4 = vmul.f32 0.5, %v3176_v63  ;;  %3466 = vmatpush.msra.mxu0 %v5138_v59  ;;  %v5128_v30 = vld [vmem:[%s5893_s28 + $0x1c0] sm:$0xff] }
0x1090   : > { %v3162_v6 = vmul.f32 0.044715, %v3158_v2  ;;  %v5137_v63 = vld [vmem:[%s5893_s28 + $0x200] sm:$0xff]  ;;  %3389 = vmatpush.msrb.mxu2 %v5119_v60 }
0x1091   : > { %v3184_v1 = vmul.f32 %v3180_v4, %v3143_v15  ;;  %3467 = vmatpush.msra.mxu0 %v5137_v63 }
0x1092   : > { %v3166_v11 = vadd.f32 %v3162_v6, %v3149_v57 }
0x1093   : > { %3223 = vmatmul.f32.gmra.mxu1 %v3184_v1 }
0x1094   : > { %v5463_v7 = vpop.eup %5462  ;;  %v3170_v3 = vmul.f32 0.7978846, %v3166_v11 }
0x1095   : > { %v3177_v10 = vadd.f32 1.0, %v5463_v7 }
0x1096   : > { %5464 = vtanh.f32 %v3170_v3 }
0x1097   : > { %v3181_v0 = vmul.f32 0.5, %v3177_v10 }
0x1099   : > { %v3185_v12 = vmul.f32 %v3181_v0, %v3146_v43 }
0x109b   : > { %3226 = vmatmul.f32.gmra.mxu1 %v3185_v12 }
0x109c   : > { %v5465_v14 = vpop.eup %5464 }
0x109d   : > { %v3178_v17 = vadd.f32 1.0, %v5465_v14 }
0x109f   : > { %v3182_v38 = vmul.f32 0.5, %v3178_v17 }
0x10a1   : > { %v3186_v45 = vmul.f32 %v3182_v38, %v3149_v57  ;;  %v5129_v57 = vld [vmem:[%s5893_s28 + $0x1c8] sm:$0xff] }
0x10a2   : > { %3427 = vmatpush.msrb.mxu3 %v5129_v57 }
0x10a3   : > { %3229 = vmatmul.f32.gmra.mxu1 %v3186_v45 }
0x10a4   : > { %3428 = vmatpush.msrb.mxu3 %v5128_v30 }
0x1108   : > { %v3221_v56 = vpop.f32.mrf.mxu1 }
0x1109   : > { %v3233_v22 = vadd.f32 %v3221_v56, %v6483_v35 }
0x110b   : > { %v6562_v49 = vadd.f32 %v5338_v18, %v3233_v22  ;;  %v6625_v22 = vld [vmem:[%s5843_s23 + $0x2] ss:$0 sm:$0xff] }
0x110d   : > { %v3250_v62 = vsel %vm1049_vm1, %v6562_v49, 0.0 }
0x110e   : > { %3251 = vadd.xlane.f32.xlu2 %v3250_v62 }
0x1110   : > { %v3224_v23 = vpop.f32.mrf.mxu1 }
0x1111   : > { %v3234_v53 = vadd.f32 %v3224_v23, %v6488_v41  ;;  %v6628_v23 = vld [vmem:[%s5849_s4 + $0x2] ss:$0 sm:$0xff] }
0x1113   : > { %v6567_v5 = vadd.f32 %v5338_v18, %v3234_v53 }
0x1115   : > { %v3253_v24 = vsel %vm1049_vm1, %v6567_v5, 0.0 }
0x1116   : > { %3254 = vadd.xlane.f32.xlu0 %v3253_v24 }
0x1118   : > { %v3227_v13 = vpop.f32.mrf.mxu1 }
0x1119   : > { %v3235_v16 = vadd.f32 %v3227_v13, %v6493_v46 }
0x111b   : > { %v6572_v25 = vadd.f32 %v5338_v18, %v3235_v16  ;;  %v5163_v16 = vld [vmem:[%s5893_s28 + $0x1b8] sm:$0xff] }
0x111c   : > { %3704 = vmatpush.msra.mxu3 %v5163_v16 }
0x111d   : > { %v3256_v35 = vsel %vm1049_vm1, %v6572_v25, 0.0 }
0x111e   : > { %3257 = vadd.xlane.f32.xlu1 %v3256_v35  ;;  %v5172_v35 = vld [vmem:[%s5893_s28 + $0x1f8] sm:$0xff] }
0x111f   : > { %3743 = vmatpush.msrb.mxu0 %v5172_v35 }
0x1120   : > { %v3230_v28 = vpop.f32.mrf.mxu1 }
0x1121   : > { %v3236_v29 = vadd.f32 %v3230_v28, %v6498_v54  ;;  %v5162_v28 = vld [vmem:[%s5893_s28 + $0x1b0] sm:$0xff] }
0x1122   : > { %3705 = vmatpush.msra.mxu3 %v5162_v28  ;;  %v5342_v28 = vld [vmem:[%s5887_s2 + $0xc] ss:$0 sm:$0xff] }
0x1123   : > { %v6577_v20 = vadd.f32 %v5338_v18, %v3236_v29  ;;  %v5171_v29 = vld [vmem:[%s5893_s28 + $0x1f0] sm:$0xff] }
0x1124   : > { %3744 = vmatpush.msrb.mxu0 %v5171_v29 }
0x1125   : > { %v3259_v41 = vsel %vm1049_vm1, %v6577_v20, 0.0 }
0x1126   : > { %3260 = vadd.xlane.f32.xlu2 %v3259_v41 }
0x1181   : > { %v3252_v31 = vpop.xlane.xlu2 %3251 }
0x1182   : > { %v3262_v19 = vmul.f32 %v3252_v31, %v5853_v61 }
0x1184   : > { %v6583_v46 = vsub.f32 %v6562_v49, %v3262_v19 }
0x1186   : > { %v3270_v8 = vmul.f32 %v6583_v46, %v6583_v46 }
0x1188   : > { %v3274_v32 = vsel %vm1049_vm1, %v3270_v8, 0.0  ;;  %v5161_v8 = vld [vmem:[%s5893_s28 + $0x1a8] sm:$0xff] }
0x1189   : > { %3275 = vadd.xlane.f32.xlu0 %v3274_v32  ;;  %v3255_v33 = vpop.xlane.xlu0 %3254  ;;  %v5170_v32 = vld [vmem:[%s5893_s28 + $0x1e8] sm:$0xff]  ;;  %3706 = vmatpush.msra.mxu3 %v5161_v8 }
0x118a   : > { %v3263_v54 = vmul.f32 %v3255_v33, %v5853_v61  ;;  %3745 = vmatpush.msrb.mxu0 %v5170_v32  ;;  %v5179_v32 = vld [vmem:[%s5893_s28 + $0x228] sm:$0xff] }
0x118c   : > { %v6590_v34 = vsub.f32 %v6567_v5, %v3263_v54 }
0x118e   : > { %v3271_v26 = vmul.f32 %v6590_v34, %v6590_v34 }
0x1190   : > { %v3277_v15 = vsel %vm1049_vm1, %v3271_v26, 0.0  ;;  %v5160_v26 = vld [vmem:[%s5893_s28 + $0x1a0] sm:$0xff] }
0x1191   : > { %3278 = vadd.xlane.f32.xlu1 %v3277_v15  ;;  %v3258_v37 = vpop.xlane.xlu1 %3257  ;;  %3707 = vmatpush.msra.mxu3 %v5160_v26 }
0x1192   : > { %v3264_v27 = vmul.f32 %v3258_v37, %v5853_v61 }
0x1194   : > { %v6597_v39 = vsub.f32 %v6572_v25, %v3264_v27  ;;  %v5169_v27 = vld [vmem:[%s5893_s28 + $0x1e0] sm:$0xff] }
0x1195   : > { %3746 = vmatpush.msrb.mxu0 %v5169_v27 }
0x1196   : > { %v3272_v52 = vmul.f32 %v6597_v39, %v6597_v39 }
0x1198   : > { %v3280_v42 = vsel %vm1049_vm1, %v3272_v52, 0.0 }
0x1199   : > { %v3261_v58 = vpop.xlane.xlu2 %3260  ;;  %3281 = vadd.xlane.f32.xlu2 %v3280_v42 }
0x119a   : > { %v3265_v43 = vmul.f32 %v3261_v58, %v5853_v61 }
0x119c   : > { %v6604_v21 = vsub.f32 %v6577_v20, %v3265_v43 }
0x119e   : > { %v3273_v44 = vmul.f32 %v6604_v21, %v6604_v21 }
0x11a0   : > { %v3283_v47 = vsel %vm1049_vm1, %v3273_v44, 0.0 }
0x11a1   : > { %3284 = vadd.xlane.f32.xlu0 %v3283_v47 }
0x11fc   : > { %v3276_v2 = vpop.xlane.xlu0 %3275 }
0x11fd   : > { %v3286_v4 = vmul.f32 %v3276_v2, %v5853_v61 }
0x11ff   : > { %v3290_v6 = vadd.f32 1e-05, %v3286_v4 }
0x1201   : > { %5466 = vrsqrt.f32 %v3290_v6  ;;  %vm3300_vm4 = vweird.f32 %v3290_v6 }
0x1204   : > { %v3279_v1 = vpop.xlane.xlu1 %3278 }
0x1205   : > { %v3287_v11 = vmul.f32 %v3279_v1, %v5853_v61 }
0x1207   : > { %v5467_v7 = vpop.eup %5466  ;;  %v3291_v10 = vadd.f32 1e-05, %v3287_v11 }
0x1208   : > { %v3295_v3 = vmul.f32 %v5467_v7, %v3290_v6  ;;  %vm3301_vm3 = vweird.f32 %v5467_v7 }
0x1209   : > { %5468 = vrsqrt.f32 %v3291_v10  ;;  %vm3302_vm5 = vmor %vm3300_vm4, %vm3301_vm3  ;;  %vm3310_vm7 = vweird.f32 %v3291_v10 }
0x120a   : > { %v3296_v0 = vmul.f32 %v5467_v7, %v3295_v3 }
0x120c   : > { %v3297_v12 = vmul.f32 0.5, %v3296_v0  ;;  %v3282_v14 = vpop.xlane.xlu2 %3281 }
0x120d   : > { %v3288_v38 = vmul.f32 %v3282_v14, %v5853_v61 }
0x120e   : > { %v3298_v17 = vsub.f32 1.5, %v3297_v12  ;;  %v5341_v12 = vld [vmem:[%s5887_s2 + $0x10] ss:$0 sm:$0xff] }
0x120f   : > { %v5469_v45 = vpop.eup %5468  ;;  %v3292_v56 = vadd.f32 1e-05, %v3288_v38 }
0x1210   : > { %v3299_v18 = vmul.f32 %v5467_v7, %v3298_v17  ;;  %v3305_v62 = vmul.f32 %v5469_v45, %v3291_v10  ;;  %vm3311_vm6 = vweird.f32 %v5469_v45 }
0x1211   : > { %5470 = vrsqrt.f32 %v3292_v56  ;;  %vm3312_vm8 = vmor %vm3310_vm7, %vm3311_vm6  ;;  %vm3320_vm10 = vweird.f32 %v3292_v56 }
0x1212   : > { %v3303_v53 = vsel %vm3302_vm5, %v5467_v7, %v3299_v18  ;;  %v3306_v13 = vmul.f32 %v5469_v45, %v3305_v62 }
0x1213   : > { %v6631_v24 = vmul.f32 %v3303_v53, %v6583_v46 }
0x1214   : > { %v3307_v31 = vmul.f32 0.5, %v3306_v13  ;;  %v3285_v19 = vpop.xlane.xlu0 %3284 }
0x1215   : > { %v3341_v41 = vmul.f32 %v6625_v22, %v6631_v24  ;;  %v3289_v33 = vmul.f32 %v3285_v19, %v5853_v61  ;;  %v5180_v19 = vld [vmem:[%s5893_s28 + $0x230] sm:$0xff] }
0x1216   : > { %v3308_v54 = vsub.f32 1.5, %v3307_v31 }
0x1217   : > { %v6643_v46 = vadd.f32 %v6628_v23, %v3341_v41  ;;  %v5471_v15 = vpop.eup %5470  ;;  %v3293_v37 = vadd.f32 1e-05, %v3289_v33  ;;  %v5181_v41 = vld [vmem:[%s5893_s28 + $0x238] sm:$0xff] }
0x1218   : > { %v3309_v52 = vmul.f32 %v5469_v45, %v3308_v54  ;;  %v3315_v42 = vmul.f32 %v5471_v15, %v3292_v56  ;;  %vm3321_vm9 = vweird.f32 %v5471_v15  ;;  %v5178_v54 = vld [vmem:[%s5893_s28 + $0x220] sm:$0xff] }
0x1219   : > { %5124 = vmatmul.msk.f32.vlgmr.msrb.gmra.mxu2 %vm1049_vm1, %v6643_v46  ;;  %5133 = vmatmul.msk.f32.vlgmr.msrb.gmra.mxu3 %vm1049_vm1, %v6643_v46  ;;  %5472 = vrsqrt.f32 %v3293_v37  ;;  %vm3322_vm11 = vmor %vm3320_vm10, %vm3321_vm9  ;;  %vm3330_vm13 = vweird.f32 %v3293_v37 }
0x121a   : > { %5142 = vmatmul.msk.f32.vlgmr.msra.gmra.mxu0 %vm1049_vm1, %v6643_v46  ;;  %v3313_v58 = vsel %vm3312_vm8, %v5469_v45, %v3309_v52  ;;  %v3316_v43 = vmul.f32 %v5471_v15, %v3315_v42  ;;  %v5343_v45 = vld [vmem:[%s5887_s2 + $0xe] ss:$0 sm:$0xff] }
0x121b   : > { %v6654_v44 = vmul.f32 %v3313_v58, %v6590_v34 }
0x121c   : > { %v3317_v47 = vmul.f32 0.5, %v3316_v43 }
0x121d   : > { %v3342_v9 = vmul.f32 %v6625_v22, %v6654_v44 }
0x121e   : > { %v3318_v50 = vsub.f32 1.5, %v3317_v47 }
0x121f   : > { %v5473_v36 = vpop.eup %5472  ;;  %v6659_v51 = vadd.f32 %v6628_v23, %v3342_v9 }
0x1220   : > { %v3319_v55 = vmul.f32 %v5471_v15, %v3318_v50  ;;  %v3325_v48 = vmul.f32 %v5473_v36, %v3293_v37  ;;  %vm3331_vm12 = vweird.f32 %v5473_v36 }
0x1221   : > { %5125 = vmatmul.msk.f32.gmra.mxu2 %vm1049_vm1, %v6659_v51  ;;  %5134 = vmatmul.msk.f32.gmra.mxu3 %vm1049_vm1, %v6659_v51  ;;  %vm3332_vm14 = vmor %vm3330_vm13, %vm3331_vm12 }
0x1222   : > { %v3323_v34 = vsel %vm3322_vm11, %v5471_v15, %v3319_v55  ;;  %v3326_v40 = vmul.f32 %v5473_v36, %v3325_v48  ;;  %5143 = vmatmul.msk.f32.gmra.mxu0 %vm1049_vm1, %v6659_v51  ;;  %v5344_v15 = vld [vmem:[%s5887_s2 + $0xf] ss:$0 sm:$0xff]  ;;  %v6742_v48 = vld [vmem:[%s7118_s27] sm:$0xff] }
0x1223   : > { %v6668_v57 = vmul.f32 %v3323_v34, %v6597_v39 }
0x1224   : > { %v3327_v59 = vmul.f32 0.5, %v3326_v40 }
0x1225   : > { %v3343_v60 = vmul.f32 %v6625_v22, %v6668_v57 }
0x1226   : > { %v3328_v30 = vsub.f32 1.5, %v3327_v59  ;;  %v6749_v59 = vld [vmem:[%s7118_s27 + $0x8] sm:$0xff] }
0x1227   : > { %v6673_v63 = vadd.f32 %v6628_v23, %v3343_v60 }
0x1228   : > { %v3329_v2 = vmul.f32 %v5473_v36, %v3328_v30 }
0x1229   : > { %5126 = vmatmul.msk.f32.gmra.mxu2 %vm1049_vm1, %v6673_v63  ;;  %5135 = vmatmul.msk.f32.gmra.mxu3 %vm1049_vm1, %v6673_v63 }
0x122a   : > { %v3333_v39 = vsel %vm3332_vm14, %v5473_v36, %v3329_v2  ;;  %5144 = vmatmul.msk.f32.gmra.mxu0 %vm1049_vm1, %v6673_v63 }
0x122b   : > { %v6682_v4 = vmul.f32 %v3333_v39, %v6604_v21  ;;  %v6756_v39 = vld [vmem:[%s7118_s27 + $0x10] sm:$0xff] }
0x122d   : > { %v3344_v6 = vmul.f32 %v6625_v22, %v6682_v4 }
0x122f   : > { %v6687_v1 = vadd.f32 %v6628_v23, %v3344_v6 }
0x1231   : > { %5127 = vmatmul.msk.f32.gmra.mxu2 %vm1049_vm1, %v6687_v1  ;;  %5136 = vmatmul.msk.f32.gmra.mxu3 %vm1049_vm1, %v6687_v1 }
0x1232   : > { %5145 = vmatmul.msk.f32.gmra.mxu0 %vm1049_vm1, %v6687_v1 }
0x1239   : > { %5165 = vmatmul.msk.f32.vlgmr.msra.gmra.mxu3 %vm1049_vm1, %v6643_v46 }
0x123a   : > { %5174 = vmatmul.msk.f32.vlgmr.msrb.gmra.mxu0 %vm1049_vm1, %v6643_v46 }
0x1241   : > { %5166 = vmatmul.msk.f32.gmra.mxu3 %vm1049_vm1, %v6659_v51 }
0x1242   : > { %5175 = vmatmul.msk.f32.gmra.mxu0 %vm1049_vm1, %v6659_v51 }
0x1249   : > { %5167 = vmatmul.msk.f32.gmra.mxu3 %vm1049_vm1, %v6673_v63 }
0x124a   : > { %5176 = vmatmul.msk.f32.gmra.mxu0 %vm1049_vm1, %v6673_v63 }
0x1251   : > { %5168 = vmatmul.msk.f32.gmra.mxu3 %vm1049_vm1, %v6687_v1 }
0x1252   : > { %5177 = vmatmul.msk.f32.gmra.mxu0 %vm1049_vm1, %v6687_v1 }
0x1297   : > { %v3469_v21 = vpop.f32.mrf.mxu0 }
0x1298   : > { %v3470_v62 = vadd.f32 %v5341_v12, %v3469_v21 }
0x129c   : > { %v3430_v11 = vpop.f32.mrf.mxu3  ;;  %v3391_v13 = vpop.f32.mrf.mxu2 }
0x129d   : > { %v3431_v29 = vadd.f32 %v5343_v45, %v3430_v11  ;;  %v3392_v31 = vadd.f32 %v5342_v28, %v3391_v13 }
0x129f   : > { %v3472_v7 = vpop.f32.mrf.mxu0 }
0x12a0   : > { %v3473_v18 = vadd.f32 %v5341_v12, %v3472_v7  ;;  %v6763_v7 = vld [vmem:[%s7118_s27 + $0x18] sm:$0xff] }
0x12a4   : > { %v3433_v3 = vpop.f32.mrf.mxu3  ;;  %v3394_v8 = vpop.f32.mrf.mxu2 }
0x12a5   : > { %v3434_v16 = vadd.f32 %v5343_v45, %v3433_v3  ;;  %v3395_v26 = vadd.f32 %v5342_v28, %v3394_v8 }
0x12a7   : > { %v3475_v10 = vpop.f32.mrf.mxu0 }
0x12a8   : > { %v3476_v38 = vadd.f32 %v5341_v12, %v3475_v10 }
0x12ac   : > { %v3436_v0 = vpop.f32.mrf.mxu3  ;;  %v3397_v37 = vpop.f32.mrf.mxu2 }
0x12ad   : > { %v3437_v53 = vadd.f32 %v5343_v45, %v3436_v0  ;;  %v3398_v42 = vadd.f32 %v5342_v28, %v3397_v37 }
0x12af   : > { %v3478_v14 = vpop.f32.mrf.mxu0 }
0x12b0   : > { %v3479_v17 = vadd.f32 %v5341_v12, %v3478_v14 }
0x12b2   : > { %3662 = vmatpush.msra.mxu2 %v3479_v17  ;;  %v5346_v17 = vld [vmem:[%s5887_s2 + $0x11] ss:$0 sm:$0xff] }
0x12b4   : > { %3663 = vmatpush.msra.mxu2 %v3476_v38  ;;  %v3439_v56 = vpop.f32.mrf.mxu3  ;;  %v3400_v47 = vpop.f32.mrf.mxu2 }
0x12b5   : > { %v3440_v22 = vadd.f32 %v5343_v45, %v3439_v56  ;;  %v3401_v9 = vadd.f32 %v5342_v28, %v3400_v47 }
0x12b6   : > { %3664 = vmatpush.msra.mxu2 %v3473_v18 }
0x12b7   : > { %v3748_v23 = vpop.f32.mrf.mxu0  ;;  %5146 = vmatpush.xpose.msk.msra.mxu1 %vm1286_vm15, %v3440_v22 }
0x12b8   : > { %3665 = vmatpush.msra.mxu2 %v3470_v62  ;;  %v3749_v50 = vadd.f32 %v5344_v15, %v3748_v23 }
0x12bb   : > { %5147 = vmatpush.xpose.msk.msra.mxu1 %vm1286_vm15, %v3437_v53 }
0x12bf   : > { %v3751_v35 = vpop.f32.mrf.mxu0  ;;  %5148 = vmatpush.xpose.msk.msra.mxu1 %vm1286_vm15, %v3434_v16 }
0x12c0   : > { %v3752_v43 = vadd.f32 %v5344_v15, %v3751_v35 }
0x12c3   : > { %5149 = vmatpush.xpose.msk.msra.mxu1 %vm1286_vm15, %v3431_v29 }
0x12c6   : > { %5150 = vmatmul.msk.f32.vlgmr.msra.gmra.mxu1 %vm1286_vm15, %v3392_v31 }
0x12c7   : > { %3782 = vmatpush.msrb.mxu1 %v5181_v41  ;;  %v3754_v33 = vpop.f32.mrf.mxu0 }
0x12c8   : > { %v3755_v58 = vadd.f32 %v5344_v15, %v3754_v33 }
0x12c9   : > { %3783 = vmatpush.msrb.mxu1 %v5180_v19 }
0x12cb   : > { %3784 = vmatpush.msrb.mxu1 %v5179_v32 }
0x12cd   : > { %3785 = vmatpush.msrb.mxu1 %v5178_v54 }
0x12ce   : > { %5151 = vmatmul.msk.f32.gmra.mxu1 %vm1286_vm15, %v3395_v26 }
0x12cf   : > { %v3757_v27 = vpop.f32.mrf.mxu0 }
0x12d0   : > { %v3758_v52 = vadd.f32 %v5344_v15, %v3757_v27 }
0x12d2   : > { %5187 = vmatpush.xpose.msk.msrb.mxu2 %vm1286_vm15, %v3758_v52 }
0x12d6   : > { %5188 = vmatpush.xpose.msk.msrb.mxu2 %vm1286_vm15, %v3755_v58  ;;  %5152 = vmatmul.msk.f32.gmra.mxu1 %vm1286_vm15, %v3398_v42 }
0x12da   : > { %5189 = vmatpush.xpose.msk.msrb.mxu2 %vm1286_vm15, %v3752_v43 }
0x12de   : > { %5190 = vmatpush.xpose.msk.msrb.mxu2 %vm1286_vm15, %v3749_v50  ;;  %5153 = vmatmul.msk.f32.gmra.mxu1 %vm1286_vm15, %v3401_v9 }
0x12e6   : > { %5183 = vmatmul.msk.f32.vlgmr.msrb.gmra.mxu1 %vm1049_vm1, %v6643_v46 }
0x12ee   : > { %5184 = vmatmul.msk.f32.gmra.mxu1 %vm1049_vm1, %v6659_v51 }
0x12f6   : > { %5185 = vmatmul.msk.f32.gmra.mxu1 %vm1049_vm1, %v6673_v63 }
0x12fe   : > { %5186 = vmatmul.msk.f32.gmra.mxu1 %vm1049_vm1, %v6687_v1 }
0x1343   : > { %v3522_v36 = vpop.f32.mrf.mxu1 }
0x1344   : > { %v3534_v55 = vmul.f32 0.25, %v3522_v36 }
0x1346   : > { %v3538_v34 = vadd.f32 %v6742_v48, %v3534_v55 }
0x1348   : > { %v3542_v46 = vsel %vm1049_vm1, %v3538_v34, -inf }
0x1349   : > { %3543 = vmax.xlane.f32.xlu1 %v3542_v46 }
0x134b   : > { %v3525_v40 = vpop.f32.mrf.mxu1 }
0x134c   : > { %v3535_v51 = vmul.f32 0.25, %v3525_v40 }
0x134e   : > { %v3539_v60 = vadd.f32 %v6749_v59, %v3535_v51 }
0x1350   : > { %v3545_v30 = vsel %vm1049_vm1, %v3539_v60, -inf }
0x1351   : > { %3546 = vmax.xlane.f32.xlu2 %v3545_v30 }
0x1353   : > { %v3528_v63 = vpop.f32.mrf.mxu1 }
0x1354   : > { %v3536_v2 = vmul.f32 0.25, %v3528_v63 }
0x1356   : > { %v3540_v6 = vadd.f32 %v6756_v39, %v3536_v2 }
0x1358   : > { %v3548_v1 = vsel %vm1049_vm1, %v3540_v6, -inf }
0x1359   : > { %3549 = vmax.xlane.f32.xlu0 %v3548_v1 }
0x135b   : > { %v3531_v21 = vpop.f32.mrf.mxu1 }
0x135c   : > { %v3537_v11 = vmul.f32 0.25, %v3531_v21 }
0x135e   : > { %v3541_v3 = vadd.f32 %v6763_v7, %v3537_v11 }
0x1360   : > { %v3551_v10 = vsel %vm1049_vm1, %v3541_v3, -inf }
0x1361   : > { %3552 = vmax.xlane.f32.xlu1 %v3551_v10 }
0x1363   : > { %v3787_v0 = vpop.f32.mrf.mxu1 }
0x1364   : > { %v3788_v22 = vadd.f32 %v5346_v17, %v3787_v0 }
0x136b   : > { %v3790_v12 = vpop.f32.mrf.mxu1 }
0x136c   : > { %v3791_v56 = vadd.f32 %v5346_v17, %v3790_v12 }
0x1373   : > { %v3793_v14 = vpop.f32.mrf.mxu1 }
0x1374   : > { %v3794_v18 = vadd.f32 %v5346_v17, %v3793_v14 }
0x137b   : > { %v3796_v38 = vpop.f32.mrf.mxu1 }
0x137c   : > { %v3797_v45 = vadd.f32 %v5346_v17, %v3796_v38 }
0x137e   : > { %3980 = vmatpush.msrb.mxu3 %v3797_v45 }
0x1380   : > { %3981 = vmatpush.msrb.mxu3 %v3794_v18 }
0x1382   : > { %3982 = vmatpush.msrb.mxu3 %v3791_v56 }
0x1384   : > { %3983 = vmatpush.msrb.mxu3 %v3788_v22 }
0x13bc   : > { %v3544_v62 = vpop.xlane.xlu1 %3543 }
0x13bd   : > { %v3554_v23 = vsub.f32 %v3538_v34, %v3544_v62 }
0x13bf   : > { %v3558_v53 = vmul.f32 1.442695, %v3554_v23 }
0x13c1   : > { %5474 = vpow2.f32 %v3558_v53 }
0x13c4   : > { %v3547_v13 = vpop.xlane.xlu2 %3546 }
0x13c5   : > { %v3555_v16 = vsub.f32 %v3539_v60, %v3547_v13 }
0x13c7   : > { %v5475_v35 = vpop.eup %5474  ;;  %v3560_v28 = vmul.f32 1.442695, %v3555_v16 }
0x13c8   : > { %v3566_v29 = vsel %vm1049_vm1, %v5475_v35, 0.0 }
0x13c9   : > { %5476 = vpow2.f32 %v3560_v28  ;;  %3567 = vadd.xlane.f32.xlu2 %v3566_v29 }
0x13cc   : > { %v3550_v41 = vpop.xlane.xlu0 %3549 }
0x13cd   : > { %v3556_v31 = vsub.f32 %v3540_v6, %v3550_v41 }
0x13cf   : > { %v5477_v19 = vpop.eup %5476  ;;  %v3562_v8 = vmul.f32 1.442695, %v3556_v31 }
0x13d0   : > { %v3569_v32 = vsel %vm1049_vm1, %v5477_v19, 0.0 }
0x13d1   : > { %5478 = vpow2.f32 %v3562_v8  ;;  %3570 = vadd.xlane.f32.xlu0 %v3569_v32 }
0x13d4   : > { %v3553_v33 = vpop.xlane.xlu1 %3552 }
0x13d5   : > { %v3557_v54 = vsub.f32 %v3541_v3, %v3553_v33 }
0x13d7   : > { %v6770_v26 = vpop.eup %5478  ;;  %v3564_v15 = vmul.f32 1.442695, %v3557_v54 }
0x13d8   : > { %v3572_v37 = vsel %vm1049_vm1, %v6770_v26, 0.0 }
0x13d9   : > { %5480 = vpow2.f32 %v3564_v15  ;;  %3573 = vadd.xlane.f32.xlu1 %v3572_v37  ;;  %v3709_v37 = vpop.f32.mrf.mxu3 }
0x13df   : > { %v6774_v27 = vpop.eup %5480 }
0x13e0   : > { %v3575_v52 = vsel %vm1049_vm1, %v6774_v27, 0.0 }
0x13e1   : > { %3576 = vadd.xlane.f32.xlu2 %v3575_v52 }
0x143c   : > { %v3568_v42 = vpop.xlane.xlu2 %3567 }
0x143d   : > { %5482 = vrcp.f32 %v3568_v42  ;;  %v3589_v50 = vand.u32 2147483648, %v3568_v42  ;;  %v3587_v55 = vand.u32 2147483647, %v3568_v42  ;;  %vm3583_vm2 = vweird.f32 %v3568_v42 }
0x143f   : > { %v3590_v40 = vor.u32 1.1754944e-38, %v3589_v50  ;;  %vm3588_vm4 = vcmp.eq.f32.partialorder %v3587_v55, 8.507059e+37 }
0x1443   : > { %v5483_v58 = vpop.eup %5482 }
0x1444   : > { %v3579_v43 = vmul.f32 %v5483_v58, %v3568_v42  ;;  %v3571_v47 = vpop.xlane.xlu0 %3570  ;;  %vm3584_vm0 = vweird.f32 %v5483_v58  ;;  %v5345_v42 = vld [vmem:[%s5887_s2 + $0xd] ss:$0 sm:$0xff] }
0x1445   : > { %5484 = vrcp.f32 %v3571_v47  ;;  %vm3585_vm3 = vmor %vm3583_vm2, %vm3584_vm0  ;;  %v3604_v21 = vand.u32 2147483648, %v3571_v47  ;;  %v3602_v11 = vand.u32 2147483647, %v3571_v47  ;;  %vm3598_vm6 = vweird.f32 %v3571_v47 }
0x1446   : > { %v3580_v9 = vsub.f32 1.0, %v3579_v43  ;;  %v3712_v43 = vpop.f32.mrf.mxu3 }
0x1447   : > { %v3605_v0 = vor.u32 1.1754944e-38, %v3604_v21  ;;  %vm3603_vm8 = vcmp.eq.f32.partialorder %v3602_v11, 8.507059e+37 }
0x1448   : > { %v3581_v36 = vmul.f32 %v5483_v58, %v3580_v9 }
0x144a   : > { %v3582_v34 = vadd.f32 %v5483_v58, %v3581_v36 }
0x144b   : > { %v5485_v46 = vpop.eup %5484 }
0x144c   : > { %v3586_v51 = vsel %vm3585_vm3, %v5483_v58, %v3582_v34  ;;  %v3594_v60 = vmul.f32 %v5485_v46, %v3571_v47  ;;  %v3574_v30 = vpop.xlane.xlu1 %3573  ;;  %vm3599_vm5 = vweird.f32 %v5485_v46  ;;  %v3710_v58 = vadd.f32 %v5345_v42, %v3709_v37 }
0x144d   : > { %v3591_v63 = vsel %vm3588_vm4, %v3590_v40, %v3586_v51  ;;  %5486 = vrcp.f32 %v3574_v30  ;;  %vm3600_vm7 = vmor %vm3598_vm6, %vm3599_vm5  ;;  %v3619_v18 = vand.u32 2147483648, %v3574_v30  ;;  %v3617_v62 = vand.u32 2147483647, %v3574_v30 }
0x144e   : > { %v3592_v2 = vmul.f32 %v5475_v35, %v3591_v63  ;;  %v3595_v6 = vsub.f32 1.0, %v3594_v60  ;;  %vm3613_vm10 = vweird.f32 %v3574_v30  ;;  %v3713_v47 = vadd.f32 %v5345_v42, %v3712_v43  ;;  %v3715_v9 = vpop.f32.mrf.mxu3  ;;  %v5200_v43 = vld [vmem:[%s6056_s30 + $0x58] sm:$0xff] }
0x144f   : > { %v3620_v13 = vor.u32 1.1754944e-38, %v3619_v18  ;;  %vm3618_vm12 = vcmp.eq.f32.partialorder %v3617_v62, 8.507059e+37  ;;  %v3716_v50 = vadd.f32 %v5345_v42, %v3715_v9  ;;  %4026 = vmatpush.msra.mxu0 %v5200_v43 }
0x1450   : > { %v3596_v1 = vmul.f32 %v5485_v46, %v3595_v6  ;;  %5154 = vmatmul.msk.f32.vlgmr.msra.gmra.mxu2 %vm1049_vm1, %v3592_v2 }
0x1452   : > { %v3597_v3 = vadd.f32 %v5485_v46, %v3596_v1 }
0x1453   : > { %v5487_v10 = vpop.eup %5486 }
0x1454   : > { %v3609_v12 = vmul.f32 %v5487_v10, %v3574_v30  ;;  %v3577_v14 = vpop.xlane.xlu2 %3576  ;;  %v3601_v17 = vsel %vm3600_vm7, %v5485_v46, %v3597_v3  ;;  %vm3614_vm9 = vweird.f32 %v5487_v10 }
0x1455   : > { %5488 = vrcp.f32 %v3577_v14  ;;  %v3606_v45 = vsel %vm3603_vm8, %v3605_v0, %v3601_v17  ;;  %vm3615_vm11 = vmor %vm3613_vm10, %vm3614_vm9  ;;  %v3634_v31 = vand.u32 2147483648, %v3577_v14  ;;  %v3632_v8 = vand.u32 2147483647, %v3577_v14 }
0x1456   : > { %v3610_v38 = vsub.f32 1.0, %v3609_v12  ;;  %v3607_v56 = vmul.f32 %v5477_v19, %v3606_v45  ;;  %vm3628_vm14 = vweird.f32 %v3577_v14  ;;  %v3718_v36 = vpop.f32.mrf.mxu3 }
0x1457   : > { %v3635_v33 = vor.u32 1.1754944e-38, %v3634_v31  ;;  %vm3633_vm2 = vcmp.eq.f32.partialorder %v3632_v8, 8.507059e+37  ;;  %v3719_v55 = vadd.f32 %v5345_v42, %v3718_v36 }
0x1458   : > { %v3611_v22 = vmul.f32 %v5487_v10, %v3610_v38  ;;  %5155 = vmatmul.msk.f32.gmra.mxu2 %vm1049_vm1, %v3607_v56 }
0x145a   : > { %v3612_v23 = vadd.f32 %v5487_v10, %v3611_v22 }
0x145b   : > { %v5489_v53 = vpop.eup %5488 }
0x145c   : > { %v3624_v16 = vmul.f32 %v5489_v53, %v3577_v14  ;;  %v3616_v35 = vsel %vm3615_vm11, %v5487_v10, %v3612_v23  ;;  %vm3629_vm13 = vweird.f32 %v5489_v53 }
0x145d   : > { %v3621_v28 = vsel %vm3618_vm12, %v3620_v13, %v3616_v35  ;;  %vm3630_vm0 = vmor %vm3628_vm14, %vm3629_vm13 }
0x145e   : > { %v3625_v29 = vsub.f32 1.0, %v3624_v16  ;;  %v3622_v41 = vmul.f32 %v6770_v26, %v3621_v28  ;;  %v5159_v26 = vld [vmem:[%s6056_s30 + $0x48] sm:$0xff] }
0x145f   : > { %4067 = vmatpush.msra.mxu1 %v5159_v26 }
0x1460   : > { %v3626_v19 = vmul.f32 %v5489_v53, %v3625_v29  ;;  %5156 = vmatmul.msk.f32.gmra.mxu2 %vm1049_vm1, %v3622_v41 }
0x1462   : > { %v3627_v32 = vadd.f32 %v5489_v53, %v3626_v19 }
0x1464   : > { %v3631_v54 = vsel %vm3630_vm0, %v5489_v53, %v3627_v32 }
0x1465   : > { %v3636_v15 = vsel %vm3633_vm2, %v3635_v33, %v3631_v54 }
0x1466   : > { %v3637_v52 = vmul.f32 %v6774_v27, %v3636_v15  ;;  %v5158_v27 = vld [vmem:[%s6056_s30 + $0x40] sm:$0xff] }
0x1467   : > { %4068 = vmatpush.msra.mxu1 %v5158_v27 }
0x1468   : > { %5157 = vmatmul.msk.f32.gmra.mxu2 %vm1049_vm1, %v3637_v52 }
0x1470   : > { %5191 = vmatmul.msk.f32.vlgmr.msrb.gmra.mxu2 %vm1286_vm15, %v3710_v58 }
0x1478   : > { %5192 = vmatmul.msk.f32.gmra.mxu2 %vm1286_vm15, %v3713_v47 }
0x1480   : > { %5193 = vmatmul.msk.f32.gmra.mxu2 %vm1286_vm15, %v3716_v50 }
0x1488   : > { %5194 = vmatmul.msk.f32.gmra.mxu2 %vm1286_vm15, %v3719_v55 }
0x14d3   : > { %v3667_v34 = vpop.f32.mrf.mxu2 }
0x14d4   : > { %5205 = vmatmul.msk.f32.vlgmr.msra.gmra.mxu1 %vm1286_vm15, %v3667_v34 }
0x14db   : > { %v3670_v46 = vpop.f32.mrf.mxu2 }
0x14dc   : > { %5206 = vmatmul.msk.f32.gmra.mxu1 %vm1286_vm15, %v3670_v46 }
0x14e3   : > { %v3673_v40 = vpop.f32.mrf.mxu2 }
0x14e4   : > { %5207 = vmatmul.msk.f32.gmra.mxu1 %vm1286_vm15, %v3673_v40 }
0x14eb   : > { %v3676_v51 = vpop.f32.mrf.mxu2 }
0x14ec   : > { %5208 = vmatmul.msk.f32.gmra.mxu1 %vm1286_vm15, %v3676_v51 }
0x14f3   : > { %v3840_v60 = vpop.f32.mrf.mxu2 }
0x14f4   : > { %v3852_v30 = vmul.f32 0.25, %v3840_v60 }
0x14f6   : > { %v3856_v63 = vadd.f32 %v6742_v48, %v3852_v30 }
0x14f8   : > { %v3860_v2 = vsel %vm1049_vm1, %v3856_v63, -inf }
0x14f9   : > { %3861 = vmax.xlane.f32.xlu0 %v3860_v2 }
0x14fb   : > { %v3843_v6 = vpop.f32.mrf.mxu2 }
0x14fc   : > { %v3853_v1 = vmul.f32 0.25, %v3843_v6 }
0x14fe   : > { %v3857_v21 = vadd.f32 %v6749_v59, %v3853_v1 }
0x1500   : > { %v3863_v11 = vsel %vm1049_vm1, %v3857_v21, -inf }
0x1501   : > { %3864 = vmax.xlane.f32.xlu1 %v3863_v11 }
0x1503   : > { %v3846_v3 = vpop.f32.mrf.mxu2 }
0x1504   : > { %v3854_v10 = vmul.f32 0.25, %v3846_v3 }
0x1506   : > { %v3858_v0 = vadd.f32 %v6756_v39, %v3854_v10 }
0x1508   : > { %v3866_v12 = vsel %vm1049_vm1, %v3858_v0, -inf }
0x1509   : > { %3867 = vmax.xlane.f32.xlu2 %v3866_v12 }
0x150b   : > { %v3849_v14 = vpop.f32.mrf.mxu2 }
0x150c   : > { %v3855_v17 = vmul.f32 0.25, %v3849_v14 }
0x150e   : > { %v3859_v48 = vadd.f32 %v6763_v7, %v3855_v17 }
0x1510   : > { %v3869_v38 = vsel %vm1049_vm1, %v3859_v48, -inf }
0x1511   : > { %3870 = vmax.xlane.f32.xlu0 %v3869_v38 }
0x156c   : > { %v3862_v45 = vpop.xlane.xlu0 %3861 }
0x156d   : > { %v3872_v18 = vsub.f32 %v3856_v63, %v3862_v45 }
0x156f   : > { %v3876_v59 = vmul.f32 1.442695, %v3872_v18 }
0x1571   : > { %5490 = vpow2.f32 %v3876_v59 }
0x1574   : > { %v3865_v56 = vpop.xlane.xlu1 %3864 }
0x1575   : > { %v3873_v22 = vsub.f32 %v3857_v21, %v3865_v56 }
0x1577   : > { %v5491_v62 = vpop.eup %5490  ;;  %v3878_v23 = vmul.f32 1.442695, %v3873_v22 }
0x1578   : > { %v3884_v39 = vsel %vm1049_vm1, %v5491_v62, 0.0 }
0x1579   : > { %5492 = vpow2.f32 %v3878_v23  ;;  %3885 = vadd.xlane.f32.xlu1 %v3884_v39 }
0x157c   : > { %v3868_v53 = vpop.xlane.xlu2 %3867 }
0x157d   : > { %v3874_v13 = vsub.f32 %v3858_v0, %v3868_v53 }
0x157f   : > { %v5493_v16 = vpop.eup %5492  ;;  %v3880_v35 = vmul.f32 1.442695, %v3874_v13 }
0x1580   : > { %v3887_v7 = vsel %vm1049_vm1, %v5493_v16, 0.0 }
0x1581   : > { %5494 = vpow2.f32 %v3880_v35  ;;  %3888 = vadd.xlane.f32.xlu2 %v3887_v7 }
0x1584   : > { %v3871_v28 = vpop.xlane.xlu0 %3870 }
0x1585   : > { %v3875_v29 = vsub.f32 %v3859_v48, %v3871_v28 }
0x1587   : > { %v6805_v41 = vpop.eup %5494  ;;  %v3882_v31 = vmul.f32 1.442695, %v3875_v29  ;;  %v5199_v29 = vld [vmem:[%s6056_s30 + $0x50] sm:$0xff] }
0x1588   : > { %v3890_v19 = vsel %vm1049_vm1, %v6805_v41, 0.0  ;;  %4027 = vmatpush.msra.mxu0 %v5199_v29 }
0x1589   : > { %5496 = vpow2.f32 %v3882_v31  ;;  %3891 = vadd.xlane.f32.xlu0 %v3890_v19 }
0x158f   : > { %v6809_v8 = vpop.eup %5496 }
0x1590   : > { %v3893_v32 = vsel %vm1049_vm1, %v6809_v8, 0.0 }
0x1591   : > { %3894 = vadd.xlane.f32.xlu1 %v3893_v32 }
0x15ec   : > { %v3886_v33 = vpop.xlane.xlu1 %3885 }
0x15ed   : > { %5498 = vrcp.f32 %v3886_v33  ;;  %v3907_v26 = vand.u32 2147483648, %v3886_v33  ;;  %v3905_v58 = vand.u32 2147483647, %v3886_v33  ;;  %vm3901_vm4 = vweird.f32 %v3886_v33 }
0x15ef   : > { %v3908_v50 = vor.u32 1.1754944e-38, %v3907_v26  ;;  %vm3906_vm6 = vcmp.eq.f32.partialorder %v3905_v58, 8.507059e+37 }
0x15f3   : > { %v5499_v54 = vpop.eup %5498 }
0x15f4   : > { %v3897_v15 = vmul.f32 %v5499_v54, %v3886_v33  ;;  %v3889_v37 = vpop.xlane.xlu2 %3888  ;;  %vm3902_vm3 = vweird.f32 %v5499_v54  ;;  %v4070_v33 = vpop.f32.mrf.mxu1 }
0x15f5   : > { %5500 = vrcp.f32 %v3889_v37  ;;  %vm3903_vm5 = vmor %vm3901_vm4, %vm3902_vm3  ;;  %v3922_v60 = vand.u32 2147483648, %v3889_v37  ;;  %v3920_v30 = vand.u32 2147483647, %v3889_v37  ;;  %vm3916_vm8 = vweird.f32 %v3889_v37 }
0x15f6   : > { %v3898_v52 = vsub.f32 1.0, %v3897_v15 }
0x15f7   : > { %v3923_v6 = vor.u32 1.1754944e-38, %v3922_v60  ;;  %vm3921_vm10 = vcmp.eq.f32.partialorder %v3920_v30, 8.507059e+37 }
0x15f8   : > { %v3899_v42 = vmul.f32 %v5499_v54, %v3898_v52 }
0x15fa   : > { %v3900_v47 = vadd.f32 %v5499_v54, %v3899_v42 }
0x15fb   : > { %v5501_v9 = vpop.eup %5500 }
0x15fc   : > { %v3904_v36 = vsel %vm3903_vm5, %v5499_v54, %v3900_v47  ;;  %v3912_v55 = vmul.f32 %v5501_v9, %v3889_v37  ;;  %v3892_v27 = vpop.xlane.xlu0 %3891  ;;  %vm3917_vm7 = vweird.f32 %v5501_v9  ;;  %v4073_v52 = vpop.f32.mrf.mxu1 }
0x15fd   : > { %v3909_v34 = vsel %vm3906_vm6, %v3908_v50, %v3904_v36  ;;  %5502 = vrcp.f32 %v3892_v27  ;;  %vm3918_vm9 = vmor %vm3916_vm8, %vm3917_vm7  ;;  %v3937_v0 = vand.u32 2147483648, %v3892_v27  ;;  %v3935_v17 = vand.u32 2147483647, %v3892_v27 }
0x15fe   : > { %v3910_v46 = vmul.f32 %v5491_v62, %v3909_v34  ;;  %v3913_v40 = vsub.f32 1.0, %v3912_v55  ;;  %vm3931_vm12 = vweird.f32 %v3892_v27 }
0x15ff   : > { %v3938_v45 = vor.u32 1.1754944e-38, %v3937_v0  ;;  %vm3936_vm14 = vcmp.eq.f32.partialorder %v3935_v17, 8.507059e+37 }
0x1600   : > { %v3914_v51 = vmul.f32 %v5501_v9, %v3913_v40  ;;  %5195 = vmatmul.msk.f32.vlgmr.msrb.gmra.mxu3 %vm1049_vm1, %v3910_v46 }
0x1602   : > { %v3915_v63 = vadd.f32 %v5501_v9, %v3914_v51 }
0x1603   : > { %v5503_v2 = vpop.eup %5502 }
0x1604   : > { %v3927_v1 = vmul.f32 %v5503_v2, %v3892_v27  ;;  %v3895_v21 = vpop.xlane.xlu1 %3894  ;;  %v3919_v11 = vsel %vm3918_vm9, %v5501_v9, %v3915_v63  ;;  %vm3932_vm11 = vweird.f32 %v5503_v2  ;;  %v4076_v50 = vpop.f32.mrf.mxu1 }
0x1605   : > { %5504 = vrcp.f32 %v3895_v21  ;;  %v3924_v10 = vsel %vm3921_vm10, %v3923_v6, %v3919_v11  ;;  %vm3933_vm13 = vmor %vm3931_vm12, %vm3932_vm11  ;;  %v3952_v23 = vand.u32 2147483648, %v3895_v21  ;;  %v3950_v53 = vand.u32 2147483647, %v3895_v21 }
0x1606   : > { %v3928_v3 = vsub.f32 1.0, %v3927_v1  ;;  %v3925_v12 = vmul.f32 %v5493_v16, %v3924_v10  ;;  %vm3946_vm2 = vweird.f32 %v3895_v21 }
0x1607   : > { %v3953_v16 = vor.u32 1.1754944e-38, %v3952_v23  ;;  %vm3951_vm4 = vcmp.eq.f32.partialorder %v3950_v53, 8.507059e+37  ;;  %v5214_v23 = vld [vmem:[%s6179_s9 + $0x50] sm:$0xff]  ;;  %v5212_v53 = vld [vmem:[%s6179_s9 + $0x40] sm:$0xff] }
0x1608   : > { %v3929_v14 = vmul.f32 %v5503_v2, %v3928_v3  ;;  %5196 = vmatmul.msk.f32.gmra.mxu3 %vm1049_vm1, %v3925_v12 }
0x160a   : > { %v3930_v48 = vadd.f32 %v5503_v2, %v3929_v14 }
0x160b   : > { %v5505_v38 = vpop.eup %5504 }
0x160c   : > { %v3942_v18 = vmul.f32 %v5505_v38, %v3895_v21  ;;  %v3934_v59 = vsel %vm3933_vm13, %v5503_v2, %v3930_v48  ;;  %vm3947_vm0 = vweird.f32 %v5505_v38  ;;  %v4079_v40 = vpop.f32.mrf.mxu1 }
0x160d   : > { %v3939_v56 = vsel %vm3936_vm14, %v3938_v45, %v3934_v59  ;;  %vm3948_vm3 = vmor %vm3946_vm2, %vm3947_vm0 }
0x160e   : > { %v3943_v22 = vsub.f32 1.0, %v3942_v18  ;;  %v3940_v62 = vmul.f32 %v6805_v41, %v3939_v56 }
0x1610   : > { %v3944_v39 = vmul.f32 %v5505_v38, %v3943_v22  ;;  %5197 = vmatmul.msk.f32.gmra.mxu3 %vm1049_vm1, %v3940_v62  ;;  %v5215_v62 = vld [vmem:[%s6179_s9 + $0x58] sm:$0xff] }
0x1611   : > { %4235 = vmatpush.msra.mxu2 %v5215_v62 }
0x1612   : > { %v3945_v13 = vadd.f32 %v5505_v38, %v3944_v39  ;;  %v5213_v39 = vld [vmem:[%s6179_s9 + $0x48] sm:$0xff]  ;;  %s6910_s9 = scalar_lea.vmem [#allocation6], %s5793_s25 }
0x1613   : > { %4236 = vmatpush.msra.mxu2 %v5214_v23 }
0x1614   : > { %v3949_v35 = vsel %vm3948_vm3, %v5505_v38, %v3945_v13 }
0x1615   : > { %v3954_v7 = vsel %vm3951_vm4, %v3953_v16, %v3949_v35  ;;  %4237 = vmatpush.msra.mxu2 %v5213_v39 }
0x1616   : > { %v3955_v28 = vmul.f32 %v6809_v8, %v3954_v7  ;;  %v5347_v8 = vld [vmem:[%s6102_s21 + $0x2] ss:$0 sm:$0xff] }
0x1617   : > { %4238 = vmatpush.msra.mxu2 %v5212_v53 }
0x1618   : > { %5198 = vmatmul.msk.f32.gmra.mxu3 %vm1049_vm1, %v3955_v28 }
0x1683   : > { %v3985_v41 = vpop.f32.mrf.mxu3 }
0x1684   : > { %5201 = vmatmul.msk.f32.vlgmr.msra.gmra.mxu0 %vm1286_vm15, %v3985_v41 }
0x168b   : > { %v3988_v31 = vpop.f32.mrf.mxu3 }
0x168c   : > { %5202 = vmatmul.msk.f32.gmra.mxu0 %vm1286_vm15, %v3988_v31 }
0x1693   : > { %v3991_v19 = vpop.f32.mrf.mxu3 }
0x1694   : > { %5203 = vmatmul.msk.f32.gmra.mxu0 %vm1286_vm15, %v3991_v19 }
0x169b   : > { %v3994_v32 = vpop.f32.mrf.mxu3 }
0x169c   : > { %5204 = vmatmul.msk.f32.gmra.mxu0 %vm1286_vm15, %v3994_v32 }
0x1701   : > { %v4029_v54 = vpop.f32.mrf.mxu0 }
0x1702   : > { %v4071_v15 = vadd.f32 %v4070_v33, %v4029_v54 }
0x1704   : > { %v4082_v37 = vadd.f32 %v4071_v15, %v6562_v49 }
0x1706   : > { %v6827_v26 = vadd.f32 %v5347_v8, %v4082_v37 }
0x1708   : > { %v4099_v42 = vsel %vm1049_vm1, %v6827_v26, 0.0 }
0x1709   : > { %4100 = vadd.xlane.f32.xlu2 %v4099_v42  ;;  %v4032_v58 = vpop.f32.mrf.mxu0  ;;  %v5348_v42 = vld [vmem:[%s6128_s5 + $0x2] ss:$0 sm:$0xff] }
0x170a   : > { %v4074_v43 = vadd.f32 %v4073_v52, %v4032_v58 }
0x170c   : > { %v4083_v47 = vadd.f32 %v4074_v43, %v6567_v5 }
0x170e   : > { %v6832_v9 = vadd.f32 %v5347_v8, %v4083_v47  ;;  %v5236_v47 = vld [vmem:[%s6192_s0 + $0x178] sm:$0xff] }
0x170f   : > { %4305 = vmatpush.msra.mxu3 %v5236_v47 }
0x1710   : > { %v4102_v36 = vsel %vm1049_vm1, %v6832_v9, 0.0 }
0x1711   : > { %4103 = vadd.xlane.f32.xlu0 %v4102_v36  ;;  %v4035_v55 = vpop.f32.mrf.mxu0  ;;  %v5349_v36 = vld [vmem:[%s6156_s29 + $0x2] ss:$0 sm:$0xff] }
0x1712   : > { %v4077_v49 = vadd.f32 %v4076_v50, %v4035_v55  ;;  %v5235_v50 = vld [vmem:[%s6192_s0 + $0x170] sm:$0xff] }
0x1713   : > { %4306 = vmatpush.msra.mxu3 %v5235_v50 }
0x1714   : > { %v4084_v27 = vadd.f32 %v4077_v49, %v6572_v25 }
0x1716   : > { %v6837_v34 = vadd.f32 %v5347_v8, %v4084_v27  ;;  %v5234_v27 = vld [vmem:[%s6192_s0 + $0x168] sm:$0xff] }
0x1717   : > { %4307 = vmatpush.msra.mxu3 %v5234_v27 }
0x1718   : > { %v4105_v46 = vsel %vm1049_vm1, %v6837_v34, 0.0 }
0x1719   : > { %4106 = vadd.xlane.f32.xlu1 %v4105_v46  ;;  %v4038_v51 = vpop.f32.mrf.mxu0 }
0x171a   : > { %v4080_v5 = vadd.f32 %v4079_v40, %v4038_v51 }
0x171c   : > { %v4085_v60 = vadd.f32 %v4080_v5, %v6577_v20 }
0x171e   : > { %v6842_v30 = vadd.f32 %v5347_v8, %v4085_v60 }
0x1720   : > { %v4108_v63 = vsel %vm1049_vm1, %v6842_v30, 0.0 }
0x1721   : > { %4109 = vadd.xlane.f32.xlu2 %v4108_v63 }
0x177c   : > { %v4101_v2 = vpop.xlane.xlu2 %4100 }
0x177d   : > { %v4111_v25 = vmul.f32 %v4101_v2, %v5853_v61 }
0x177f   : > { %v4115_v6 = vsub.f32 %v6827_v26, %v4111_v25 }
0x1781   : > { %v4119_v1 = vmul.f32 %v4115_v6, %v4115_v6 }
0x1783   : > { %v4123_v21 = vsel %vm1049_vm1, %v4119_v1, 0.0 }
0x1784   : > { %4124 = vadd.xlane.f32.xlu0 %v4123_v21  ;;  %v4104_v11 = vpop.xlane.xlu0 %4103 }
0x1785   : > { %v4112_v3 = vmul.f32 %v4104_v11, %v5853_v61 }
0x1787   : > { %v6851_v20 = vsub.f32 %v6832_v9, %v4112_v3 }
0x1789   : > { %v4120_v10 = vmul.f32 %v6851_v20, %v6851_v20 }
0x178b   : > { %v4126_v0 = vsel %vm1049_vm1, %v4120_v10, 0.0 }
0x178c   : > { %v4107_v12 = vpop.xlane.xlu1 %4106  ;;  %4127 = vadd.xlane.f32.xlu1 %v4126_v0 }
0x178d   : > { %v4113_v14 = vmul.f32 %v4107_v12, %v5853_v61 }
0x178f   : > { %v6858_v17 = vsub.f32 %v6837_v34, %v4113_v14 }
0x1791   : > { %v4121_v48 = vmul.f32 %v6858_v17, %v6858_v17 }
0x1793   : > { %v4129_v38 = vsel %vm1049_vm1, %v4121_v48, 0.0 }
0x1794   : > { %4130 = vadd.xlane.f32.xlu2 %v4129_v38  ;;  %v4110_v45 = vpop.xlane.xlu2 %4109 }
0x1795   : > { %v4114_v18 = vmul.f32 %v4110_v45, %v5853_v61 }
0x1797   : > { %v6865_v59 = vsub.f32 %v6842_v30, %v4114_v18 }
0x1799   : > { %v4122_v56 = vmul.f32 %v6865_v59, %v6865_v59 }
0x179b   : > { %v4132_v22 = vsel %vm1049_vm1, %v4122_v56, 0.0 }
0x179c   : > { %4133 = vadd.xlane.f32.xlu0 %v4132_v22 }
0x17f7   : > { %v4125_v13 = vpop.xlane.xlu0 %4124 }
0x17f8   : > { %v4135_v16 = vmul.f32 %v4125_v13, %v5853_v61 }
0x17fa   : > { %v4139_v35 = vadd.f32 1e-05, %v4135_v16 }
0x17fc   : > { %5506 = vrsqrt.f32 %v4139_v35  ;;  %vm4149_vm5 = vweird.f32 %v4139_v35 }
0x17ff   : > { %v4128_v7 = vpop.xlane.xlu1 %4127 }
0x1800   : > { %v4136_v28 = vmul.f32 %v4128_v7, %v5853_v61  ;;  %v5233_v7 = vld [vmem:[%s6192_s0 + $0x160] sm:$0xff] }
0x1801   : > { %4308 = vmatpush.msra.mxu3 %v5233_v7 }
0x1802   : > { %v5507_v29 = vpop.eup %5506  ;;  %v4140_v31 = vadd.f32 1e-05, %v4136_v28  ;;  %v5232_v28 = vld [vmem:[%s6192_s0 + $0x158] sm:$0xff] }
0x1803   : > { %v4144_v41 = vmul.f32 %v5507_v29, %v4139_v35  ;;  %vm4150_vm15 = vweird.f32 %v5507_v29  ;;  %4309 = vmatpush.msra.mxu3 %v5232_v28 }
0x1804   : > { %5508 = vrsqrt.f32 %v4140_v31  ;;  %vm4151_vm6 = vmor %vm4149_vm5, %vm4150_vm15  ;;  %vm4159_vm8 = vweird.f32 %v4140_v31 }
0x1805   : > { %v4145_v19 = vmul.f32 %v5507_v29, %v4144_v41  ;;  %v5230_v41 = vld [vmem:[%s6192_s0 + $0x148] sm:$0xff] }
0x1807   : > { %v4146_v32 = vmul.f32 0.5, %v4145_v19  ;;  %v4131_v33 = vpop.xlane.xlu2 %4130  ;;  %v5227_v19 = vld [vmem:[%s6192_s0 + $0x130] sm:$0xff] }
0x1808   : > { %v4137_v15 = vmul.f32 %v4131_v33, %v5853_v61  ;;  %v5225_v33 = vld [vmem:[%s6192_s0 + $0x120] sm:$0xff] }
0x1809   : > { %v4147_v54 = vsub.f32 1.5, %v4146_v32  ;;  %v5226_v32 = vld [vmem:[%s6192_s0 + $0x128] sm:$0xff] }
0x180a   : > { %v5509_v8 = vpop.eup %5508  ;;  %v4141_v52 = vadd.f32 1e-05, %v4137_v15  ;;  %v5223_v15 = vld [vmem:[%s6192_s0 + $0x110] sm:$0xff] }
0x180b   : > { %v4148_v37 = vmul.f32 %v5507_v29, %v4147_v54  ;;  %v4154_v58 = vmul.f32 %v5509_v8, %v4140_v31  ;;  %vm4160_vm7 = vweird.f32 %v5509_v8  ;;  %v5229_v31 = vld [vmem:[%s6192_s0 + $0x140] sm:$0xff]  ;;  %v5224_v54 = vld [vmem:[%s6192_s0 + $0x118] sm:$0xff] }
0x180c   : > { %5510 = vrsqrt.f32 %v4141_v52  ;;  %vm4161_vm9 = vmor %vm4159_vm8, %vm4160_vm7  ;;  %vm4169_vm11 = vweird.f32 %v4141_v52 }
0x180d   : > { %v4152_v43 = vsel %vm4151_vm6, %v5507_v29, %v4148_v37  ;;  %v4155_v49 = vmul.f32 %v5509_v8, %v4154_v58  ;;  %v5231_v29 = vld [vmem:[%s6192_s0 + $0x150] sm:$0xff]  ;;  %v5221_v37 = vld [vmem:[%s6192_s0 + $0x100] sm:$0xff] }
0x180e   : > { %v4183_v55 = vmul.f32 %v4152_v43, %v4115_v6  ;;  %4310 = vmatpush.msra.mxu3 %v5231_v29 }
0x180f   : > { %v4156_v40 = vmul.f32 0.5, %v4155_v49  ;;  %v4134_v51 = vpop.xlane.xlu0 %4133 }
0x1810   : > { %v4190_v46 = vmul.f32 %v5348_v42, %v4183_v55  ;;  %v4138_v5 = vmul.f32 %v4134_v51, %v5853_v61  ;;  %4311 = vmatpush.msra.mxu3 %v5230_v41  ;;  %v5351_v41 = vld [vmem:[%s6212_s24 + $0x2] ss:$0 sm:$0xff] }
0x1811   : > { %v4157_v63 = vsub.f32 1.5, %v4156_v40 }
0x1812   : > { %v4197_v60 = vadd.f32 %v5349_v36, %v4190_v46  ;;  %v5511_v2 = vpop.eup %5510  ;;  %v4142_v25 = vadd.f32 1e-05, %v4138_v5  ;;  %4312 = vmatpush.msra.mxu3 %v5229_v31 }
0x1813   : > { %v4158_v1 = vmul.f32 %v5509_v8, %v4157_v63  ;;  %v4164_v21 = vmul.f32 %v5511_v2, %v4141_v52  ;;  %vm4170_vm10 = vweird.f32 %v5511_v2  ;;  %v5350_v52 = vld [vmem:[%s6172_s22 + $0x2] ss:$0 sm:$0xff] }
0x1814   : > { %5217 = vmatmul.msk.f32.vlgmr.msra.gmra.mxu2 %vm1049_vm1, %v4197_v60  ;;  %5512 = vrsqrt.f32 %v4142_v25  ;;  %vm4171_vm12 = vmor %vm4169_vm11, %vm4170_vm10  ;;  %vm4179_vm14 = vweird.f32 %v4142_v25 }
0x1815   : > { %v4162_v6 = vsel %vm4161_vm9, %v5509_v8, %v4158_v1  ;;  %v4165_v11 = vmul.f32 %v5511_v2, %v4164_v21  ;;  %v5222_v8 = vld [vmem:[%s6192_s0 + $0x108] sm:$0xff] }
0x1816   : > { %v4184_v3 = vmul.f32 %v4162_v6, %v6851_v20 }
0x1817   : > { %v4166_v10 = vmul.f32 0.5, %v4165_v11 }
0x1818   : > { %v4191_v0 = vmul.f32 %v5348_v42, %v4184_v3 }
0x1819   : > { %v4167_v12 = vsub.f32 1.5, %v4166_v10 }
0x181a   : > { %v5513_v14 = vpop.eup %5512  ;;  %v4198_v48 = vadd.f32 %v5349_v36, %v4191_v0 }
0x181b   : > { %v4168_v38 = vmul.f32 %v5511_v2, %v4167_v12  ;;  %v4174_v45 = vmul.f32 %v5513_v14, %v4142_v25  ;;  %vm4180_vm13 = vweird.f32 %v5513_v14 }
0x181c   : > { %5218 = vmatmul.msk.f32.gmra.mxu2 %vm1049_vm1, %v4198_v48  ;;  %vm4181_vm0 = vmor %vm4179_vm14, %vm4180_vm13 }
0x181d   : > { %v4172_v18 = vsel %vm4171_vm12, %v5511_v2, %v4168_v38  ;;  %v4175_v56 = vmul.f32 %v5513_v14, %v4174_v45 }
0x181e   : > { %v4185_v22 = vmul.f32 %v4172_v18, %v6858_v17 }
0x181f   : > { %v4176_v62 = vmul.f32 0.5, %v4175_v56 }
0x1820   : > { %v4192_v20 = vmul.f32 %v5348_v42, %v4185_v22 }
0x1821   : > { %v4177_v23 = vsub.f32 1.5, %v4176_v62 }
0x1822   : > { %v4199_v39 = vadd.f32 %v5349_v36, %v4192_v20 }
0x1823   : > { %v4178_v53 = vmul.f32 %v5513_v14, %v4177_v23 }
0x1824   : > { %5219 = vmatmul.msk.f32.gmra.mxu2 %vm1049_vm1, %v4199_v39 }
0x1825   : > { %v4182_v13 = vsel %vm4181_vm0, %v5513_v14, %v4178_v53 }
0x1826   : > { %v4186_v16 = vmul.f32 %v4182_v13, %v6865_v59  ;;  %v5228_v59 = vld [vmem:[%s6192_s0 + $0x138] sm:$0xff] }
0x1827   : > { %4313 = vmatpush.msra.mxu3 %v5228_v59 }
0x1828   : > { %v4193_v17 = vmul.f32 %v5348_v42, %v4186_v16 }
0x1829   : > { %4314 = vmatpush.msra.mxu3 %v5227_v19 }
0x182a   : > { %v4200_v35 = vadd.f32 %v5349_v36, %v4193_v17 }
0x182b   : > { %4315 = vmatpush.msra.mxu3 %v5226_v32 }
0x182c   : > { %5220 = vmatmul.msk.f32.gmra.mxu2 %vm1049_vm1, %v4200_v35 }
0x182d   : > { %4316 = vmatpush.msra.mxu3 %v5225_v33 }
0x182f   : > { %4317 = vmatpush.msra.mxu3 %v5224_v54 }
0x1831   : > { %4318 = vmatpush.msra.mxu3 %v5223_v15 }
0x1833   : > { %4319 = vmatpush.msra.mxu3 %v5222_v8 }
0x1835   : > { %4320 = vmatpush.msra.mxu3 %v5221_v37 }
0x1897   : > { %v4240_v42 = vpop.f32.mrf.mxu2 }
0x1898   : > { %v4241_v58 = vadd.f32 %v5350_v52, %v4240_v42 }
0x189a   : > { %v4252_v43 = vmul.f32 %v4241_v58, %v4241_v58 }
0x189c   : > { %v4256_v47 = vmul.f32 %v4252_v43, %v4241_v58 }
0x189e   : > { %v4260_v50 = vmul.f32 0.044715, %v4256_v47 }
0x189f   : > { %v4243_v55 = vpop.f32.mrf.mxu2 }
0x18a0   : > { %v4264_v36 = vadd.f32 %v4260_v50, %v4241_v58  ;;  %v4244_v49 = vadd.f32 %v5350_v52, %v4243_v55 }
0x18a2   : > { %v4268_v27 = vmul.f32 0.7978846, %v4264_v36  ;;  %v4253_v46 = vmul.f32 %v4244_v49, %v4244_v49 }
0x18a4   : > { %5514 = vtanh.f32 %v4268_v27  ;;  %v4257_v40 = vmul.f32 %v4253_v46, %v4244_v49 }
0x18a6   : > { %v4261_v51 = vmul.f32 0.044715, %v4257_v40 }
0x18a7   : > { %v4246_v5 = vpop.f32.mrf.mxu2 }
0x18a8   : > { %v4265_v60 = vadd.f32 %v4261_v51, %v4244_v49  ;;  %v4247_v63 = vadd.f32 %v5350_v52, %v4246_v5 }
0x18aa   : > { %v5515_v2 = vpop.eup %5514  ;;  %v4254_v1 = vmul.f32 %v4247_v63, %v4247_v63  ;;  %v4269_v21 = vmul.f32 0.7978846, %v4265_v60 }
0x18ab   : > { %v4276_v25 = vadd.f32 1.0, %v5515_v2 }
0x18ac   : > { %v4258_v11 = vmul.f32 %v4254_v1, %v4247_v63  ;;  %5516 = vtanh.f32 %v4269_v21 }
0x18ad   : > { %v4280_v6 = vmul.f32 0.5, %v4276_v25 }
0x18ae   : > { %v4262_v10 = vmul.f32 0.044715, %v4258_v11 }
0x18af   : > { %v4284_v3 = vmul.f32 %v4280_v6, %v4241_v58  ;;  %v4249_v0 = vpop.f32.mrf.mxu2 }
0x18b0   : > { %v4266_v12 = vadd.f32 %v4262_v10, %v4247_v63  ;;  %v4250_v14 = vadd.f32 %v5350_v52, %v4249_v0 }
0x18b1   : > { %4321 = vmatmul.f32.vlgmr.msra.gmra.mxu3 %v4284_v3 }
0x18b2   : > { %v5517_v48 = vpop.eup %5516  ;;  %v4255_v38 = vmul.f32 %v4250_v14, %v4250_v14  ;;  %v4270_v45 = vmul.f32 0.7978846, %v4266_v12 }
0x18b3   : > { %v4277_v18 = vadd.f32 1.0, %v5517_v48 }
0x18b4   : > { %v4259_v56 = vmul.f32 %v4255_v38, %v4250_v14  ;;  %5518 = vtanh.f32 %v4270_v45 }
0x18b5   : > { %v4281_v22 = vmul.f32 0.5, %v4277_v18 }
0x18b6   : > { %v4263_v62 = vmul.f32 0.044715, %v4259_v56 }
0x18b7   : > { %v4285_v20 = vmul.f32 %v4281_v22, %v4244_v49 }
0x18b8   : > { %v4267_v23 = vadd.f32 %v4263_v62, %v4250_v14 }
0x18b9   : > { %4324 = vmatmul.f32.gmra.mxu3 %v4285_v20 }
0x18ba   : > { %v5519_v39 = vpop.eup %5518  ;;  %v4271_v53 = vmul.f32 0.7978846, %v4267_v23 }
0x18bb   : > { %v4278_v13 = vadd.f32 1.0, %v5519_v39 }
0x18bc   : > { %5520 = vtanh.f32 %v4271_v53 }
0x18bd   : > { %v4282_v16 = vmul.f32 0.5, %v4278_v13 }
0x18bf   : > { %v4286_v17 = vmul.f32 %v4282_v16, %v4247_v63 }
0x18c1   : > { %4327 = vmatmul.f32.gmra.mxu3 %v4286_v17 }
0x18c2   : > { %v5521_v35 = vpop.eup %5520 }
0x18c3   : > { %v4279_v7 = vadd.f32 1.0, %v5521_v35 }
0x18c5   : > { %v4283_v28 = vmul.f32 0.5, %v4279_v7 }
0x18c7   : > { %v4287_v29 = vmul.f32 %v4283_v28, %v4250_v14 }
0x18c9   : > { %4330 = vmatmul.f32.gmra.mxu3 %v4287_v29 }
0x1934   : > { %v4322_v31 = vpop.f32.mrf.mxu3 }
0x1935   : > { %v4334_v59 = vadd.f32 %v4322_v31, %v6827_v26 }
0x1937   : > { %v4343_v19 = vadd.f32 %v5351_v41, %v4334_v59 }
0x193c   : > { %v4325_v32 = vpop.f32.mrf.mxu3 }
0x193d   : > { %v4335_v33 = vadd.f32 %v4325_v32, %v6832_v9 }
0x193f   : > { %v4344_v54 = vadd.f32 %v5351_v41, %v4335_v33 }
0x1944   : > { %v4328_v15 = vpop.f32.mrf.mxu3 }
0x1945   : > { %v4336_v8 = vadd.f32 %v4328_v15, %v6837_v34 }
0x1947   : > { %v4345_v37 = vadd.f32 %v5351_v41, %v4336_v8 }
0x194b   : > { %4350 = sbr.rel (%p5238_p11) target bundleno = 6484 (0x1954), region = 104 }
0x194c   : > { %v4331_v52 = vpop.f32.mrf.mxu3 }
0x194d   : > { %v4337_v42 = vadd.f32 %v4331_v52, %v6842_v30 }
0x194f   : > { %v4346_v58 = vadd.f32 %v5351_v41, %v4337_v42 }
0x1950   : > { %4351 = vst.msk [vmem:[#allocation2] sm:$0xff] %vm1049_vm1, %v4343_v19 }
0x1951   : > { %4352 = vst.msk [vmem:[#allocation2 + $0x8] sm:$0xff] %vm1049_vm1, %v4344_v54 }
0x1952   : > { %4353 = vst.msk [vmem:[#allocation2 + $0x10] sm:$0xff] %vm1049_vm1, %v4345_v37 }
0x1953   : > { %4354 = vst.msk [vmem:[#allocation2 + $0x18] sm:$0xff] %vm1049_vm1, %v4346_v58 }
0x1954 PF: > { %p5239_p12 = scmp.ne.s32.totalorder %s5762_s15, 1 }
0x1956   : > { %4358 = sbr.rel (%p5239_p12) target bundleno = 7033 (0x1b79), region = 108 }
0x195b   : > { %v4365_v26 = vsel %vm1049_vm1, %v4345_v37, 0.0  ;;  %v4359_v9 = vsel %vm1049_vm1, %v4343_v19, 0.0  ;;  %v4368_v34 = vsel %vm1049_vm1, %v4346_v58, 0.0  ;;  %v4362_v30 = vsel %vm1049_vm1, %v4344_v54, 0.0 }
0x195c   : > { %4366 = vadd.xlane.f32.xlu1 %v4365_v26  ;;  %4360 = vadd.xlane.f32.xlu0 %v4359_v9 }
0x1964   : > { %4369 = vadd.xlane.f32.xlu1 %v4368_v34  ;;  %4363 = vadd.xlane.f32.xlu0 %v4362_v30 }
0x19cf   : > { %v4367_v43 = vpop.xlane.xlu1 %4366  ;;  %v4361_v47 = vpop.xlane.xlu0 %4360 }
0x19d0   : > { %v4373_v50 = vmul.f32 %v4367_v43, %v5853_v61  ;;  %v4371_v36 = vmul.f32 %v4361_v47, %v5853_v61 }
0x19d2   : > { %v6928_v55 = vsub.f32 %v4345_v37, %v4373_v50  ;;  %v4375_v49 = vsub.f32 %v4343_v19, %v4371_v36 }
0x19d4   : > { %v4381_v27 = vmul.f32 %v6928_v55, %v6928_v55  ;;  %v4379_v46 = vmul.f32 %v4375_v49, %v4375_v49 }
0x19d6   : > { %v4389_v40 = vsel %vm1049_vm1, %v4381_v27, 0.0  ;;  %v4383_v51 = vsel %vm1049_vm1, %v4379_v46, 0.0 }
0x19d7   : > { %v4370_v5 = vpop.xlane.xlu1 %4369  ;;  %4390 = vadd.xlane.f32.xlu0 %v4389_v40  ;;  %4384 = vadd.xlane.f32.xlu2 %v4383_v51  ;;  %v4364_v60 = vpop.xlane.xlu0 %4363 }
0x19d8   : > { %v4374_v63 = vmul.f32 %v4370_v5, %v5853_v61  ;;  %v4372_v2 = vmul.f32 %v4364_v60, %v5853_v61 }
0x19da   : > { %v6936_v25 = vsub.f32 %v4346_v58, %v4374_v63  ;;  %v6938_v1 = vsub.f32 %v4344_v54, %v4372_v2 }
0x19dc   : > { %v4382_v21 = vmul.f32 %v6936_v25, %v6936_v25  ;;  %v4380_v6 = vmul.f32 %v6938_v1, %v6938_v1 }
0x19de   : > { %v4392_v11 = vsel %vm1049_vm1, %v4382_v21, 0.0  ;;  %v4386_v3 = vsel %vm1049_vm1, %v4380_v6, 0.0 }
0x19df   : > { %4393 = vadd.xlane.f32.xlu1 %v4392_v11  ;;  %4387 = vadd.xlane.f32.xlu2 %v4386_v3 }
0x1a4a   : > { %v4385_v10 = vpop.xlane.xlu2 %4384  ;;  %v4391_v0 = vpop.xlane.xlu0 %4390 }
0x1a4b   : > { %v4395_v12 = vmul.f32 %v4385_v10, %v5853_v61  ;;  %v4397_v14 = vmul.f32 %v4391_v0, %v5853_v61 }
0x1a4d   : > { %v4399_v48 = vadd.f32 1e-05, %v4395_v12  ;;  %v4401_v38 = vadd.f32 1e-05, %v4397_v14 }
0x1a4f   : > { %5530 = vrsqrt.f32 %v4399_v48  ;;  %vm4409_vm4 = vweird.f32 %v4399_v48  ;;  %vm4429_vm5 = vweird.f32 %v4401_v38 }
0x1a50   : > { %5532 = vrsqrt.f32 %v4401_v38 }
0x1a52   : > { %v4394_v45 = vpop.xlane.xlu1 %4393  ;;  %v4388_v18 = vpop.xlane.xlu2 %4387 }
0x1a53   : > { %v4398_v56 = vmul.f32 %v4394_v45, %v5853_v61  ;;  %v4396_v22 = vmul.f32 %v4388_v18, %v5853_v61 }
0x1a55   : > { %v5531_v62 = vpop.eup %5530  ;;  %v4402_v20 = vadd.f32 1e-05, %v4398_v56  ;;  %v4400_v23 = vadd.f32 1e-05, %v4396_v22 }
0x1a56   : > { %v5533_v39 = vpop.eup %5532  ;;  %v4404_v53 = vmul.f32 %v5531_v62, %v4399_v48  ;;  %vm4410_vm2 = vweird.f32 %v5531_v62 }
0x1a57   : > { %v4424_v13 = vmul.f32 %v5533_v39, %v4401_v38  ;;  %5534 = vrsqrt.f32 %v4402_v20  ;;  %vm4430_vm3 = vweird.f32 %v5533_v39  ;;  %vm4411_vm15 = vmor %vm4409_vm4, %vm4410_vm2  ;;  %vm4439_vm9 = vweird.f32 %v4402_v20 }
0x1a58   : > { %v4405_v16 = vmul.f32 %v5531_v62, %v4404_v53  ;;  %5536 = vrsqrt.f32 %v4400_v23  ;;  %vm4431_vm6 = vmor %vm4429_vm5, %vm4430_vm3  ;;  %vm4419_vm11 = vweird.f32 %v4400_v23 }
0x1a59   : > { %v4425_v17 = vmul.f32 %v5533_v39, %v4424_v13 }
0x1a5a   : > { %v4406_v35 = vmul.f32 0.5, %v4405_v16 }
0x1a5b   : > { %v4426_v7 = vmul.f32 0.5, %v4425_v17 }
0x1a5c   : > { %v4407_v28 = vsub.f32 1.5, %v4406_v35 }
0x1a5d   : > { %v5535_v29 = vpop.eup %5534  ;;  %v4427_v41 = vsub.f32 1.5, %v4426_v7 }
0x1a5e   : > { %v5537_v31 = vpop.eup %5536  ;;  %v4434_v59 = vmul.f32 %v5535_v29, %v4402_v20  ;;  %v4408_v19 = vmul.f32 %v5531_v62, %v4407_v28  ;;  %vm4440_vm7 = vweird.f32 %v5535_v29 }
0x1a5f   : > { %v4414_v32 = vmul.f32 %v5537_v31, %v4400_v23  ;;  %v4428_v33 = vmul.f32 %v5533_v39, %v4427_v41  ;;  %vm4420_vm8 = vweird.f32 %v5537_v31  ;;  %vm4441_vm10 = vmor %vm4439_vm9, %vm4440_vm7 }
0x1a60   : > { %v4435_v54 = vmul.f32 %v5535_v29, %v4434_v59  ;;  %v4412_v15 = vsel %vm4411_vm15, %v5531_v62, %v4408_v19  ;;  %vm4421_vm12 = vmor %vm4419_vm11, %vm4420_vm8 }
0x1a61   : > { %v4415_v8 = vmul.f32 %v5537_v31, %v4414_v32  ;;  %v4443_v37 = vmul.f32 %v4412_v15, %v4375_v49  ;;  %v4432_v52 = vsel %vm4431_vm6, %v5533_v39, %v4428_v33 }
0x1a62   : > { %v4436_v42 = vmul.f32 0.5, %v4435_v54  ;;  %v4445_v58 = vmul.f32 %v4432_v52, %v6928_v55 }
0x1a63   : > { %v4416_v26 = vmul.f32 0.5, %v4415_v8  ;;  %v4447_v9 = vadd.f32 %v4443_v37, %v6631_v24 }
0x1a64   : > { %v4437_v34 = vsub.f32 1.5, %v4436_v42  ;;  %v4449_v30 = vadd.f32 %v4445_v58, %v6668_v57 }
0x1a65   : > { %v4417_v43 = vsub.f32 1.5, %v4416_v26  ;;  %v4451_v47 = vmul.f32 0.5, %v4447_v9 }
0x1a66   : > { %v4453_v50 = vmul.f32 0.5, %v4449_v30  ;;  %v4438_v36 = vmul.f32 %v5535_v29, %v4437_v34 }
0x1a67   : > { %v4455_v49 = vsel %vm1049_vm1, %v4451_v47, 0.0  ;;  %v4418_v27 = vmul.f32 %v5537_v31, %v4417_v43 }
0x1a68   : > { %4456 = vadd.xlane.f32.xlu2 %v4455_v49  ;;  %v4461_v55 = vsel %vm1049_vm1, %v4453_v50, 0.0  ;;  %v4442_v24 = vsel %vm4441_vm10, %v5535_v29, %v4438_v36 }
0x1a69   : > { %4462 = vadd.xlane.f32.xlu1 %v4461_v55  ;;  %v4446_v46 = vmul.f32 %v4442_v24, %v6936_v25  ;;  %v4422_v57 = vsel %vm4421_vm12, %v5537_v31, %v4418_v27 }
0x1a6a   : > { %v4444_v40 = vmul.f32 %v4422_v57, %v6938_v1 }
0x1a6b   : > { %v4450_v51 = vadd.f32 %v4446_v46, %v6682_v4 }
0x1a6c   : > { %v4448_v5 = vadd.f32 %v4444_v40, %v6654_v44 }
0x1a6d   : > { %v4454_v60 = vmul.f32 0.5, %v4450_v51 }
0x1a6e   : > { %v4452_v63 = vmul.f32 0.5, %v4448_v5 }
0x1a6f   : > { %v4464_v2 = vsel %vm1049_vm1, %v4454_v60, 0.0 }
0x1a70   : > { %4465 = vadd.xlane.f32.xlu2 %v4464_v2  ;;  %v4458_v21 = vsel %vm1049_vm1, %v4452_v63, 0.0 }
0x1a71   : > { %4459 = vadd.xlane.f32.xlu0 %v4458_v21 }
0x1adb   : > { %v4457_v6 = vpop.xlane.xlu2 %4456 }
0x1adc   : > { %v4467_v11 = vmul.f32 %v4457_v6, %v5853_v61  ;;  %v4463_v3 = vpop.xlane.xlu1 %4462 }
0x1add   : > { %v4469_v25 = vmul.f32 %v4463_v3, %v5853_v61 }
0x1ade   : > { %v4471_v10 = vsub.f32 %v4451_v47, %v4467_v11 }
0x1adf   : > { %v4473_v1 = vsub.f32 %v4453_v50, %v4469_v25 }
0x1ae0   : > { %v4475_v0 = vmul.f32 %v4471_v10, %v4471_v10 }
0x1ae1   : > { %v4477_v4 = vmul.f32 %v4473_v1, %v4473_v1 }
0x1ae2   : > { %v4479_v44 = vsel %vm1049_vm1, %v4475_v0, 0.0 }
0x1ae3   : > { %4480 = vadd.xlane.f32.xlu0 %v4479_v44  ;;  %v4466_v12 = vpop.xlane.xlu2 %4465  ;;  %v4485_v14 = vsel %vm1049_vm1, %v4477_v4, 0.0 }
0x1ae4   : > { %v4470_v48 = vmul.f32 %v4466_v12, %v5853_v61  ;;  %4486 = vadd.xlane.f32.xlu2 %v4485_v14  ;;  %v4460_v38 = vpop.xlane.xlu0 %4459 }
0x1ae5   : > { %v4468_v45 = vmul.f32 %v4460_v38, %v5853_v61 }
0x1ae6   : > { %v6967_v18 = vsub.f32 %v4454_v60, %v4470_v48 }
0x1ae7   : > { %v6969_v56 = vsub.f32 %v4452_v63, %v4468_v45 }
0x1ae8   : > { %v4478_v22 = vmul.f32 %v6967_v18, %v6967_v18 }
0x1ae9   : > { %v4476_v62 = vmul.f32 %v6969_v56, %v6969_v56 }
0x1aea   : > { %v4488_v20 = vsel %vm1049_vm1, %v4478_v22, 0.0 }
0x1aeb   : > { %4489 = vadd.xlane.f32.xlu0 %v4488_v20  ;;  %v4482_v23 = vsel %vm1049_vm1, %v4476_v62, 0.0 }
0x1aec   : > { %4483 = vadd.xlane.f32.xlu1 %v4482_v23 }
0x1b56   : > { %v4481_v39 = vpop.xlane.xlu0 %4480 }
0x1b57   : > { %v4487_v53 = vpop.xlane.xlu2 %4486  ;;  %v4491_v13 = vmul.f32 %v4481_v39, %v5853_v61 }
0x1b58   : > { %v4493_v16 = vmul.f32 %v4487_v53, %v5853_v61 }
0x1b59   : > { %v4495_v17 = vadd.f32 1e-05, %v4491_v13 }
0x1b5a   : > { %v4497_v35 = vadd.f32 1e-05, %v4493_v16 }
0x1b5b   : > { %5538 = vrsqrt.f32 %v4495_v17  ;;  %vm4505_vm0 = vweird.f32 %v4495_v17 }
0x1b5c   : > { %5540 = vrsqrt.f32 %v4497_v35  ;;  %vm4525_vm2 = vweird.f32 %v4497_v35 }
0x1b5e   : > { %v4490_v7 = vpop.xlane.xlu0 %4489 }
0x1b5f   : > { %v4484_v28 = vpop.xlane.xlu1 %4483  ;;  %v4494_v29 = vmul.f32 %v4490_v7, %v5853_v61 }
0x1b60   : > { %v4492_v41 = vmul.f32 %v4484_v28, %v5853_v61 }
0x1b61   : > { %v5539_v31 = vpop.eup %5538  ;;  %v4498_v59 = vadd.f32 1e-05, %v4494_v29 }
0x1b62   : > { %v5541_v19 = vpop.eup %5540  ;;  %v4500_v32 = vmul.f32 %v5539_v31, %v4495_v17  ;;  %v4496_v33 = vadd.f32 1e-05, %v4492_v41  ;;  %vm4506_vm13 = vweird.f32 %v5539_v31 }
0x1b63   : > { %v4520_v54 = vmul.f32 %v5541_v19, %v4497_v35  ;;  %5542 = vrsqrt.f32 %v4498_v59  ;;  %vm4526_vm14 = vweird.f32 %v5541_v19  ;;  %vm4507_vm3 = vmor %vm4505_vm0, %vm4506_vm13  ;;  %vm4535_vm6 = vweird.f32 %v4498_v59 }
0x1b64   : > { %v4501_v15 = vmul.f32 %v5539_v31, %v4500_v32  ;;  %5544 = vrsqrt.f32 %v4496_v33  ;;  %vm4527_vm4 = vmor %vm4525_vm2, %vm4526_vm14  ;;  %vm4515_vm7 = vweird.f32 %v4496_v33 }
0x1b65   : > { %v4521_v8 = vmul.f32 %v5541_v19, %v4520_v54 }
0x1b66   : > { %v4502_v37 = vmul.f32 0.5, %v4501_v15 }
0x1b67   : > { %v4522_v52 = vmul.f32 0.5, %v4521_v8 }
0x1b68   : > { %v4503_v42 = vsub.f32 1.5, %v4502_v37 }
0x1b69   : > { %v5543_v58 = vpop.eup %5542  ;;  %v4523_v26 = vsub.f32 1.5, %v4522_v52 }
0x1b6a   : > { %v5545_v9 = vpop.eup %5544  ;;  %v4504_v34 = vmul.f32 %v5539_v31, %v4503_v42  ;;  %v4530_v61 = vmul.f32 %v5543_v58, %v4498_v59  ;;  %vm4536_vm15 = vweird.f32 %v5543_v58 }
0x1b6b   : > { %v4524_v30 = vmul.f32 %v5541_v19, %v4523_v26  ;;  %v4510_v43 = vmul.f32 %v5545_v9, %v4496_v33  ;;  %vm4516_vm5 = vweird.f32 %v5545_v9  ;;  %vm4537_vm8 = vmor %vm4535_vm6, %vm4536_vm15 }
0x1b6c   : > { %v4508_v47 = vsel %vm4507_vm3, %v5539_v31, %v4504_v34  ;;  %v4531_v50 = vmul.f32 %v5543_v58, %v4530_v61  ;;  %vm4517_vm9 = vmor %vm4515_vm7, %vm4516_vm5 }
0x1b6d   : > { %v4528_v36 = vsel %vm4527_vm4, %v5541_v19, %v4524_v30  ;;  %v4539_v49 = vmul.f32 %v4508_v47, %v4471_v10  ;;  %v4511_v27 = vmul.f32 %v5545_v9, %v4510_v43 }
0x1b6e   : > { %v4541_v55 = vmul.f32 %v4528_v36, %v4473_v1  ;;  %v4532_v24 = vmul.f32 0.5, %v4531_v50 }
0x1b6f   : > { %4543 = vst.msk [vmem:[#allocation2] sm:$0xff] %vm1049_vm1, %v4539_v49  ;;  %v4512_v46 = vmul.f32 0.5, %v4511_v27 }
0x1b70   : > { %4545 = vst.msk [vmem:[#allocation2 + $0x10] sm:$0xff] %vm1049_vm1, %v4541_v55  ;;  %v4533_v57 = vsub.f32 1.5, %v4532_v24 }
0x1b71   : > { %v4513_v40 = vsub.f32 1.5, %v4512_v46 }
0x1b72   : > { %v4534_v51 = vmul.f32 %v5543_v58, %v4533_v57 }
0x1b73   : > { %v4514_v5 = vmul.f32 %v5545_v9, %v4513_v40 }
0x1b74   : > { %v4538_v60 = vsel %vm4537_vm8, %v5543_v58, %v4534_v51 }
0x1b75   : > { %v4518_v63 = vsel %vm4517_vm9, %v5545_v9, %v4514_v5  ;;  %v4542_v2 = vmul.f32 %v4538_v60, %v6967_v18 }
0x1b76   : > { %v4540_v21 = vmul.f32 %v4518_v63, %v6969_v56 }
0x1b77   : > { %4546 = vst.msk [vmem:[#allocation2 + $0x18] sm:$0xff] %vm1049_vm1, %v4542_v2 }
0x1b78   : > { %4544 = vst.msk [vmem:[#allocation2 + $0x8] sm:$0xff] %vm1049_vm1, %v4540_v21 }
0x1b79 PF: > { %s4547_s25 = sld [smem:[#allocation5]]  ;;  %vm4550_vm10 = vcmask 253952  }
0x1b7a   : > { %s5240_s2 = sld [smem:[#allocation5 + $0x1]] }
0x1b7b   : > { %s5241_s30 = sld [smem:[#allocation5 + $0x2]] }
0x1b7c   : > { %s5242_s21 = sld [smem:[#allocation5 + $0x3]] }
0x1b7d   : > { %s5243_s5 = sld [smem:[#allocation5 + $0x4]] }
0x1b7e   : > { %s5244_s29 = sld [smem:[#allocation5 + $0x5]] }
0x1b7f   : > { %s5245_s22 = sld [smem:[#allocation5 + $0x6]]  ;;  %s4548_s0 = scalar_lea.vmem [#allocation2], %s4547_s25 }
0x1b80   : > { %v4549_v6 = vld [vmem:[%s4548_s0] sm:$0x1]  ;;  %s5246_s24 = sld [smem:[#allocation5 + $0x7]]  ;;  %s4553_s6 = scalar_lea.vmem [#allocation2], %s5240_s2 }
0x1b81   : > { %4551 = vst.msk [vmem:[#allocation3] sm:$0x1] %vm4550_vm10, %v4549_v6  ;;  %v4554_v11 = vld [vmem:[%s4553_s6] sm:$0x1]  ;;  %s4557_s23 = scalar_lea.vmem [#allocation2], %s5241_s30 }
0x1b82   : > { %4555 = vst.msk [vmem:[#allocation3 + $0x1] sm:$0x1] %vm4550_vm10, %v4554_v11  ;;  %v4558_v3 = vld [vmem:[%s4557_s23] sm:$0x1]  ;;  %s4561_s4 = scalar_lea.vmem [#allocation2], %s5242_s21 }
0x1b83   : > { %4559 = vst.msk [vmem:[#allocation3 + $0x2] sm:$0x1] %vm4550_vm10, %v4558_v3  ;;  %v4562_v25 = vld [vmem:[%s4561_s4] sm:$0x1]  ;;  %s4565_s28 = scalar_lea.vmem [#allocation2], %s5243_s5 }
0x1b84   : > { %4563 = vst.msk [vmem:[#allocation3 + $0x3] sm:$0x1] %vm4550_vm10, %v4562_v25  ;;  %v4566_v10 = vld [vmem:[%s4565_s28] sm:$0x1]  ;;  %s4569_s7 = scalar_lea.vmem [#allocation2], %s5244_s29  ;;  %4582 = sbr.rel (%p5238_p11) target bundleno = 7186 (0x1c12), region = 112 }
0x1b85   : > { %4567 = vst.msk [vmem:[#allocation3 + $0x4] sm:$0x1] %vm4550_vm10, %v4566_v10  ;;  %v4570_v1 = vld [vmem:[%s4569_s7] sm:$0x1]  ;;  %s4573_s8 = scalar_lea.vmem [#allocation2], %s5245_s22 }
0x1b86   : > { %4571 = vst.msk [vmem:[#allocation3 + $0x5] sm:$0x1] %vm4550_vm10, %v4570_v1  ;;  %v4574_v0 = vld [vmem:[%s4573_s8] sm:$0x1]  ;;  %s4577_s26 = scalar_lea.vmem [#allocation2], %s5246_s24 }
0x1b87   : > { %4575 = vst.msk [vmem:[#allocation3 + $0x6] sm:$0x1] %vm4550_vm10, %v4574_v0  ;;  %v4578_v4 = vld [vmem:[%s4577_s26] sm:$0x1] }
0x1b88   : > { %4579 = vst.msk [vmem:[#allocation3 + $0x7] sm:$0x1] %vm4550_vm10, %v4578_v4 }
0x1b89   : > { %v4587_v44 = vld [vmem:[%s7072_s19 + $0x18] sm:$0xff]  ;;  %v4586_v12 = vld [vmem:[%s7072_s19 + $0x10] sm:$0xff]  ;;  %v4585_v14 = vld [vmem:[%s7072_s19 + $0x8] sm:$0xff] }
0x1b8a   : > { %4607 = vmatpush.msra.mxu0 %v4587_v44  ;;  %v4584_v48 = vld [vmem:[%s7072_s19] sm:$0xff] }
0x1b8b   : > { %v5546_v45 = vld [vmem:[%s7073_s20] ss:$0 sm:$0xff] }
0x1b8c   : > { %4608 = vmatpush.msra.mxu0 %v4586_v12 }
0x1b8e   : > { %4609 = vmatpush.msra.mxu0 %v4585_v14 }
0x1b8f   : > { %v4583_v38 = vld [vmem:[#allocation3] sm:$0xff] }
0x1b90   : > { %4610 = vmatpush.msra.mxu0 %v4584_v48 }
0x1b91   : > { %5248 = vmatmul.msk.f32.vlgmr.msra.gmra.mxu0 %vm1049_vm1, %v4583_v38 }
0x1c0e   : > { %v4612_v18 = vpop.f32.mrf.mxu0 }
0x1c0f   : > { %v4613_v56 = vadd.f32 %v5546_v45, %v4612_v18 }
0x1c11   : > { %4615 = vst.msk [vmem:[%s6910_s9] sm:$0xff] %vm1049_vm1, %v4613_v56 }
0x1c12 PF: > { %4618 = sbr.rel (%p5239_p12) target bundleno = 7194 (0x1c1a), region = 116 }
0x1c18   : > { %v4619_v22 = vld [vmem:[#allocation3] sm:$0xff] }
0x1c19   : > { %4620 = vst.msk [vmem:[%s6910_s9] sm:$0xff] %vm1049_vm1, %v4619_v22 }
0x1c1a PF: > { %s7120_s24 = sld [smem:[#allocation11_spill]]  ;;  %s5251_s23 = sshll.u32 %s5762_s15, 3 }
0x1c1b   : > { %s7122_s7 = sld [smem:[#allocation29_spill]]  ;;  %s4634_s26 = sshll.u32 %s6910_s9, 4  ;;  %s4635_s26 = int_to_ptr.vmem [resolvable:$true] %s4634_s26 }
0x1c20   : > { %s7123_s3 = sand.u32 1, %s7120_s24  }
0x1c21   : > { %s4632_s8 = scalar_lea.hbm %s7122_s7, %s5251_s23  ;;  %s4622_s25 = scalar_lea.sflag [#allocation7], %s7123_s3 }
0x1c22   : > { %s4636_s1 = sshll.u32 %s4632_s8, 4  ;;  %s5579_s15 = scalar_lea.hbm %s7122_s7, 16  ;;  %s4637_s1 = int_to_ptr.hbm [resolvable:$true] %s4636_s1 }
0x1c23   : > { %s5573_s2 = sshra.s32 %s4637_s1, 4  ;;  %s5574_s2 = int_to_ptr.hbm [resolvable:$true] %s5573_s2 }
0x1c24   : > { %s5575_s30 = scalar_lea.hbm %s5574_s2, 8  ;;  %p5580_p2 = scmp.lt.s32.totalorder %s5574_s2, %s7122_s7 }
0x1c25   : > { %p5576_p13 = scmp.ne.s32.totalorder %s5574_s2, %s5575_s30  ;;  %p5581_p3 = scmp.lt.s32.totalorder %s5579_s15, %s5575_s30 }
0x1c27   : > { %p5577_p0 = pnand %p5576_p13, %p5779_p5  ;;  %p5582_p4 = por %p5581_p3, %p5580_p2 }
0x1c29   : > { %p5578_p1 = pneg %p5577_p0 }
0x1c2b   : > { %p5583_p7 = pnand %p5582_p4, %p5578_p1 }
0x1c2d   : > { %5586 = shalt.err (!%p5583_p7)
}
0x1c2e   : > { %5266 = dma.vmem_to_hbm [thread:$0]  (%p5779_p5), %s4635_s26, 128, %s4637_s1, %s4622_s25  }
0x1c2f PF: > { %s7124_s9 = sld [smem:[#allocation13_spill]] }
0x1c30   : > { %s7125_s0 = sld [smem:[#allocation10_spill]] }
0x1c35   : > { %p5272_p8 = scmp.ge.s32.totalorder %s7124_s9, 2 }
0x1c36   : > { %s4648_s23 = sand.u32 1, %s7125_s0  }
0x1c37   : > { %p5269_p9 = pnand %p5272_p8, %p5783_p6  ;;  %s4649_s4 = scalar_lea.sflag [#allocation7], %s4648_s23 }
0x1c39   : > { %p5270_p10 = pneg %p5269_p9 }
0x1c3b   : > { %5606 = dma.done.wait (%p5270_p10), %s4649_s4, 128  }
0x1c3c   : > { %5608 = vsyncadd (%p5270_p10), %s4649_s4, 4294967168  ;;  %s7127_s0 = sld [smem:[#allocation14_spill]] }
0x1c3d   : > { %s7128_s3 = sld [smem:[#allocation11_spill]] }
0x1c3e   : > { %s7129_s28 = sld [smem:[#allocation12_spill]] }
0x1c3f   : > { %s7130_s29 = sld [smem:[#allocation15_spill]] }
0x1c42   : > { %p39_p11 = scmp.ge.s32.totalorder %s7127_s0, 4  }
0x1c44   :  { %41 = sbr.rel (!%p39_p11) target bundleno = 27 (0x1b), region = 264 }
0x1c49   :  { %4655 = vsyncpa [#allocation7], 1 }
0x1c4a   :  { %4657 = vsyncpa [#allocation7 + $0x1], 1 }

</bundles_post_ra>
